<compile_context>
chip_gen: v5e
topology: v5e:2x2
jax: 0.10.0
libtpu: 0.0.40
codegen_flags: <defaults>
</compile_context>

<pallas_src>
import functools
import math

import jax
import jax.numpy as jnp
from jax import lax
from jax.experimental import pallas as pl
from jax.experimental.pallas import tpu as pltpu


def _split_heads(x2d, seq, heads, head_dim):
    """(S, E) -> (H, S, Dh) with a single lane-layout-aware relayout."""
    x3 = x2d.reshape(seq, heads, head_dim)
    einshape = getattr(pltpu, "einshape", None)
    if einshape is not None:
        return einshape("shd->hsd", x3)
    return jnp.transpose(x3, (1, 0, 2))


def _merge_heads(x3d, seq, heads, head_dim):
    """(H, S, Dh) -> (S, E) with a single lane-layout-aware relayout."""
    einshape = getattr(pltpu, "einshape", None)
    if einshape is not None:
        x3 = einshape("hsd->shd", x3d)
    else:
        x3 = jnp.transpose(x3d, (1, 0, 2))
    return x3.reshape(seq, heads * head_dim)


def _attention_kernel(x_ref, wqkv_ref, bqkv_ref, wout_ref, bout_ref, o_ref,
                      qkv_ref, attn_ref, *, bt, seq, heads, head_dim, mxu_dtype):
    E = heads * head_dim

    # ---- fused QKV in-projection over all bt*S rows (one tall MXU matmul).
    # 1/sqrt(Dh) is already folded into the q slice of W_in^T / b_in.
    qkv = jnp.dot(x_ref[...].astype(mxu_dtype), wqkv_ref[...],
                  preferred_element_type=jnp.float32)
    qkv_ref[...] = (qkv + bqkv_ref[0]).astype(qkv_ref.dtype)

    # ---- attention core, one batch element at a time through VMEM scratch so
    # only a single element's (H, S, S) scores are live at any point.
    def body(b, carry):
        qkv_b = qkv_ref[pl.ds(b * seq, seq), :]               # (S, 3E)
        qh = _split_heads(qkv_b[:, 0 * E:1 * E], seq, heads, head_dim)
        kh = _split_heads(qkv_b[:, 1 * E:2 * E], seq, heads, head_dim)
        vh = _split_heads(qkv_b[:, 2 * E:3 * E], seq, heads, head_dim)

        # All heads batched into one dot_general (no explicit k^T).
        # NOTE: QK^T contracts over Dh (<128) so MXU occupancy is partial here;
        # the high-K projections above/below dominate ViT FLOPs.
        s = jnp.einsum("hqd,hkd->hqk", qh, kh,
                       preferred_element_type=jnp.float32)     # (H, S, S) f32

        # Numerically stable softmax in f32; EUP approx reciprocal for the
        # denominator (error ~2^-12, well inside the module's tolerance).
        s = s - jnp.max(s, axis=-1, keepdims=True)
        p = jnp.exp(s)
        p = p * pl.reciprocal(jnp.sum(p, axis=-1, keepdims=True), approx=True)
        # TODO(synk): attention dropout (p=0.1) is train-only; eval forward omits it.
        # TODO(synk): for long sequences (S >= ~512) tile KV with an online-softmax
        # (flash) accumulator in VMEM scratch instead of materializing (H, S, S).

        o = jnp.einsum("hqk,hkd->hqd", p.astype(mxu_dtype), vh,
                       preferred_element_type=jnp.float32)     # (H, S, Dh) f32
        attn_ref[pl.ds(b * seq, seq), :] = _merge_heads(
            o, seq, heads, head_dim).astype(attn_ref.dtype)
        return carry

    lax.fori_loop(0, bt, body, 0, unroll=True)

    # ---- output projection over all bt*S rows; single lane-dense store.
    out = jnp.dot(attn_ref[...], wout_ref[...],
                  preferred_element_type=jnp.float32)
    o_ref[...] = (out + bout_ref[0]).astype(o_ref.dtype)


def _estimate_vmem_bytes(bt, seq, emb, heads, x_itemsize, mxu_itemsize):
    """Rough per-grid-step VMEM working-set estimate (bytes)."""
    rows = bt * seq
    io = 2 * (2 * rows * emb * x_itemsize)               # x + out tiles, double-buffered
    weights = (3 * emb * emb + emb * emb) * mxu_itemsize + 4 * emb * 4  # single-buffered
    scratch = rows * 3 * emb * mxu_itemsize + rows * emb * mxu_itemsize
    qkv_tmp = rows * 3 * emb * 4                          # f32 projection result
    scores = 2 * heads * seq * seq * 4                    # s + p for one live element
    head_tmp = 3 * seq * emb * mxu_itemsize + seq * emb * 4
    out_tmp = rows * emb * 4
    return io + weights + scratch + qkv_tmp + scores + head_tmp + out_tmp


def _pick_batch_tile(B, seq, emb, heads, *, block_b, x_itemsize, mxu_itemsize,
                     vmem_budget):
    # Block's second-to-last dim (bt*S) must be divisible by 8 or cover the
    # full (B*S) extent; also cap the working set by the VMEM budget.
    cands = [d for d in range(1, B + 1)
             if B % d == 0 and d <= max(block_b, 1)
             and ((d * seq) % 8 == 0 or d == B)]
    if not cands:
        cands = [B]
    fits = [d for d in cands
            if _estimate_vmem_bytes(d, seq, emb, heads,
                                    x_itemsize, mxu_itemsize) <= vmem_budget]
    cands = fits or [min(cands)]
    even_steps = [d for d in cands if (B // d) % 2 == 0]  # balanced megacore split
    multi_steps = [d for d in cands if B // d >= 2]
    pool = even_steps or multi_steps or cands
    return max(pool)


def mha_attention(x, w_in, b_in, w_out, b_out, *, heads: int,
                  mxu_dtype=jnp.bfloat16, block_b: int = 8):
    """Batch-first MHA; numerics match torch.nn.MultiheadAttention (eval).

    w_in: (3E, E), b_in: (3E,), w_out: (E, E), b_out: (E,) -- torch layouts.
    mxu_dtype: dtype of the MXU operands.  bf16 is the default (fast path on
      all of v5e/v6e/v7x); matmul accumulation and softmax stay float32.
      Pass jnp.float32 for exact (non-downcast) operands.
    """
    B, S, E = x.shape
    assert E % heads == 0
    head_dim = E // heads

    # One-time wrapper-side preprocessing (cached with the params in a real
    # model): pre-transpose so the kernel computes x @ W directly, and fold the
    # 1/sqrt(head_dim) attention scale into the q projection weight/bias.
    scale = 1.0 / math.sqrt(head_dim)
    w_in_t = jnp.asarray(w_in).T                                  # (E, 3E)
    w_in_t = w_in_t.at[:, :E].multiply(scale)
    b_in_s = jnp.asarray(b_in).at[:E].multiply(scale)
    w_out_t = jnp.asarray(w_out).T                                # (E, E)

    w_in_t = w_in_t.astype(mxu_dtype)
    w_out_t = w_out_t.astype(mxu_dtype)
    b_in2 = b_in_s.reshape(1, 3 * E).astype(jnp.float32)
    b_out2 = jnp.asarray(b_out).reshape(1, E).astype(jnp.float32)

    x_itemsize = jnp.dtype(x.dtype).itemsize
    mxu_itemsize = jnp.dtype(mxu_dtype).itemsize

    # VMEM capacity: query the chip when possible (v7x only has 64 MiB / TC).
    try:
        vmem_cap = int(pltpu.get_tpu_info().vmem_capacity_bytes)
    except Exception:
        vmem_cap = 64 * 1024 * 1024

    bt = _pick_batch_tile(B, S, E, heads, block_b=block_b,
                          x_itemsize=x_itemsize, mxu_itemsize=mxu_itemsize,
                          vmem_budget=int(0.6 * vmem_cap))
    grid = (B // bt,)

    est = _estimate_vmem_bytes(bt, S, E, heads, x_itemsize, mxu_itemsize)
    vmem_limit = int(min(0.85 * vmem_cap, max(32 * 1024 * 1024, 1.5 * est)))

    kernel = functools.partial(_attention_kernel, bt=bt, seq=S, heads=heads,
                               head_dim=head_dim, mxu_dtype=mxu_dtype)

    def _param_spec(shape):
        # Grid-invariant parameter: constant index_map, single-buffered.
        ndim = len(shape)
        return pl.BlockSpec(shape, lambda b: (0,) * ndim,
                            pipeline_mode=pl.Buffered(1))

    flops = 2 * B * S * E * (4 * E + 2 * S)
    bytes_accessed = (2 * B * S * E * x_itemsize
                      + (3 * E * E + E * E) * mxu_itemsize + 4 * E * 4)
    cost = pl.CostEstimate(flops=flops,
                           transcendentals=B * heads * S * S,
                           bytes_accessed=bytes_accessed)

    x2d = x.reshape(B * S, E)   # lane/sublane-dense slab for the in/out tiles

    out2d = pl.pallas_call(
        kernel,
        out_shape=jax.ShapeDtypeStruct((B * S, E), x.dtype),
        grid_spec=pltpu.PrefetchScalarGridSpec(
            num_scalar_prefetch=0,
            grid=grid,
            in_specs=[
                pl.BlockSpec((bt * S, E), lambda b: (b, 0)),      # x tile
                _param_spec((E, 3 * E)),                          # W_in^T (q pre-scaled)
                _param_spec((1, 3 * E)),                          # b_in (q pre-scaled)
                _param_spec((E, E)),                              # W_out^T
                _param_spec((1, E)),                              # b_out
            ],
            out_specs=pl.BlockSpec((bt * S, E), lambda b: (b, 0)),
            scratch_shapes=[
                pltpu.VMEM((bt * S, 3 * E), mxu_dtype),           # QKV rows
                pltpu.VMEM((bt * S, E), mxu_dtype),               # attention rows
            ],
        ),
        compiler_params=pltpu.CompilerParams(
            dimension_semantics=("parallel",),
            vmem_limit_bytes=vmem_limit),
        cost_estimate=cost,
    )(x2d, w_in_t, b_in2, w_out_t, b_out2)

    return out2d.reshape(B, S, E)


def mha_attention_ref(x, w_in, b_in, w_out, b_out, *, heads: int):
    """Pure-JAX reference for verification."""
    B, S, E = x.shape
    Dh = E // heads
    qkv = jnp.einsum("bse,fe->bsf", x, w_in) + b_in
    q, k, v = jnp.split(qkv, 3, axis=-1)
    q = q.reshape(B, S, heads, Dh).transpose(0, 2, 1, 3)
    k = k.reshape(B, S, heads, Dh).transpose(0, 2, 1, 3)
    v = v.reshape(B, S, heads, Dh).transpose(0, 2, 1, 3)
    s = jnp.einsum("bhqd,bhkd->bhqk", q, k) / math.sqrt(Dh)
    p = jax.nn.softmax(s, axis=-1)
    o = jnp.einsum("bhqk,bhkd->bhqd", p, v)
    o = o.transpose(0, 2, 1, 3).reshape(B, S, E)
    return jnp.einsum("bse,fe->bsf", o, w_out) + b_out


if __name__ == "__main__":
    # Small shapes consistent with the module: d_model divisible by heads.
    B, S, D_MODEL, HEADS = 2, 16, 256, 8

    key = jax.random.PRNGKey(0)
    kx, k1, k2, k3, k4 = jax.random.split(key, 5)

    x = jax.random.normal(kx, (B, S, D_MODEL), dtype=jnp.float32)

    # Deterministic synthetic parameters (shapes mirror nn.MultiheadAttention).
    in_proj_weight = 0.02 * jax.random.normal(k1, (3 * D_MODEL, D_MODEL), jnp.float32)
    in_proj_bias = 0.02 * jax.random.normal(k2, (3 * D_MODEL,), jnp.float32)
    out_proj_weight = 0.02 * jax.random.normal(k3, (D_MODEL, D_MODEL), jnp.float32)
    out_proj_bias = 0.02 * jax.random.normal(k4, (D_MODEL,), jnp.float32)

    ref = mha_attention_ref(x, in_proj_weight, in_proj_bias,
                            out_proj_weight, out_proj_bias, heads=HEADS)
    ref_scale = jnp.max(jnp.abs(ref))

    # f32 MXU operands (exact path apart from the approx softmax reciprocal).
    out_f32 = mha_attention(x, in_proj_weight, in_proj_bias,
                            out_proj_weight, out_proj_bias,
                            heads=HEADS, mxu_dtype=jnp.float32)
    out_f32 = jax.block_until_ready(out_f32)
    assert out_f32.shape == (B, S, D_MODEL)
    err_f32 = float(jnp.max(jnp.abs(out_f32 - ref)) / ref_scale)
    assert err_f32 < 5e-3, f"f32 mismatch vs reference: rel err {err_f32}"

    # bf16 MXU operands (default fast path); accumulation & softmax stay f32.
    out_bf16 = mha_attention(x, in_proj_weight, in_proj_bias,
                             out_proj_weight, out_proj_bias, heads=HEADS)
    out_bf16 = jax.block_until_ready(out_bf16)
    err_bf16 = float(jnp.max(jnp.abs(out_bf16 - ref)) / ref_scale)
    assert err_bf16 < 5e-2, f"bf16 mismatch vs reference: rel err {err_bf16}"

    print("KERNEL_OK")
</pallas_src>

<mosaic_0001>
module attributes {stable_mosaic.version = 11 : i64} {
  func.func @_attention_kernel(%arg0: i32, %arg1: memref<16x256xf32, #tpu.memory_space<vmem>>, %arg2: memref<256x768xf32, #tpu.memory_space<vmem>>, %arg3: memref<1x768xf32, #tpu.memory_space<vmem>>, %arg4: memref<256x256xf32, #tpu.memory_space<vmem>>, %arg5: memref<1x256xf32, #tpu.memory_space<vmem>>, %arg6: memref<16x256xf32, #tpu.memory_space<vmem>>, %arg7: memref<16x768xf32, #tpu.memory_space<vmem>>, %arg8: memref<16x256xf32, #tpu.memory_space<vmem>>) attributes {dimension_semantics = [#tpu.dimension_semantics<parallel>], iteration_bounds = array<i64: 2>, scalar_prefetch = 0 : i64, scratch_operands = 2 : i64, tpu.core_type = #tpu.core_type<tc>, window_params = [{transform_indices = @transform_0, window_bounds = array<i64: 16, 256>}, {pipeline_mode = #tpu.pipeline_mode<synchronous>, transform_indices = @transform_1, window_bounds = array<i64: 256, 768>}, {pipeline_mode = #tpu.pipeline_mode<synchronous>, transform_indices = @transform_2, window_bounds = array<i64: 1, 768>}, {pipeline_mode = #tpu.pipeline_mode<synchronous>, transform_indices = @transform_3, window_bounds = array<i64: 256, 256>}, {pipeline_mode = #tpu.pipeline_mode<synchronous>, transform_indices = @transform_4, window_bounds = array<i64: 1, 256>}, {transform_indices = @transform_5, window_bounds = array<i64: 16, 256>}]} {
    %c0 = arith.constant 0 : index
    %c0_0 = arith.constant 0 : index
    %0 = vector.load %arg1[%c0, %c0_0] : memref<16x256xf32, #tpu.memory_space<vmem>>, vector<16x256xf32>
    %c0_1 = arith.constant 0 : index
    %c0_2 = arith.constant 0 : index
    %1 = vector.load %arg2[%c0_1, %c0_2] : memref<256x768xf32, #tpu.memory_space<vmem>>, vector<256x768xf32>
    %cst = arith.constant dense<0.000000e+00> : vector<16x768xf32>
    %2 = tpu.matmul %0, %1, %cst {dimension_numbers = #tpu.dot_dimension_numbers<[1], [0], [0], [1], [0, 0, 1, 1], [], []>} : vector<16x256xf32>, vector<256x768xf32>, vector<16x768xf32> -> vector<16x768xf32>
    %c0_3 = arith.constant 0 : index
    %c0_4 = arith.constant 0 : index
    %3 = vector.load %arg3[%c0_3, %c0_4] : memref<1x768xf32, #tpu.memory_space<vmem>>, vector<1x768xf32>
    %4 = vector.shape_cast %3 : vector<1x768xf32> to vector<768xf32>
    %5 = vector.shape_cast %4 : vector<768xf32> to vector<1x768xf32>
    %6 = vector.broadcast %5 : vector<1x768xf32> to vector<16x768xf32>
    %7 = arith.addf %2, %6 : vector<16x768xf32>
    %c0_5 = arith.constant 0 : index
    %c0_6 = arith.constant 0 : index
    %8 = vector.load %arg7[%c0_5, %c0_6] : memref<16x768xf32, #tpu.memory_space<vmem>>, vector<16x768xf32>
    tpu.vector_store %arg7[%c0_5, %c0_6], %7 {strides = array<i32>} : memref<16x768xf32, #tpu.memory_space<vmem>>, vector<16x768xf32>,
    %c0_i32 = arith.constant 0 : i32
    %c16_i32 = arith.constant 16 : i32
    %9 = arith.muli %c0_i32, %c16_i32 : i32
    %10 = arith.index_cast %9 : i32 to index
    %c0_7 = arith.constant 0 : index
    %11 = vector.load %arg7[%10, %c0_7] : memref<16x768xf32, #tpu.memory_space<vmem>>, vector<16x768xf32>
    %12 = vector.extract_strided_slice %11 {offsets = [0, 0], sizes = [16, 256], strides = [1, 1]} : vector<16x768xf32> to vector<16x256xf32>
    %13 = vector.shape_cast %12 : vector<16x256xf32> to vector<16x8x32xf32>
    %14 = tpu.transpose %13, [1, 0, 2] : vector<16x8x32xf32> -> vector<8x16x32xf32>
    %15 = vector.extract_strided_slice %11 {offsets = [0, 256], sizes = [16, 256], strides = [1, 1]} : vector<16x768xf32> to vector<16x256xf32>
    %16 = vector.shape_cast %15 : vector<16x256xf32> to vector<16x8x32xf32>
    %17 = tpu.transpose %16, [1, 0, 2] : vector<16x8x32xf32> -> vector<8x16x32xf32>
    %18 = vector.extract_strided_slice %11 {offsets = [0, 512], sizes = [16, 256], strides = [1, 1]} : vector<16x768xf32> to vector<16x256xf32>
    %19 = vector.shape_cast %18 : vector<16x256xf32> to vector<16x8x32xf32>
    %20 = tpu.transpose %19, [1, 0, 2] : vector<16x8x32xf32> -> vector<8x16x32xf32>
    "tpu.trace_start"() <{level = 10 : i32, message = "hqd,hkd->hqk"}> : () -> ()
    %cst_8 = arith.constant dense<0.000000e+00> : vector<8x16x16xf32>
    %21 = tpu.matmul %14, %17, %cst_8 {dimension_numbers = #tpu.dot_dimension_numbers<[2], [2], [1], [1], [0, 0, 0, 1, 1, 1], [0], [0]>} : vector<8x16x32xf32>, vector<8x16x32xf32>, vector<8x16x16xf32> -> vector<8x16x16xf32>
    "tpu.trace_stop"() : () -> ()
    %cst_9 = arith.constant dense<0xFF800000> : vector<8x16xf32>
    %22 = vector.multi_reduction <maximumf>, %21, %cst_9 [2] : vector<8x16x16xf32> to vector<8x16xf32>
    %23 = vector.shape_cast %22 : vector<8x16xf32> to vector<8x16x1xf32>
    %24 = vector.broadcast %23 : vector<8x16x1xf32> to vector<8x16x16xf32>
    %25 = arith.subf %21, %24 : vector<8x16x16xf32>
    %26 = math.exp %25 : vector<8x16x16xf32>
    %cst_10 = arith.constant dense<0.000000e+00> : vector<8x16xf32>
    %27 = vector.multi_reduction <add>, %26, %cst_10 [2] : vector<8x16x16xf32> to vector<8x16xf32>
    %28 = vector.shape_cast %27 : vector<8x16xf32> to vector<8x16x1xf32>
    %29 = tpu.reciprocal %28 {approx = true} : vector<8x16x1xf32> -> vector<8x16x1xf32>
    %30 = vector.broadcast %29 : vector<8x16x1xf32> to vector<8x16x16xf32>
    %31 = arith.mulf %26, %30 : vector<8x16x16xf32>
    "tpu.trace_start"() <{level = 10 : i32, message = "hqk,hkd->hqd"}> : () -> ()
    %cst_11 = arith.constant dense<0.000000e+00> : vector<8x16x32xf32>
    %32 = tpu.matmul %31, %20, %cst_11 {dimension_numbers = #tpu.dot_dimension_numbers<[2], [1], [1], [2], [0, 0, 0, 1, 1, 2], [0], [0]>} : vector<8x16x16xf32>, vector<8x16x32xf32>, vector<8x16x32xf32> -> vector<8x16x32xf32>
    "tpu.trace_stop"() : () -> ()
    %33 = tpu.transpose %32, [1, 0, 2] : vector<8x16x32xf32> -> vector<16x8x32xf32>
    %34 = vector.shape_cast %33 : vector<16x8x32xf32> to vector<16x256xf32>
    %c16_i32_12 = arith.constant 16 : i32
    %35 = arith.muli %c0_i32, %c16_i32_12 : i32
    %36 = arith.index_cast %35 : i32 to index
    %c0_13 = arith.constant 0 : index
    %37 = vector.load %arg8[%36, %c0_13] : memref<16x256xf32, #tpu.memory_space<vmem>>, vector<16x256xf32>
    tpu.vector_store %arg8[%36, %c0_13], %34 {strides = array<i32>} : memref<16x256xf32, #tpu.memory_space<vmem>>, vector<16x256xf32>,
    %c1_i32 = arith.constant 1 : i32
    %c0_14 = arith.constant 0 : index
    %c0_15 = arith.constant 0 : index
    %38 = vector.load %arg8[%c0_14, %c0_15] : memref<16x256xf32, #tpu.memory_space<vmem>>, vector<16x256xf32>
    %c0_16 = arith.constant 0 : index
    %c0_17 = arith.constant 0 : index
    %39 = vector.load %arg4[%c0_16, %c0_17] : memref<256x256xf32, #tpu.memory_space<vmem>>, vector<256x256xf32>
    %cst_18 = arith.constant dense<0.000000e+00> : vector<16x256xf32>
    %40 = tpu.matmul %38, %39, %cst_18 {dimension_numbers = #tpu.dot_dimension_numbers<[1], [0], [0], [1], [0, 0, 1, 1], [], []>} : vector<16x256xf32>, vector<256x256xf32>, vector<16x256xf32> -> vector<16x256xf32>
    %c0_19 = arith.constant 0 : index
    %c0_20 = arith.constant 0 : index
    %41 = vector.load %arg5[%c0_19, %c0_20] : memref<1x256xf32, #tpu.memory_space<vmem>>, vector<1x256xf32>
    %42 = vector.shape_cast %41 : vector<1x256xf32> to vector<256xf32>
    %43 = vector.shape_cast %42 : vector<256xf32> to vector<1x256xf32>
    %44 = vector.broadcast %43 : vector<1x256xf32> to vector<16x256xf32>
    %45 = arith.addf %40, %44 : vector<16x256xf32>
    %c0_21 = arith.constant 0 : index
    %c0_22 = arith.constant 0 : index
    %46 = vector.load %arg6[%c0_21, %c0_22] : memref<16x256xf32, #tpu.memory_space<vmem>>, vector<16x256xf32>
    tpu.vector_store %arg6[%c0_21, %c0_22], %45 {strides = array<i32>} : memref<16x256xf32, #tpu.memory_space<vmem>>, vector<16x256xf32>,
    return
  }
  func.func @transform_0(%arg0: i32) -> (i32, i32) {
    %c0_i32 = arith.constant 0 : i32
    %c0_i32_0 = arith.constant 0 : i32
    return %arg0, %c0_i32 : i32, i32
  }
  func.func @transform_1(%arg0: i32) -> (i32, i32) {
    %c0_i32 = arith.constant 0 : i32
    %c0_i32_0 = arith.constant 0 : i32
    %c0_i32_1 = arith.constant 0 : i32
    return %c0_i32, %c0_i32_0 : i32, i32
  }
  func.func @transform_2(%arg0: i32) -> (i32, i32) {
    %c0_i32 = arith.constant 0 : i32
    %c0_i32_0 = arith.constant 0 : i32
    %c0_i32_1 = arith.constant 0 : i32
    return %c0_i32, %c0_i32_0 : i32, i32
  }
  func.func @transform_3(%arg0: i32) -> (i32, i32) {
    %c0_i32 = arith.constant 0 : i32
    %c0_i32_0 = arith.constant 0 : i32
    %c0_i32_1 = arith.constant 0 : i32
    return %c0_i32, %c0_i32_0 : i32, i32
  }
  func.func @transform_4(%arg0: i32) -> (i32, i32) {
    %c0_i32 = arith.constant 0 : i32
    %c0_i32_0 = arith.constant 0 : i32
    %c0_i32_1 = arith.constant 0 : i32
    return %c0_i32, %c0_i32_0 : i32, i32
  }
  func.func @transform_5(%arg0: i32) -> (i32, i32) {
    %c0_i32 = arith.constant 0 : i32
    %c0_i32_0 = arith.constant 0 : i32
    return %arg0, %c0_i32 : i32, i32
  }
}

</mosaic_0001>

<bundles_post_ra>
// kernel: tpu_custom_call.1
= control target key start
LH: loop header
LB: loop body
LE: loop exit
PB: predicated region body
PF: predicated region fallthrough
CT: control target
= control target key end

     0   :  { %10 = vsyncpa [#allocation5], 0  ;;  %s5866_s0 = inlined_call_operand.hbm [shape: f32[32,256], index: 0, kind: input, shape index: {}]   ;;  %s5867_s1 = inlined_call_operand.hbm [shape: f32[256,768], index: 1, kind: input, shape index: {}]   ;;  %s5868_s2 = inlined_call_operand.hbm [shape: f32[1,768], index: 2, kind: input, shape index: {}]   ;;  %s5869_s3 = inlined_call_operand.hbm [shape: f32[256,256], index: 3, kind: input, shape index: {}]   ;;  %s5870_s4 = inlined_call_operand.vmem [shape: f32[1,256], index: 4, kind: input, shape index: {}]   ;;  %s5871_s5 = inlined_call_operand.hbm [shape: f32[32,256], index: 5, kind: output, shape index: {}]  }
   0x1   :  { %12 = vsyncpa [#allocation5 + $0x1], 0 }
   0x2   :  { %13 = vsyncpa [#allocation8], 0 }
   0x3   :  { %14 = vsyncpa [#allocation11], 0 }
   0x4   :  { %15 = vsyncpa [#allocation6], 0 }
   0x5   :  { %17 = vsyncpa [#allocation6 + $0x1], 0  ;;  %s4290_s18 = smov 0   ;;  %s4292_s19 = smov 0  }
   0x6   :  { %s4294_s20 = smov 0   ;;  %s4296_s21 = smov 0  }
   0x7 LB: > { %s4311_s22 = sadd.s32 4294967295, %s4244_s21   ;;  %s3764_s23 = sadd.s32 4294967294, %s4244_s21   ;;  %s4244_s21 = sphi %s4296_s21, %s5899_s21   ;;  %s4240_s20 = sphi %s4294_s20, %s5898_s20   ;;  %s4236_s19 = sphi %s4292_s19, %s5897_s19   ;;  %s4232_s18 = sphi %s4290_s18, %s5896_s18  }
   0x8   : > { %p43_p0 = scmp.ne.s32.totalorder %s4236_s19, %s4232_s18  ;;  %p44_p1 = scmp.eq.s32.totalorder %s4311_s22, 0 }
   0x9   : > { %p151_p2 = scmp.eq.s32.totalorder %s4311_s22, 1  ;;  %p157_p3 = scmp.eq.s32.totalorder %s3764_s23, 1 }
   0xa   : > { %p4320_p4 = por %p44_p1, %p43_p0  ;;  %p3765_p5 = scmp.ge.s32.totalorder %s4244_s21, 1 }
   0xb   : > { %p4325_p6 = por %p157_p3, %p43_p0  ;;  %p164_p7 = scmp.lt.s32.totalorder %s4244_s21, 3 }
   0xc   : > { %s175_s28 = sshll.u32 %s5867_s1, 4  ;;  %s4246_s30 = smov [#allocation7]   ;;  %s176_s28 = int_to_ptr.hbm [resolvable:$true] %s175_s28 }
   0xd   : > { %p4333_p8 = pnand %p3765_p5, %p164_p7  ;;  %s177_s6 = sshll.u32 %s4246_s30, 4  ;;  %s178_s6 = int_to_ptr.vmem [resolvable:$true] %s177_s6 }
   0xe   : > { %s190_s10 = sshll.u32 %s5868_s2, 4  ;;  %s4247_s11 = smov 768   ;;  %s191_s10 = int_to_ptr.hbm [resolvable:$true] %s190_s10 }
   0xf   : > { %p3854_p9 = pneg %p4333_p8  ;;  %s4248_s12 = smov 48  }
  0x10   : > { %s4249_s13 = smov [#allocation9]   ;;  %s201_s17 = sshll.u32 %s5869_s3, 4  ;;  %s202_s17 = int_to_ptr.hbm [resolvable:$true] %s201_s17 }
  0x11   : > { %p4341_p10 = pnand %p3854_p9, %p44_p1  ;;  %s192_s14 = sshll.u32 %s4249_s13, 4  ;;  %s193_s14 = int_to_ptr.vmem [resolvable:$true] %s192_s14 }
  0x12   : > { %s4250_s23 = smov [#allocation10]   ;;  %s5872_s27 = smov 256  }
  0x13   : > { %3857 = dma.hbm_to_vmem [thread:$0]  (!%p4341_p10), %s176_s28, 24576, %s178_s6, [#allocation8], %s4247_s11, %s4247_s11, %s4248_s12  }
  0x14   : > { %3860 = dma.hbm_to_vmem [thread:$0]  (!%p4341_p10), %s191_s10, 96, %s193_s14, [#allocation8]  }
  0x15   : > { %s203_s26 = sshll.u32 %s4250_s23, 4  ;;  %s4252_s28 = smov 16   ;;  %s204_s26 = int_to_ptr.vmem [resolvable:$true] %s203_s26 }
  0x16   : > { %3863 = dma.hbm_to_vmem [thread:$0]  (!%p4341_p10), %s202_s17, 8192, %s204_s26, [#allocation11], %s5872_s27, %s5872_s27, %s4252_s28  }
  0x17   : > { %s4362_s30 = sadd.s32 1, %s4244_s21   ;;  %s30_s8 = sadd.s32 1, %s4240_s20 }
  0x18   : > { %s27_s6 = ssub.s32 %s4244_s21, %s4362_s30  ;;  %p37_p13 = scmp.ne.s32.totalorder %s4240_s20, %s4236_s19 }
  0x19   : > { %p28_p12 = scmp.eq.s32.totalorder %s27_s6, 0  ;;  %p38_p0 = scmp.eq.s32.totalorder %s4244_s21, 0 }
  0x1a   : > { %p4375_p3 = por %p151_p2, %p37_p13  ;;  %p3875_p5 = scmp.lt.s32.totalorder %s4244_s21, 2 }
  0x1b   : > { %s4371_s9 = scalar_select %p28_p12, %s4240_s20, %s30_s8  }
  0x1c   : > { %s220_s7 = sand.u32 1, %s4240_s20   ;;  %s3835_s11 = sshll.u32 %s4244_s21, 5 }
  0x1d   : > { %p39_p7 = por %p38_p0, %p37_p13  ;;  %s3770_s12 = sshll.u32 %s220_s7, 5 }
  0x1e   : > { %s230_s15 = scalar_lea.hbm %s5866_s0, %s3835_s11  ;;  %s224_s17 = scalar_lea.vmem [#allocation4], %s3770_s12 }
  0x1f   : > { %s231_s16 = sshll.u32 %s230_s15, 4  ;;  %s233_s23 = sshll.u32 %s224_s17, 4  ;;  %s232_s16 = int_to_ptr.hbm [resolvable:$true] %s231_s16  ;;  %s234_s23 = int_to_ptr.vmem [resolvable:$true] %s233_s23 }
  0x20   : > { %p4385_p9 = pnand %p3875_p5, %p39_p7  ;;  %s221_s6 = scalar_lea.sflag [#allocation5], %s220_s7 }
  0x21   : > { %s4140_s8 = sshra.s32 %s232_s16, 4  ;;  %s4147_s12 = scalar_lea.hbm %s5866_s0, 64  ;;  %s4141_s8 = int_to_ptr.hbm [resolvable:$true] %s4140_s8 }
  0x22   : > { %s4142_s27 = scalar_lea.hbm %s4141_s8, 32  ;;  %p4144_p10 = pneg %p4385_p9 }
  0x23   : > { %p4143_p2 = scmp.ne.s32.totalorder %s4141_s8, %s4142_s27  ;;  %p4148_p0 = scmp.lt.s32.totalorder %s4141_s8, %s5866_s0 }
  0x24   : > { %p4149_p5 = scmp.lt.s32.totalorder %s4147_s12, %s4142_s27 }
  0x25   : > { %p4145_p12 = pnand %p4144_p10, %p4143_p2 }
  0x26   : > { %p4150_p7 = por %p4149_p5, %p4148_p0 }
  0x27   : > { %p4146_p13 = pneg %p4145_p12 }
  0x29   : > { %p4151_p11 = pnand %p4150_p7, %p4146_p13 }
  0x2b   : > { %4154 = shalt.err (!%p4151_p11)
}
  0x2c   : > { %s5879_s7 = smov 256   ;;  %245 = sbr.rel (%p4333_p8) target bundleno = 1369 (0x559), region = 40 }
  0x2d   : > { %3867 = dma.hbm_to_vmem [thread:$0]  (!%p4385_p9), %s232_s16, 512, %s234_s23, %s221_s6, %s5879_s7, %s5879_s7, %s4252_s28  }
  0x2e   : > { %s4405_s17 = sand.u32 (!%p4333_p8), 1, %s4236_s19  }
  0x2f   : > { %s3775_s27 = sshll.u32 (!%p4333_p8), %s4405_s17, 5  ;;  %s248_s8 = scalar_lea.sflag (!%p4333_p8), [#allocation5], %s4405_s17 }
  0x30   : > { %s4411_s11 = scalar_lea.vmem (!%p4333_p8), [#allocation4], %s3775_s27 }
  0x31   : > { %4215 = dma.done.wait (%p4320_p4), %s248_s8, 512  }
  0x32   : > { %4217 = vsyncadd (%p4320_p4), %s248_s8, 4294966784 }
  0x33   : > { %4219 = dma.done.wait (%p44_p1), [#allocation8], 24672  }
  0x34   : > { %4221 = vsyncadd (%p44_p1), [#allocation8], 4294942624 }
  0x35   : > { %4223 = dma.done.wait (%p44_p1), [#allocation11], 8192  }
  0x36   : > { %4225 = vsyncadd (%p44_p1), [#allocation11], 4294959104  ;;  %v390_v0 = vld [vmem:[#allocation7 + $0x2d0] sm:$0xff]  ;;  %v391_v1 = vld [vmem:[#allocation7 + $0x2d8] sm:$0xff]  ;;  %s4253_s24 = smov 64   ;;  %s4254_s29 = smov 96  }
  0x37   : > { %v384_v2 = vld [vmem:[#allocation7 + $0x2a0] sm:$0xff]  ;;  %506 = vmatpush.msra.mxu0 %v390_v0  ;;  %552 = vmatpush.msra.mxu2 %v391_v1  ;;  %v486_v3 = vld [vmem:[#allocation7 + $0x5d0] sm:$0xff]  ;;  %v385_v4 = vld [vmem:[#allocation7 + $0x2a8] sm:$0xff]  ;;  %s4255_s28 = smov 32   ;;  %vm847_vm0 = vcmask 1047556   ;;  %vm2271_vm1 = vcmask 261120  }
  0x38   : > { %v487_v5 = vld [vmem:[#allocation7 + $0x5d8] sm:$0xff]  ;;  %529 = vmatpush.msra.mxu1 %v486_v3  ;;  %v378_v6 = vld [vmem:[#allocation7 + $0x270] sm:$0xff]  ;;  %v480_v7 = vld [vmem:[#allocation7 + $0x5a0] sm:$0xff]  ;;  %vm2552_vm2 = vcmask 130048   ;;  %vm3459_vm3 = vcmask 523264   ;;  %vm3462_vm4 = vcmask 785408  }
  0x39   : > { %575 = vmatpush.msra.mxu3 %v487_v5  ;;  %v379_v8 = vld [vmem:[#allocation7 + $0x278] sm:$0xff]  ;;  %507 = vmatpush.msra.mxu0 %v384_v2  ;;  %v481_v9 = vld [vmem:[#allocation7 + $0x5a8] sm:$0xff]  ;;  %v474_v10 = vld [vmem:[#allocation7 + $0x570] sm:$0xff]  ;;  %s293_s26 = scalar_lea.vmem [#allocation12], %s3775_s27  ;;  %s3837_s6 = sshll.u32 %s4311_s22, 5 }
  0x3a   : > { %553 = vmatpush.msra.mxu2 %v385_v4  ;;  %530 = vmatpush.msra.mxu1 %v480_v7  ;;  %v372_v11 = vld [vmem:[#allocation7 + $0x240] sm:$0xff]  ;;  %v373_v12 = vld [vmem:[#allocation7 + $0x248] sm:$0xff]  ;;  %v475_v13 = vld [vmem:[#allocation7 + $0x578] sm:$0xff]  ;;  %s3658_s14 = scalar_lea.hbm %s5871_s5, %s3837_s6  ;;  %s3659_s15 = sshll.u32 %s293_s26, 4  ;;  %s3660_s15 = int_to_ptr.vmem [resolvable:$true] %s3659_s15 }
  0x3b   : > { %576 = vmatpush.msra.mxu3 %v481_v9  ;;  %508 = vmatpush.msra.mxu0 %v378_v6  ;;  %v468_v14 = vld [vmem:[#allocation7 + $0x540] sm:$0xff]  ;;  %v469_v15 = vld [vmem:[#allocation7 + $0x548] sm:$0xff]  ;;  %v366_v16 = vld [vmem:[#allocation7 + $0x210] sm:$0xff]  ;;  %s3661_s7 = sshll.u32 %s3658_s14, 4  ;;  %s3646_s27 = scalar_lea.sflag [#allocation6], %s4405_s17  ;;  %s3662_s7 = int_to_ptr.hbm [resolvable:$true] %s3661_s7 }
  0x3c   : > { %554 = vmatpush.msra.mxu2 %v379_v8  ;;  %531 = vmatpush.msra.mxu1 %v474_v10  ;;  %v367_v17 = vld [vmem:[#allocation7 + $0x218] sm:$0xff]  ;;  %v462_v18 = vld [vmem:[#allocation7 + $0x510] sm:$0xff]  ;;  %v360_v20 = vld [vmem:[#allocation7 + $0x1e0] sm:$0xff]  ;;  %s4184_s8 = sshra.s32 %s3662_s7, 4  ;;  %s4185_s8 = int_to_ptr.hbm [resolvable:$true] %s4184_s8 }
  0x3d   : > { %577 = vmatpush.msra.mxu3 %v475_v13  ;;  %509 = vmatpush.msra.mxu0 %v372_v11  ;;  %v463_v19 = vld [vmem:[#allocation7 + $0x518] sm:$0xff]  ;;  %v361_v21 = vld [vmem:[#allocation7 + $0x1e8] sm:$0xff]  ;;  %v456_v22 = vld [vmem:[#allocation7 + $0x4e0] sm:$0xff]  ;;  %s4186_s22 = scalar_lea.hbm %s4185_s8, 32  ;;  %p4191_p11 = scmp.lt.s32.totalorder %s4185_s8, %s5871_s5 }
  0x3e   : > { %555 = vmatpush.msra.mxu2 %v373_v12  ;;  %532 = vmatpush.msra.mxu1 %v468_v14  ;;  %v457_v23 = vld [vmem:[#allocation7 + $0x4e8] sm:$0xff]  ;;  %v354_v24 = vld [vmem:[#allocation7 + $0x1b0] sm:$0xff]  ;;  %v355_v25 = vld [vmem:[#allocation7 + $0x1b8] sm:$0xff]  ;;  %p4187_p1 = scmp.ne.s32.totalorder %s4185_s8, %s4186_s22 }
  0x3f   : > { %578 = vmatpush.msra.mxu3 %v469_v15  ;;  %510 = vmatpush.msra.mxu0 %v366_v16  ;;  %v450_v26 = vld [vmem:[#allocation7 + $0x4b0] sm:$0xff]  ;;  %v451_v27 = vld [vmem:[#allocation7 + $0x4b8] sm:$0xff]  ;;  %v348_v28 = vld [vmem:[#allocation7 + $0x180] sm:$0xff] }
  0x40   : > { %556 = vmatpush.msra.mxu2 %v367_v17  ;;  %533 = vmatpush.msra.mxu1 %v462_v18  ;;  %v349_v29 = vld [vmem:[#allocation7 + $0x188] sm:$0xff]  ;;  %v444_v30 = vld [vmem:[#allocation7 + $0x480] sm:$0xff]  ;;  %v342_v32 = vld [vmem:[#allocation7 + $0x150] sm:$0xff]  ;;  %p4188_p4 = pnand %p4187_p1, %p4375_p3 }
  0x41   : > { %579 = vmatpush.msra.mxu3 %v463_v19  ;;  %511 = vmatpush.msra.mxu0 %v360_v20  ;;  %v445_v31 = vld [vmem:[#allocation7 + $0x488] sm:$0xff]  ;;  %v343_v33 = vld [vmem:[#allocation7 + $0x158] sm:$0xff]  ;;  %v438_v34 = vld [vmem:[#allocation7 + $0x450] sm:$0xff] }
  0x42   : > { %557 = vmatpush.msra.mxu2 %v361_v21  ;;  %534 = vmatpush.msra.mxu1 %v456_v22  ;;  %v439_v35 = vld [vmem:[#allocation7 + $0x458] sm:$0xff]  ;;  %v336_v36 = vld [vmem:[#allocation7 + $0x120] sm:$0xff]  ;;  %v337_v37 = vld [vmem:[#allocation7 + $0x128] sm:$0xff]  ;;  %p4189_p8 = pneg %p4188_p4 }
  0x43   : > { %580 = vmatpush.msra.mxu3 %v457_v23  ;;  %512 = vmatpush.msra.mxu0 %v354_v24  ;;  %v432_v38 = vld [vmem:[#allocation7 + $0x420] sm:$0xff]  ;;  %v433_v39 = vld [vmem:[#allocation7 + $0x428] sm:$0xff]  ;;  %v330_v40 = vld [vmem:[#allocation7 + $0xf0] sm:$0xff] }
  0x44   : > { %558 = vmatpush.msra.mxu2 %v355_v25  ;;  %535 = vmatpush.msra.mxu1 %v450_v26  ;;  %v331_v41 = vld [vmem:[#allocation7 + $0xf8] sm:$0xff]  ;;  %v426_v42 = vld [vmem:[#allocation7 + $0x3f0] sm:$0xff]  ;;  %v324_v44 = vld [vmem:[#allocation7 + $0xc0] sm:$0xff] }
  0x45   : > { %581 = vmatpush.msra.mxu3 %v451_v27  ;;  %513 = vmatpush.msra.mxu0 %v348_v28  ;;  %v427_v43 = vld [vmem:[#allocation7 + $0x3f8] sm:$0xff]  ;;  %v325_v45 = vld [vmem:[#allocation7 + $0xc8] sm:$0xff]  ;;  %v420_v46 = vld [vmem:[#allocation7 + $0x3c0] sm:$0xff] }
  0x46   : > { %559 = vmatpush.msra.mxu2 %v349_v29  ;;  %536 = vmatpush.msra.mxu1 %v444_v30  ;;  %v421_v47 = vld [vmem:[#allocation7 + $0x3c8] sm:$0xff]  ;;  %v318_v48 = vld [vmem:[#allocation7 + $0x90] sm:$0xff]  ;;  %v319_v49 = vld [vmem:[#allocation7 + $0x98] sm:$0xff] }
  0x47   : > { %582 = vmatpush.msra.mxu3 %v445_v31  ;;  %514 = vmatpush.msra.mxu0 %v342_v32  ;;  %v414_v50 = vld [vmem:[#allocation7 + $0x390] sm:$0xff]  ;;  %v415_v51 = vld [vmem:[#allocation7 + $0x398] sm:$0xff]  ;;  %v312_v52 = vld [vmem:[#allocation7 + $0x60] sm:$0xff] }
  0x48   : > { %560 = vmatpush.msra.mxu2 %v343_v33  ;;  %537 = vmatpush.msra.mxu1 %v438_v34  ;;  %v313_v53 = vld [vmem:[#allocation7 + $0x68] sm:$0xff]  ;;  %v408_v54 = vld [vmem:[#allocation7 + $0x360] sm:$0xff]  ;;  %v306_v56 = vld [vmem:[#allocation7 + $0x30] sm:$0xff] }
  0x49   : > { %583 = vmatpush.msra.mxu3 %v439_v35  ;;  %515 = vmatpush.msra.mxu0 %v336_v36  ;;  %v409_v55 = vld [vmem:[#allocation7 + $0x368] sm:$0xff]  ;;  %v307_v57 = vld [vmem:[#allocation7 + $0x38] sm:$0xff]  ;;  %v402_v58 = vld [vmem:[#allocation7 + $0x330] sm:$0xff] }
  0x4a   : > { %561 = vmatpush.msra.mxu2 %v337_v37  ;;  %538 = vmatpush.msra.mxu1 %v432_v38  ;;  %v403_v59 = vld [vmem:[#allocation7 + $0x338] sm:$0xff]  ;;  %v300_v60 = vld [vmem:[#allocation7] sm:$0xff]  ;;  %v301_v61 = vld [vmem:[#allocation7 + $0x8] sm:$0xff] }
  0x4b   : > { %584 = vmatpush.msra.mxu3 %v433_v39  ;;  %516 = vmatpush.msra.mxu0 %v330_v40  ;;  %v4426_v62 = vld [vmem:[%s4411_s11] sm:$0xff]  ;;  %v397_v1 = vld [vmem:[#allocation7 + $0x308] sm:$0xff]  ;;  %v386_v3 = vld [vmem:[#allocation7 + $0x2b0] sm:$0xff] }
  0x4c   : > { %562 = vmatpush.msra.mxu2 %v331_v41  ;;  %539 = vmatpush.msra.mxu1 %v426_v42  ;;  %v392_v63 = vld [vmem:[#allocation7 + $0x2e0] sm:$0xff]  ;;  %v4429_v2 = vld [vmem:[%s4411_s11 + $0x8] sm:$0xff]  ;;  %v482_v8 = vld [vmem:[#allocation7 + $0x5b0] sm:$0xff] }
  0x4d   : > { %585 = vmatpush.msra.mxu3 %v427_v43  ;;  %517 = vmatpush.msra.mxu0 %v324_v44  ;;  %v396_v0 = vld [vmem:[#allocation7 + $0x300] sm:$0xff]  ;;  %v393_v5 = vld [vmem:[#allocation7 + $0x2e8] sm:$0xff]  ;;  %v387_v9 = vld [vmem:[#allocation7 + $0x2b8] sm:$0xff] }
  0x4e   : > { %563 = vmatpush.msra.mxu2 %v325_v45  ;;  %540 = vmatpush.msra.mxu1 %v420_v46  ;;  %v488_v4 = vld [vmem:[#allocation7 + $0x5e0] sm:$0xff]  ;;  %v489_v7 = vld [vmem:[#allocation7 + $0x5e8] sm:$0xff]  ;;  %v374_v10 = vld [vmem:[#allocation7 + $0x250] sm:$0xff] }
  0x4f   : > { %586 = vmatpush.msra.mxu3 %v421_v47  ;;  %518 = vmatpush.msra.mxu0 %v318_v48  ;;  %v380_v6 = vld [vmem:[#allocation7 + $0x280] sm:$0xff]  ;;  %v483_v11 = vld [vmem:[#allocation7 + $0x5b8] sm:$0xff]  ;;  %v381_v13 = vld [vmem:[#allocation7 + $0x288] sm:$0xff] }
  0x50   : > { %564 = vmatpush.msra.mxu2 %v319_v49  ;;  %541 = vmatpush.msra.mxu1 %v414_v50  ;;  %v476_v12 = vld [vmem:[#allocation7 + $0x580] sm:$0xff]  ;;  %v477_v15 = vld [vmem:[#allocation7 + $0x588] sm:$0xff]  ;;  %v470_v16 = vld [vmem:[#allocation7 + $0x550] sm:$0xff] }
  0x51   : > { %587 = vmatpush.msra.mxu3 %v415_v51  ;;  %519 = vmatpush.msra.mxu0 %v312_v52  ;;  %v368_v14 = vld [vmem:[#allocation7 + $0x220] sm:$0xff]  ;;  %v375_v17 = vld [vmem:[#allocation7 + $0x258] sm:$0xff]  ;;  %v362_v18 = vld [vmem:[#allocation7 + $0x1f0] sm:$0xff] }
  0x52   : > { %565 = vmatpush.msra.mxu2 %v313_v53  ;;  %542 = vmatpush.msra.mxu1 %v408_v54  ;;  %v471_v19 = vld [vmem:[#allocation7 + $0x558] sm:$0xff]  ;;  %v464_v20 = vld [vmem:[#allocation7 + $0x520] sm:$0xff]  ;;  %v369_v21 = vld [vmem:[#allocation7 + $0x228] sm:$0xff] }
  0x53   : > { %588 = vmatpush.msra.mxu3 %v409_v55  ;;  %520 = vmatpush.msra.mxu0 %v306_v56  ;;  %v356_v22 = vld [vmem:[#allocation7 + $0x1c0] sm:$0xff]  ;;  %v465_v23 = vld [vmem:[#allocation7 + $0x528] sm:$0xff]  ;;  %v458_v24 = vld [vmem:[#allocation7 + $0x4f0] sm:$0xff] }
  0x54   : > { %566 = vmatpush.msra.mxu2 %v307_v57  ;;  %543 = vmatpush.msra.mxu1 %v402_v58  ;;  %v363_v25 = vld [vmem:[#allocation7 + $0x1f8] sm:$0xff]  ;;  %v350_v26 = vld [vmem:[#allocation7 + $0x190] sm:$0xff]  ;;  %v452_v28 = vld [vmem:[#allocation7 + $0x4c0] sm:$0xff] }
  0x55   : > { %589 = vmatpush.msra.mxu3 %v403_v59  ;;  %521 = vmatpush.msra.mxu0 %v300_v60  ;;  %v459_v27 = vld [vmem:[#allocation7 + $0x4f8] sm:$0xff]  ;;  %v357_v29 = vld [vmem:[#allocation7 + $0x1c8] sm:$0xff]  ;;  %v344_v31 = vld [vmem:[#allocation7 + $0x160] sm:$0xff] }
  0x56   : > { %567 = vmatpush.msra.mxu2 %v301_v61  ;;  %544 = vmatpush.msra.mxu1 %v396_v0  ;;  %v453_v30 = vld [vmem:[#allocation7 + $0x4c8] sm:$0xff]  ;;  %v446_v32 = vld [vmem:[#allocation7 + $0x490] sm:$0xff]  ;;  %v351_v33 = vld [vmem:[#allocation7 + $0x198] sm:$0xff] }
  0x57   : > { %568 = vmatmul.f32.vlgmr.msra.gmra.mxu2 %v4426_v62  ;;  %598 = vmatpush.msrb.mxu0 %v392_v63  ;;  %v338_v34 = vld [vmem:[#allocation7 + $0x130] sm:$0xff]  ;;  %v440_v35 = vld [vmem:[#allocation7 + $0x460] sm:$0xff]  ;;  %v345_v36 = vld [vmem:[#allocation7 + $0x168] sm:$0xff] }
  0x58   : > { %590 = vmatpush.msra.mxu3 %v397_v1  ;;  %621 = vmatpush.msrb.mxu1 %v488_v4  ;;  %v447_v37 = vld [vmem:[#allocation7 + $0x498] sm:$0xff]  ;;  %v332_v38 = vld [vmem:[#allocation7 + $0x100] sm:$0xff]  ;;  %v434_v39 = vld [vmem:[#allocation7 + $0x430] sm:$0xff] }
  0x59   : > { %591 = vmatmul.f32.vlgmr.msra.gmra.mxu3 %v4429_v2  ;;  %599 = vmatpush.msrb.mxu0 %v386_v3  ;;  %v339_v40 = vld [vmem:[#allocation7 + $0x138] sm:$0xff]  ;;  %v441_v41 = vld [vmem:[#allocation7 + $0x468] sm:$0xff]  ;;  %v326_v42 = vld [vmem:[#allocation7 + $0xd0] sm:$0xff] }
  0x5a   : > { %644 = vmatpush.msrb.mxu2 %v393_v5  ;;  %667 = vmatpush.msrb.mxu3 %v489_v7  ;;  %v428_v43 = vld [vmem:[#allocation7 + $0x400] sm:$0xff]  ;;  %v333_v44 = vld [vmem:[#allocation7 + $0x108] sm:$0xff]  ;;  %v435_v45 = vld [vmem:[#allocation7 + $0x438] sm:$0xff] }
  0x5b   : > { %600 = vmatpush.msrb.mxu0 %v380_v6  ;;  %622 = vmatpush.msrb.mxu1 %v482_v8  ;;  %v4436_v46 = vld [vmem:[%s4411_s11 + $0x10] sm:$0xff]  ;;  %v320_v48 = vld [vmem:[#allocation7 + $0xa0] sm:$0xff]  ;;  %v327_v49 = vld [vmem:[#allocation7 + $0xd8] sm:$0xff] }
  0x5c   : > { %645 = vmatpush.msrb.mxu2 %v387_v9  ;;  %668 = vmatpush.msrb.mxu3 %v483_v11  ;;  %v422_v47 = vld [vmem:[#allocation7 + $0x3d0] sm:$0xff]  ;;  %v429_v50 = vld [vmem:[#allocation7 + $0x408] sm:$0xff]  ;;  %v4439_v51 = vld [vmem:[%s4411_s11 + $0x18] sm:$0xff] }
  0x5d   : > { %601 = vmatpush.msrb.mxu0 %v374_v10  ;;  %623 = vmatpush.msrb.mxu1 %v476_v12  ;;  %v314_v52 = vld [vmem:[#allocation7 + $0x70] sm:$0xff]  ;;  %v416_v53 = vld [vmem:[#allocation7 + $0x3a0] sm:$0xff]  ;;  %v321_v54 = vld [vmem:[#allocation7 + $0xa8] sm:$0xff] }
  0x5e   : > { %646 = vmatpush.msrb.mxu2 %v381_v13  ;;  %669 = vmatpush.msrb.mxu3 %v477_v15  ;;  %v423_v55 = vld [vmem:[#allocation7 + $0x3d8] sm:$0xff]  ;;  %v308_v56 = vld [vmem:[#allocation7 + $0x40] sm:$0xff]  ;;  %v410_v57 = vld [vmem:[#allocation7 + $0x370] sm:$0xff] }
  0x5f   : > { %602 = vmatpush.msrb.mxu0 %v368_v14  ;;  %624 = vmatpush.msrb.mxu1 %v470_v16  ;;  %v315_v58 = vld [vmem:[#allocation7 + $0x78] sm:$0xff]  ;;  %v417_v59 = vld [vmem:[#allocation7 + $0x3a8] sm:$0xff]  ;;  %v302_v60 = vld [vmem:[#allocation7 + $0x10] sm:$0xff] }
  0x60   : > { %647 = vmatpush.msrb.mxu2 %v375_v17  ;;  %670 = vmatpush.msrb.mxu3 %v471_v19  ;;  %v404_v61 = vld [vmem:[#allocation7 + $0x340] sm:$0xff]  ;;  %v309_v63 = vld [vmem:[#allocation7 + $0x48] sm:$0xff]  ;;  %v411_v0 = vld [vmem:[#allocation7 + $0x378] sm:$0xff] }
  0x61   : > { %603 = vmatpush.msrb.mxu0 %v362_v18  ;;  %625 = vmatpush.msrb.mxu1 %v464_v20  ;;  %v398_v1 = vld [vmem:[#allocation7 + $0x310] sm:$0xff]  ;;  %v303_v3 = vld [vmem:[#allocation7 + $0x18] sm:$0xff]  ;;  %v405_v4 = vld [vmem:[#allocation7 + $0x348] sm:$0xff] }
  0x62   : > { %648 = vmatpush.msrb.mxu2 %v369_v21  ;;  %671 = vmatpush.msrb.mxu3 %v465_v23  ;;  %v399_v5 = vld [vmem:[#allocation7 + $0x318] sm:$0xff]  ;;  %v389_v7 = vld [vmem:[#allocation7 + $0x2c8] sm:$0xff]  ;;  %v394_v11 = vld [vmem:[#allocation7 + $0x2f0] sm:$0xff] }
  0x63   : > { %604 = vmatpush.msrb.mxu0 %v356_v22  ;;  %626 = vmatpush.msrb.mxu1 %v458_v24  ;;  %v395_v6 = vld [vmem:[#allocation7 + $0x2f8] sm:$0xff]  ;;  %v485_v10 = vld [vmem:[#allocation7 + $0x5c8] sm:$0xff]  ;;  %v388_v14 = vld [vmem:[#allocation7 + $0x2c0] sm:$0xff] }
  0x64   : > { %649 = vmatpush.msrb.mxu2 %v363_v25  ;;  %672 = vmatpush.msrb.mxu3 %v459_v27  ;;  %v491_v8 = vld [vmem:[#allocation7 + $0x5f8] sm:$0xff]  ;;  %v377_v12 = vld [vmem:[#allocation7 + $0x268] sm:$0xff]  ;;  %v490_v15 = vld [vmem:[#allocation7 + $0x5f0] sm:$0xff] }
  0x65   : > { %605 = vmatpush.msrb.mxu0 %v350_v26  ;;  %627 = vmatpush.msrb.mxu1 %v452_v28  ;;  %v383_v9 = vld [vmem:[#allocation7 + $0x298] sm:$0xff]  ;;  %v473_v17 = vld [vmem:[#allocation7 + $0x568] sm:$0xff]  ;;  %v382_v18 = vld [vmem:[#allocation7 + $0x290] sm:$0xff] }
  0x66   : > { %650 = vmatpush.msrb.mxu2 %v357_v29  ;;  %522 = vmatmul.f32.vlgmr.msra.gmra.mxu0 %v4426_v62  ;;  %v479_v13 = vld [vmem:[#allocation7 + $0x598] sm:$0xff]  ;;  %v484_v19 = vld [vmem:[#allocation7 + $0x5c0] sm:$0xff]  ;;  %v365_v20 = vld [vmem:[#allocation7 + $0x208] sm:$0xff] }
  0x67   : > { %673 = vmatpush.msrb.mxu3 %v453_v30  ;;  %606 = vmatpush.msrb.mxu0 %v344_v31  ;;  %v371_v16 = vld [vmem:[#allocation7 + $0x238] sm:$0xff]  ;;  %v376_v22 = vld [vmem:[#allocation7 + $0x260] sm:$0xff]  ;;  %v478_v23 = vld [vmem:[#allocation7 + $0x590] sm:$0xff] }
  0x68   : > { %628 = vmatpush.msrb.mxu1 %v446_v32  ;;  %651 = vmatpush.msrb.mxu2 %v351_v33  ;;  %v467_v21 = vld [vmem:[#allocation7 + $0x538] sm:$0xff]  ;;  %v461_v25 = vld [vmem:[#allocation7 + $0x508] sm:$0xff]  ;;  %v370_v26 = vld [vmem:[#allocation7 + $0x230] sm:$0xff] }
  0x69   : > { %545 = vmatmul.f32.vlgmr.msra.gmra.mxu1 %v4429_v2  ;;  %607 = vmatpush.msrb.mxu0 %v338_v34  ;;  %v359_v24 = vld [vmem:[#allocation7 + $0x1d8] sm:$0xff]  ;;  %v472_v27 = vld [vmem:[#allocation7 + $0x560] sm:$0xff]  ;;  %v353_v28 = vld [vmem:[#allocation7 + $0x1a8] sm:$0xff] }
  0x6a   : > { %629 = vmatpush.msrb.mxu1 %v440_v35  ;;  %652 = vmatpush.msrb.mxu2 %v345_v36  ;;  %v455_v29 = vld [vmem:[#allocation7 + $0x4d8] sm:$0xff]  ;;  %v364_v30 = vld [vmem:[#allocation7 + $0x200] sm:$0xff]  ;;  %v466_v31 = vld [vmem:[#allocation7 + $0x530] sm:$0xff] }
  0x6b   : > { %674 = vmatpush.msrb.mxu3 %v447_v37  ;;  %608 = vmatpush.msrb.mxu0 %v332_v38  ;;  %v347_v32 = vld [vmem:[#allocation7 + $0x178] sm:$0xff]  ;;  %v449_v33 = vld [vmem:[#allocation7 + $0x4a8] sm:$0xff]  ;;  %v358_v34 = vld [vmem:[#allocation7 + $0x1d0] sm:$0xff] }
  0x6c   : > { %630 = vmatpush.msrb.mxu1 %v434_v39  ;;  %653 = vmatpush.msrb.mxu2 %v339_v40  ;;  %v460_v35 = vld [vmem:[#allocation7 + $0x500] sm:$0xff]  ;;  %v341_v36 = vld [vmem:[#allocation7 + $0x148] sm:$0xff]  ;;  %v443_v37 = vld [vmem:[#allocation7 + $0x478] sm:$0xff] }
  0x6d   : > { %675 = vmatpush.msrb.mxu3 %v441_v41  ;;  %609 = vmatpush.msrb.mxu0 %v326_v42  ;;  %v352_v38 = vld [vmem:[#allocation7 + $0x1a0] sm:$0xff]  ;;  %v454_v39 = vld [vmem:[#allocation7 + $0x4d0] sm:$0xff]  ;;  %v335_v40 = vld [vmem:[#allocation7 + $0x118] sm:$0xff] }
  0x6e   : > { %631 = vmatpush.msrb.mxu1 %v428_v43  ;;  %654 = vmatpush.msrb.mxu2 %v333_v44  ;;  %v4453_v41 = vld [vmem:[#allocation9] sm:$0x3f]  ;;  %v437_v42 = vld [vmem:[#allocation7 + $0x448] sm:$0xff]  ;;  %v346_v43 = vld [vmem:[#allocation7 + $0x170] sm:$0xff] }
  0x6f   : > { %676 = vmatpush.msrb.mxu3 %v435_v45  ;;  %525 = vmatmul.f32.gmra.mxu0 %v4436_v46  ;;  %v448_v44 = vld [vmem:[#allocation7 + $0x4a0] sm:$0xff]  ;;  %v329_v45 = vld [vmem:[#allocation7 + $0xe8] sm:$0xff] }
  0x70   : > { %632 = vmatpush.msrb.mxu1 %v422_v47  ;;  %610 = vmatpush.msrb.mxu0 %v320_v48  ;;  %v431_v47 = vld [vmem:[#allocation7 + $0x418] sm:$0xff]  ;;  %v495_v48 = vperm.slane %v4453_v41, 1 }
  0x71   : > { %655 = vmatpush.msrb.mxu2 %v327_v49  ;;  %677 = vmatpush.msrb.mxu3 %v429_v50  ;;  %v340_v49 = vld [vmem:[#allocation7 + $0x140] sm:$0xff]  ;;  %v442_v50 = vld [vmem:[#allocation7 + $0x470] sm:$0xff] }
  0x72   : > { %548 = vmatmul.f32.gmra.mxu1 %v4439_v51  ;;  %571 = vmatmul.f32.gmra.mxu2 %v4436_v46 }
  0x73   : > { %611 = vmatpush.msrb.mxu0 %v314_v52  ;;  %633 = vmatpush.msrb.mxu1 %v416_v53  ;;  %v323_v52 = vld [vmem:[#allocation7 + $0xb8] sm:$0xff]  ;;  %v425_v53 = vld [vmem:[#allocation7 + $0x3e8] sm:$0xff] }
  0x74   : > { %656 = vmatpush.msrb.mxu2 %v321_v54  ;;  %678 = vmatpush.msrb.mxu3 %v423_v55  ;;  %v334_v55 = vld [vmem:[#allocation7 + $0x110] sm:$0xff] }
  0x75   : > { %612 = vmatpush.msrb.mxu0 %v308_v56  ;;  %594 = vmatmul.f32.gmra.mxu3 %v4439_v51  ;;  %v436_v56 = vld [vmem:[#allocation7 + $0x440] sm:$0xff] }
  0x76   : > { %634 = vmatpush.msrb.mxu1 %v410_v57  ;;  %657 = vmatpush.msrb.mxu2 %v315_v58  ;;  %v317_v57 = vld [vmem:[#allocation7 + $0x88] sm:$0xff] }
  0x77   : > { %679 = vmatpush.msrb.mxu3 %v417_v59  ;;  %613 = vmatpush.msrb.mxu0 %v302_v60  ;;  %v419_v59 = vld [vmem:[#allocation7 + $0x3b8] sm:$0xff] }
  0x78   : > { %635 = vmatpush.msrb.mxu1 %v404_v61  ;;  %658 = vmatpush.msrb.mxu2 %v309_v63  ;;  %v328_v61 = vld [vmem:[#allocation7 + $0xe0] sm:$0xff]  ;;  %v430_v63 = vld [vmem:[#allocation7 + $0x410] sm:$0xff] }
  0x79   : > { %680 = vmatpush.msrb.mxu3 %v411_v0  ;;  %614 = vmatmul.f32.vlgmr.msrb.gmra.mxu0 %v4426_v62  ;;  %v311_v0 = vld [vmem:[#allocation7 + $0x58] sm:$0xff] }
  0x7a   : > { %636 = vmatpush.msrb.mxu1 %v398_v1  ;;  %659 = vmatpush.msrb.mxu2 %v303_v3  ;;  %v413_v3 = vld [vmem:[#allocation7 + $0x388] sm:$0xff] }
  0x7b   : > { %681 = vmatpush.msrb.mxu3 %v405_v4  ;;  %637 = vmatmul.f32.vlgmr.msrb.gmra.mxu1 %v4429_v2  ;;  %v322_v4 = vld [vmem:[#allocation7 + $0xb0] sm:$0xff] }
  0x7c   : > { %660 = vmatmul.f32.vlgmr.msrb.gmra.mxu2 %v4426_v62  ;;  %690 = vmatpush.msra.mxu0 %v394_v11  ;;  %v494_v11 = vperm.slane %v4453_v41, 0 }
  0x7d   : > { %682 = vmatpush.msrb.mxu3 %v399_v5  ;;  %736 = vmatpush.msra.mxu2 %v395_v6  ;;  %v424_v5 = vld [vmem:[#allocation7 + $0x3e0] sm:$0xff]  ;;  %v305_v6 = vld [vmem:[#allocation7 + $0x28] sm:$0xff] }
  0x7e   : > { %683 = vmatmul.f32.vlgmr.msrb.gmra.mxu3 %v4429_v2  ;;  %691 = vmatpush.msra.mxu0 %v388_v14 }
  0x7f   : > { %737 = vmatpush.msra.mxu2 %v389_v7  ;;  %759 = vmatpush.msra.mxu3 %v491_v8  ;;  %v407_v7 = vld [vmem:[#allocation7 + $0x358] sm:$0xff]  ;;  %v316_v8 = vld [vmem:[#allocation7 + $0x80] sm:$0xff] }
  0x80   : > { %713 = vmatpush.msra.mxu1 %v490_v15  ;;  %692 = vmatpush.msra.mxu0 %v382_v18  ;;  %v304_v15 = vld [vmem:[#allocation7 + $0x20] sm:$0xff] }
  0x81   : > { %617 = vmatmul.f32.gmra.mxu0 %v4436_v46  ;;  %738 = vmatpush.msra.mxu2 %v383_v9  ;;  %v418_v9 = vld [vmem:[#allocation7 + $0x3b0] sm:$0xff] }
  0x82   : > { %760 = vmatpush.msra.mxu3 %v485_v10  ;;  %714 = vmatpush.msra.mxu1 %v484_v19  ;;  %v401_v10 = vld [vmem:[#allocation7 + $0x328] sm:$0xff]  ;;  %v400_v19 = vld [vmem:[#allocation7 + $0x320] sm:$0xff] }
  0x83   : > { %640 = vmatmul.f32.gmra.mxu1 %v4439_v51  ;;  %739 = vmatpush.msra.mxu2 %v377_v12  ;;  %v310_v12 = vld [vmem:[#allocation7 + $0x50] sm:$0xff] }
  0x84   : > { %663 = vmatmul.f32.gmra.mxu2 %v4436_v46  ;;  %761 = vmatpush.msra.mxu3 %v479_v13  ;;  %v412_v13 = vld [vmem:[#allocation7 + $0x380] sm:$0xff] }
  0x85   : > { %740 = vmatpush.msra.mxu2 %v371_v16  ;;  %693 = vmatpush.msra.mxu0 %v376_v22  ;;  %v406_v16 = vld [vmem:[#allocation7 + $0x350] sm:$0xff] }
  0x86   : > { %686 = vmatmul.f32.gmra.mxu3 %v4439_v51  ;;  %715 = vmatpush.msra.mxu1 %v478_v23 }
  0x87   : > { %762 = vmatpush.msra.mxu3 %v473_v17  ;;  %741 = vmatpush.msra.mxu2 %v365_v20 }
  0x88   : > { %694 = vmatpush.msra.mxu0 %v370_v26  ;;  %716 = vmatpush.msra.mxu1 %v472_v27 }
  0x89   : > { %763 = vmatpush.msra.mxu3 %v467_v21  ;;  %742 = vmatpush.msra.mxu2 %v359_v24 }
  0x8a   : > { %695 = vmatpush.msra.mxu0 %v364_v30  ;;  %717 = vmatpush.msra.mxu1 %v466_v31 }
  0x8b   : > { %764 = vmatpush.msra.mxu3 %v461_v25  ;;  %743 = vmatpush.msra.mxu2 %v353_v28 }
  0x8c   : > { %696 = vmatpush.msra.mxu0 %v358_v34  ;;  %718 = vmatpush.msra.mxu1 %v460_v35 }
  0x8d   : > { %765 = vmatpush.msra.mxu3 %v455_v29  ;;  %744 = vmatpush.msra.mxu2 %v347_v32 }
  0x8e   : > { %697 = vmatpush.msra.mxu0 %v352_v38  ;;  %719 = vmatpush.msra.mxu1 %v454_v39 }
  0x8f   : > { %766 = vmatpush.msra.mxu3 %v449_v33  ;;  %745 = vmatpush.msra.mxu2 %v341_v36 }
  0x90   : > { %698 = vmatpush.msra.mxu0 %v346_v43  ;;  %720 = vmatpush.msra.mxu1 %v448_v44 }
  0x91   : > { %767 = vmatpush.msra.mxu3 %v443_v37  ;;  %746 = vmatpush.msra.mxu2 %v335_v40 }
  0x92   : > { %699 = vmatpush.msra.mxu0 %v340_v49  ;;  %721 = vmatpush.msra.mxu1 %v442_v50 }
  0x93   : > { %768 = vmatpush.msra.mxu3 %v437_v42  ;;  %747 = vmatpush.msra.mxu2 %v329_v45 }
  0x94   : > { %700 = vmatpush.msra.mxu0 %v334_v55  ;;  %722 = vmatpush.msra.mxu1 %v436_v56 }
  0x95   : > { %769 = vmatpush.msra.mxu3 %v431_v47  ;;  %748 = vmatpush.msra.mxu2 %v323_v52  ;;  %v4256_v52 = vmov 1983009808  }
  0x96   : > { %701 = vmatpush.msra.mxu0 %v328_v61  ;;  %723 = vmatpush.msra.mxu1 %v430_v63 }
  0x97   : > { %770 = vmatpush.msra.mxu3 %v425_v53  ;;  %749 = vmatpush.msra.mxu2 %v317_v57  ;;  %v852_v53 = vunpack.c.l.s4 %v4256_v52 }
  0x98   : > { %702 = vmatpush.msra.mxu0 %v322_v4  ;;  %724 = vmatpush.msra.mxu1 %v424_v5 }
  0x99   : > { %771 = vmatpush.msra.mxu3 %v419_v59  ;;  %750 = vmatpush.msra.mxu2 %v311_v0  ;;  %v4549_v63 = vunpack.c.0.s8 %v852_v53 }
  0x9a   : > { %703 = vmatpush.msra.mxu0 %v316_v8  ;;  %725 = vmatpush.msra.mxu1 %v418_v9 }
  0x9b   : > { %772 = vmatpush.msra.mxu3 %v413_v3  ;;  %751 = vmatpush.msra.mxu2 %v305_v6 }
  0x9c   : > { %752 = vmatmul.f32.vlgmr.msra.gmra.mxu2 %v4426_v62  ;;  %704 = vmatpush.msra.mxu0 %v310_v12 }
  0x9d   : > { %773 = vmatpush.msra.mxu3 %v407_v7  ;;  %726 = vmatpush.msra.mxu1 %v412_v13 }
  0x9e   : > { %705 = vmatpush.msra.mxu0 %v304_v15 }
  0x9f   : > { %774 = vmatpush.msra.mxu3 %v401_v10  ;;  %727 = vmatpush.msra.mxu1 %v406_v16 }
  0xa0   : > { %775 = vmatmul.f32.vlgmr.msra.gmra.mxu3 %v4429_v2  ;;  %706 = vmatmul.f32.vlgmr.msra.gmra.mxu0 %v4426_v62  ;;  %v496_v62 = vperm.slane %v4453_v41, 2 }
  0xa1   : > { %728 = vmatpush.msra.mxu1 %v400_v19 }
  0xa2   : > { %729 = vmatmul.f32.vlgmr.msra.gmra.mxu1 %v4429_v2 }
  0xa4   : > { %755 = vmatmul.f32.gmra.mxu2 %v4436_v46 }
  0xa8   : > { %778 = vmatmul.f32.gmra.mxu3 %v4439_v51  ;;  %709 = vmatmul.f32.gmra.mxu0 %v4436_v46  ;;  %v497_v46 = vperm.slane %v4453_v41, 3 }
  0xaa   : > { %732 = vmatmul.f32.gmra.mxu1 %v4439_v51 }
  0xda   : > { %v569_v54 = vpop.f32.mrf.mxu2 }
  0xdb   : > { %v570_v58 = vadd.f32 %v569_v54, %v495_v48 }
  0xdc   : > { %v592_v60 = vpop.f32.mrf.mxu3 }
  0xdd   : > { %v4458_v1 = vadd.f32 %v592_v60, %v570_v58 }
  0xdf   : > { %834 = vrot.lane.b32.xlu0 %v4458_v1, %s4253_s24  ;;  %v873_v55 = vrot.slane %v4458_v1, 4 }
  0xe3   : > { %v523_v14 = vpop.f32.mrf.mxu0 }
  0xe4   : > { %v524_v17 = vadd.f32 %v523_v14, %v494_v11  ;;  %v4257_v14 = vmov 1934713408  }
  0xe5   : > { %v900_v15 = vunpack.c.l.s4 %v4257_v14 }
  0xe6   : > { %v546_v18 = vpop.f32.mrf.mxu1 }
  0xe7   : > { %v4467_v20 = vadd.f32 %v546_v18, %v524_v17 }
  0xe9   : > { %808 = vrot.lane.b32.xlu2 %v4467_v20, %s4254_s29  ;;  %v849_v56 = vrot.slane %v4467_v20, 4 }
  0xec   : > { %v526_v21 = vpop.f32.mrf.mxu0 }
  0xed   : > { %v527_v39 = vadd.f32 %v526_v21, %v494_v11 }
  0xef   : > { %v549_v22 = vpop.f32.mrf.mxu1 }
  0xf0   : > { %v4515_v40 = vadd.f32 %v549_v22, %v527_v39 }
  0xf1   : > { %828 = vrot.lane.b32.xlu2 %v4458_v1, %s4254_s29 }
  0xf2   : > { %v961_v61 = vrot.slane %v4515_v40, 4 }
  0xf5   : > { %v572_v23 = vpop.f32.mrf.mxu2 }
  0xf6   : > { %v615_v24 = vpop.f32.mrf.mxu0  ;;  %v573_v42 = vadd.f32 %v572_v23, %v495_v48 }
  0xf7   : > { %v616_v25 = vadd.f32 %v615_v24, %v496_v62 }
  0xf8   : > { %v595_v26 = vpop.f32.mrf.mxu3  ;;  %v638_v2 = vpop.f32.mrf.mxu1 }
  0xf9   : > { %v4480_v27 = vadd.f32 %v638_v2, %v616_v25  ;;  %v4525_v43 = vadd.f32 %v595_v26, %v573_v42 }
  0xfb   : > { %1309 = vrot.lane.b32.xlu1 %v4480_v27, %s4255_s28  ;;  %1303 = vrot.lane.b32.xlu0 %v4480_v27, %s4253_s24  ;;  %v1337_v58 = vrot.slane %v4480_v27, 4  ;;  %v985_v6 = vrot.slane %v4525_v43, 4 }
  0xfc   : > { %1297 = vrot.lane.b32.xlu2 %v4480_v27, %s4254_s29 }
  0xfe   : > { %v618_v51 = vpop.f32.mrf.mxu0 }
  0xff   : > { %v661_v28 = vpop.f32.mrf.mxu2  ;;  %v619_v29 = vadd.f32 %v618_v51, %v496_v62 }
 0x100   : > { %v662_v30 = vadd.f32 %v661_v28, %v497_v46  ;;  %v641_v31 = vpop.f32.mrf.mxu1 }
 0x101   : > { %v684_v32 = vpop.f32.mrf.mxu3  ;;  %v4489_v33 = vadd.f32 %v641_v31, %v619_v29  ;;  %v4573_v29 = vunpack.c.0.s8 %v900_v15 }
 0x102   : > { %v4491_v34 = vadd.f32 %v684_v32, %v662_v30  ;;  %v499_v30 = vperm.slane %v4453_v41, 5 }
 0x103   : > { %v1449_v51 = vrot.slane %v4489_v33, 4 }
 0x104   : > { %1323 = vrot.lane.b32.xlu1 %v4491_v34, %s4253_s24  ;;  %1317 = vrot.lane.b32.xlu0 %v4491_v34, %s4254_s29  ;;  %v1361_v5 = vrot.slane %v4491_v34, 4 }
 0x105   : > { %1311 = vrot.lane.b32.xlu2 %v4489_v33, %s4255_s28 }
 0x107   : > { %v664_v35 = vpop.f32.mrf.mxu2 }
 0x108   : > { %v665_v36 = vadd.f32 %v664_v35, %v497_v46  ;;  %v498_v46 = vperm.slane %v4453_v41, 4 }
 0x109   : > { %v687_v37 = vpop.f32.mrf.mxu3 }
 0x10a   : > { %v4499_v38 = vadd.f32 %v687_v37, %v665_v36 }
 0x10c   : > { %1329 = vrot.lane.b32.xlu1 %v4491_v34, %s4255_s28  ;;  %1319 = vrot.lane.b32.xlu0 %v4499_v38, %s4254_s29 }
 0x10d   : > { %1331 = vrot.lane.b32.xlu2 %v4499_v38, %s4255_s28 }
 0x114   : > { %1299 = vrot.lane.b32.xlu1 %v4489_v33, %s4254_s29  ;;  %1325 = vrot.lane.b32.xlu0 %v4499_v38, %s4253_s24 }
 0x115   : > { %820 = vrot.lane.b32.xlu2 %v4467_v20, %s4255_s28 }
 0x11c   : > { %1305 = vrot.lane.b32.xlu1 %v4489_v33, %s4253_s24  ;;  %814 = vrot.lane.b32.xlu0 %v4467_v20, %s4253_s24 }
 0x11d   : > { %810 = vrot.lane.b32.xlu2 %v4515_v40, %s4254_s29  ;;  %v707_v59 = vpop.f32.mrf.mxu0 }
 0x11e   : > { %v708_v36 = vadd.f32 %v707_v59, %v498_v46 }
 0x11f   : > { %v753_v60 = vpop.f32.mrf.mxu2  ;;  %v730_v17 = vpop.f32.mrf.mxu1 }
 0x120   : > { %v754_v52 = vadd.f32 %v753_v60, %v499_v30 }
 0x123   : > { %v776_v18 = vpop.f32.mrf.mxu3 }
 0x124   : > { %840 = vrot.lane.b32.xlu1 %v4458_v1, %s4255_s28  ;;  %830 = vrot.lane.b32.xlu0 %v4525_v43, %s4254_s29 }
 0x125   : > { %822 = vrot.lane.b32.xlu2 %v4515_v40, %s4255_s28 }
 0x12b   : > { %v779_v14 = vpop.f32.mrf.mxu3 }
 0x12c   : > { %836 = vrot.lane.b32.xlu1 %v4525_v43, %s4253_s24  ;;  %816 = vrot.lane.b32.xlu0 %v4515_v40, %s4253_s24 }
 0x134   : > { %842 = vrot.lane.b32.xlu1 %v4525_v43, %s4255_s28 }
 0x143   : > { %v809_v44 = vpop.permute.xlu2 %808 }
 0x144   : > { %v861_v19 = vrot.slane %v809_v44, 4 }
 0x14b   : > { %v4539_v45 = vpop.permute.xlu2 %828 }
 0x14c   : > { %v885_v53 = vrot.slane %v4539_v45, 4 }
 0x151   : > { %v835_v49 = vpop.permute.xlu0 %834 }
 0x152   : > { %v871_v54 = vrot.slane %v835_v49, 4  ;;  %v874_v0 = vsel %vm847_vm0, %v835_v49, %v873_v55  ;;  %v1473_v49 = vrot.slane %v4499_v38, 4 }
 0x153   : > { %v4569_v2 = vperm.slane %v874_v0, %v4549_v63 }
 0x154   : > { %v872_v12 = vsel %vm847_vm0, %v871_v54, %v4458_v1 }
 0x155   : > { %v4566_v26 = vperm.slane %v872_v12, %v4549_v63  ;;  %v933_v41 = vrot.slane %v4569_v2, 4  ;;  %v4607_v12 = vadd.f32 %v776_v18, %v754_v52 }
 0x156   : > { %v1298_v47 = vpop.permute.xlu2 %1297 }
 0x157   : > { %v1349_v57 = vrot.slane %v1298_v47, 4  ;;  %v921_v54 = vrot.slane %v4566_v26, 4 }
 0x15f   : > { %v4541_v48 = vpop.permute.xlu2 %1311 }
 0x160   : > { %v1459_v15 = vrot.slane %v4541_v48, 4 }
 0x167   : > { %v4543_v50 = vpop.permute.xlu2 %1331 }
 0x16d   : > { %v1310_v3 = vpop.permute.xlu1 %1309  ;;  %v1304_v4 = vpop.permute.xlu0 %1303 }
 0x16e   : > { %v1347_v7 = vrot.slane %v1310_v3, 4  ;;  %v1350_v8 = vsel %vm847_vm0, %v1310_v3, %v1349_v57  ;;  %v1335_v9 = vrot.slane %v1304_v4, 4  ;;  %v1338_v10 = vsel %vm847_vm0, %v1304_v4, %v1337_v58  ;;  %v710_v58 = vpop.f32.mrf.mxu0  ;;  %v756_v3 = vpop.f32.mrf.mxu2 }
 0x16f   : > { %v821_v11 = vpop.permute.xlu2 %820  ;;  %v1358_v13 = vperm.slane %v1350_v8, %v4549_v63  ;;  %v1346_v16 = vperm.slane %v1338_v10, %v4549_v63 }
 0x170   : > { %v1348_v21 = vsel %vm847_vm0, %v1347_v7, %v1298_v47  ;;  %v1336_v22 = vsel %vm847_vm0, %v1335_v9, %v4480_v27  ;;  %v859_v62 = vrot.slane %v821_v11, 4  ;;  %v862_v27 = vsel %vm847_vm0, %v821_v11, %v861_v19 }
 0x171   : > { %v1354_v23 = vperm.slane %v1348_v21, %v4549_v63  ;;  %v1395_v24 = vrot.slane %v1358_v13, 4  ;;  %v1342_v1 = vperm.slane %v1336_v22, %v4549_v63  ;;  %v1397_v25 = vrot.slane %v1346_v16, 4 }
 0x172   : > { %v860_v39 = vsel %vm847_vm0, %v859_v62, %v809_v44  ;;  %v4586_v55 = vperm.slane %v862_v27, %v4549_v63  ;;  %v4605_v11 = vadd.f32 %v730_v17, %v708_v36  ;;  %v757_v21 = vadd.f32 %v756_v3, %v499_v30 }
 0x173   : > { %v1383_v28 = vrot.slane %v1354_v23, 4  ;;  %v1385_v31 = vrot.slane %v1342_v1, 4  ;;  %v1396_v32 = vsel %vm847_vm0, %v1395_v24, %v1346_v16  ;;  %v1398_v35 = vsel %vm847_vm0, %v1358_v13, %v1397_v25 }
 0x174   : > { %v4589_v59 = vperm.slane %v1396_v32, %v4573_v29  ;;  %v4592_v44 = vperm.slane %v1398_v35, %v4573_v29  ;;  %v4600_v8 = vperm.slane %v860_v39, %v4549_v63  ;;  %v711_v13 = vadd.f32 %v710_v58, %v498_v46 }
 0x175   : > { %v1384_v37 = vsel %vm847_vm0, %v1383_v28, %v1342_v1  ;;  %v1386_v4 = vsel %vm847_vm0, %v1354_v23, %v1385_v31  ;;  %v1483_v16 = vrot.slane %v4543_v50, 4  ;;  %v907_v17 = vrot.slane %v4586_v55, 4 }
 0x176   : > { %v1324_v42 = vpop.permute.xlu1 %1323  ;;  %v1318_v47 = vpop.permute.xlu0 %1317  ;;  %v4597_v7 = vperm.slane %v1384_v37, %v4573_v29  ;;  %v1394_v22 = vperm.slane %v1386_v4, %v4573_v29  ;;  %v1441_v62 = vrot.slane %v4589_v59, 4  ;;  %v895_v18 = vrot.slane %v4600_v8, 4 }
 0x177   : > { %v811_v57 = vpop.permute.xlu2 %810  ;;  %v1359_v0 = vrot.slane %v1324_v42, 4  ;;  %v1362_v60 = vsel %vm847_vm0, %v1324_v42, %v1361_v5  ;;  %v733_v5 = vpop.f32.mrf.mxu1  ;;  %v1373_v23 = vrot.slane %v1318_v47, 4  ;;  %v4619_v1 = vadd.f32 %v779_v14, %v757_v21 }
 0x178   : > { %v1370_v9 = vperm.slane %v1362_v60, %v4549_v63  ;;  %v4617_v24 = vadd.f32 %v733_v5, %v711_v13  ;;  %v1433_v25 = vrot.slane %v4597_v7, 4  ;;  %v973_v27 = vrot.slane %v811_v57, 4 }
 0x179   : > { %v1360_v10 = vsel %vm847_vm0, %v1359_v0, %v4491_v34  ;;  %v1445_v34 = vrot.slane %v4592_v44, 4  ;;  %v1437_v21 = vrot.slane %v1394_v22, 4 }
 0x17a   : > { %v1366_v19 = vperm.slane %v1360_v10, %v4549_v63  ;;  %v1421_v28 = vrot.slane %v1370_v9, 4  ;;  %v4637_v10 = vpack.i.bf16 %v4617_v24, %v4619_v1 }
 0x17c   : > { %v1409_v46 = vrot.slane %v1366_v19, 4  ;;  %3932 = vrot.lane.b32.xlu1 %v4637_v10, %s4253_s24  ;;  %3927 = vrot.lane.b32.xlu0 %v4637_v10, %s4254_s29 }
 0x17e   : > { %v1330_v30 = vpop.permute.xlu1 %1329  ;;  %v1320_v31 = vpop.permute.xlu0 %1319 }
 0x17f   : > { %v1371_v32 = vrot.slane %v1330_v30, 4  ;;  %v1374_v35 = vsel %vm847_vm0, %v1330_v30, %v1373_v23  ;;  %v1484_v36 = vsel %vm847_vm0, %v1483_v16, %v1320_v31  ;;  %v1485_v37 = vrot.slane %v1320_v31, 4  ;;  %v823_v39 = vpop.permute.xlu2 %822 }
 0x180   : > { %v1382_v42 = vperm.slane %v1374_v35, %v4549_v63  ;;  %v4626_v52 = vperm.slane %v1484_v36, %v4549_v63  ;;  %v971_v58 = vrot.slane %v823_v39, 4  ;;  %v974_v0 = vsel %vm847_vm0, %v823_v39, %v973_v27 }
 0x181   : > { %v1372_v60 = vsel %vm847_vm0, %v1371_v32, %v1318_v47  ;;  %v1486_v3 = vsel %vm847_vm0, %v4543_v50, %v1485_v37  ;;  %v4633_v4 = vperm.slane %v974_v0, %v4549_v63 }
 0x182   : > { %v1378_v13 = vperm.slane %v1372_v60, %v4549_v63  ;;  %v1419_v5 = vrot.slane %v1382_v42, 4  ;;  %v1422_v14 = vsel %vm847_vm0, %v1382_v42, %v1421_v28  ;;  %v1494_v16 = vperm.slane %v1486_v3, %v4549_v63 }
 0x183   : > { %v1430_v47 = vperm.slane %v1422_v14, %v4573_v29  ;;  %v1519_v23 = vrot.slane %v4626_v52, 4  ;;  %v972_v50 = vsel %vm847_vm0, %v971_v58, %v811_v57 }
 0x184   : > { %v1407_v27 = vrot.slane %v1378_v13, 4  ;;  %v1410_v30 = vsel %vm847_vm0, %v1378_v13, %v1409_v46  ;;  %v1420_v31 = vsel %vm847_vm0, %v1419_v5, %v1370_v9  ;;  %v1531_v42 = vrot.slane %v1494_v16, 4 }
 0x185   : > { %v1418_v28 = vperm.slane %v1410_v30, %v4573_v29  ;;  %v1426_v35 = vperm.slane %v1420_v31, %v4573_v29  ;;  %v1443_v36 = vrot.slane %v1430_v47, 4  ;;  %v4653_v37 = vsel %vm847_vm0, %v1430_v47, %v1445_v34 }
 0x186   : > { %v1408_v57 = vsel %vm847_vm0, %v1407_v27, %v1366_v19  ;;  %v4658_v58 = vperm.slane %v972_v50, %v4549_v63  ;;  %v1300_v46 = vpop.permute.xlu1 %1299  ;;  %v1326_v9 = vpop.permute.xlu0 %1325 }
 0x187   : > { %v1414_v0 = vperm.slane %v1408_v57, %v4573_v29  ;;  %v1435_v60 = vrot.slane %v1418_v28, 4  ;;  %v4662_v3 = vsel %vm847_vm0, %v1418_v28, %v1437_v21  ;;  %v1439_v13 = vrot.slane %v1426_v35, 4 }
 0x188   : > { %v4665_v34 = vsel %vm847_vm0, %v1426_v35, %v1441_v62  ;;  %v4669_v19 = vsel %vm847_vm0, %v1443_v36, %v4592_v44  ;;  %v1007_v14 = vrot.slane %v4658_v58, 4  ;;  %v1460_v31 = vsel %vm847_vm0, %v1459_v15, %v1300_v46 }
 0x189   : > { %v1431_v47 = vrot.slane %v1414_v0, 4  ;;  %v4674_v50 = vsel %vm847_vm0, %v1435_v60, %v1394_v22  ;;  %v4678_v21 = vsel %vm847_vm0, %v1439_v13, %v4589_v59  ;;  %v1597_v44 = vrot.slane %v4665_v34, 4 }
 0x18a   : > { %v1559_v62 = vrot.slane %v4674_v50, 4  ;;  %v1585_v30 = vrot.slane %v4678_v21, 4  ;;  %v1461_v28 = vrot.slane %v1300_v46, 4  ;;  %v1466_v22 = vperm.slane %v1460_v31, %v4549_v63 }
 0x18b   : > { %v1471_v35 = vrot.slane %v1326_v9, 4  ;;  %v1474_v59 = vsel %vm847_vm0, %v1326_v9, %v1473_v49  ;;  %v4697_v57 = vsel %vm847_vm0, %v4653_v37, %v1597_v44  ;;  %v4702_v15 = vsel %vm847_vm0, %v1431_v47, %v4597_v7 }
 0x18c   : > { %v4693_v36 = vsel %vm847_vm0, %v4669_v19, %v1585_v30  ;;  %v1482_v60 = vperm.slane %v1474_v59, %v4549_v63  ;;  %v1462_v46 = vsel %vm847_vm0, %v4541_v48, %v1461_v28  ;;  %v1495_v13 = vrot.slane %v1466_v22, 4 }
 0x18d   : > { %v1472_v49 = vsel %vm847_vm0, %v1471_v35, %v4499_v38  ;;  %v4711_v9 = vsel %vm847_vm0, %v1414_v0, %v1433_v25  ;;  %v1470_v30 = vperm.slane %v1462_v46, %v4549_v63 }
 0x18e   : > { %v1478_v44 = vperm.slane %v1472_v49, %v4549_v63  ;;  %v1532_v31 = vsel %vm847_vm0, %v1531_v42, %v1482_v60  ;;  %v1533_v47 = vrot.slane %v1482_v60, 4  ;;  %v1306_v59 = vpop.permute.xlu1 %1305  ;;  %v815_v39 = vpop.permute.xlu0 %814 }
 0x18f   : > { %v1538_v48 = vperm.slane %v1532_v31, %v4573_v29  ;;  %v1447_v28 = vrot.slane %v1306_v59, 4  ;;  %v1450_v38 = vsel %vm847_vm0, %v1306_v59, %v1449_v51  ;;  %v846_v7 = vrot.slane %v815_v39, 4 }
 0x190   : > { %v1507_v35 = vrot.slane %v1470_v30, 4  ;;  %v1520_v25 = vsel %vm847_vm0, %v1519_v23, %v1478_v44  ;;  %v1521_v0 = vrot.slane %v1478_v44, 4  ;;  %v1534_v46 = vsel %vm847_vm0, %v1494_v16, %v1533_v47 }
 0x191   : > { %v4723_v49 = vperm.slane %v1520_v25, %v4573_v29  ;;  %v1542_v42 = vperm.slane %v1534_v46, %v4573_v29  ;;  %v1551_v60 = vrot.slane %v1538_v48, 4  ;;  %v1448_v31 = vsel %vm847_vm0, %v1447_v28, %v4489_v33 }
 0x192   : > { %v1522_v27 = vsel %vm847_vm0, %v4626_v52, %v1521_v0  ;;  %v1454_v51 = vperm.slane %v1448_v31, %v4549_v63  ;;  %v1458_v59 = vperm.slane %v1450_v38, %v4549_v63  ;;  %v848_v23 = vsel %vm847_vm0, %v846_v7, %v4467_v20 }
 0x193   : > { %v1530_v16 = vperm.slane %v1522_v27, %v4573_v29  ;;  %v1543_v44 = vrot.slane %v4723_v49, 4  ;;  %v1555_v47 = vrot.slane %v1542_v42, 4  ;;  %v850_v25 = vsel %vm847_vm0, %v815_v39, %v849_v56 }
 0x194   : > { %v1496_v33 = vsel %vm847_vm0, %v1495_v13, %v1454_v51  ;;  %v1497_v28 = vrot.slane %v1454_v51, 4  ;;  %v1508_v52 = vsel %vm847_vm0, %v1507_v35, %v1458_v59  ;;  %v1509_v0 = vrot.slane %v1458_v59, 4 }
 0x195   : > { %v1547_v46 = vrot.slane %v1530_v16, 4  ;;  %v4742_v38 = vperm.slane %v1496_v33, %v4573_v29  ;;  %v1514_v7 = vperm.slane %v1508_v52, %v4573_v29  ;;  %v854_v27 = vperm.slane %v848_v23, %v4549_v63 }
 0x196   : > { %v1498_v31 = vsel %vm847_vm0, %v1466_v22, %v1497_v28  ;;  %v1510_v20 = vsel %vm847_vm0, %v1470_v30, %v1509_v0  ;;  %v858_v56 = vperm.slane %v850_v25, %v4549_v63  ;;  %v841_v39 = vpop.permute.xlu1 %840  ;;  %v4749_v13 = vpop.permute.xlu0 %830  ;;  %v4753_v35 = vsel %vm847_vm0, %v1559_v62, %v4702_v15 }
 0x197   : > { %v1506_v51 = vperm.slane %v1498_v31, %v4573_v29  ;;  %v1518_v59 = vperm.slane %v1510_v20, %v4573_v29  ;;  %v4759_v23 = vsel %vm847_vm0, %v1543_v44, %v4742_v38  ;;  %v1545_v22 = vrot.slane %v4742_v38, 4 }
 0x198   : > { %v1552_v30 = vsel %vm847_vm0, %v1551_v60, %v1514_v7  ;;  %v1553_v25 = vrot.slane %v1514_v7, 4  ;;  %v896_v62 = vsel %vm847_vm0, %v895_v18, %v854_v27 }
 0x199   : > { %v4768_v28 = vsel %vm847_vm0, %v1547_v46, %v1506_v51  ;;  %v1549_v52 = vrot.slane %v1506_v51, 4  ;;  %v1556_v0 = vsel %vm847_vm0, %v1555_v47, %v1518_v59  ;;  %v1557_v31 = vrot.slane %v1518_v59, 4 }
 0x19a   : > { %v4772_v44 = vsel %vm847_vm0, %v1538_v48, %v1553_v25  ;;  %v1671_v20 = vrot.slane %v4768_v28, 4  ;;  %v1695_v60 = vrot.slane %v1556_v0, 4  ;;  %v1697_v7 = vrot.slane %v1552_v30, 4 }
 0x19b   : > { %v4776_v33 = vsel %vm847_vm0, %v1530_v16, %v1549_v52  ;;  %v4779_v5 = vsel %vm847_vm0, %v1542_v42, %v1557_v31  ;;  %v897_v46 = vrot.slane %v854_v27, 4  ;;  %v4786_v59 = vperm.slane %v896_v62, %v4573_v29 }
 0x19c   : > { %v1696_v51 = vsel %vm847_vm0, %v1695_v60, %v1552_v30  ;;  %v1698_v47 = vsel %vm847_vm0, %v1556_v0, %v1697_v7  ;;  %v1707_v48 = vrot.slane %v4779_v5, 4  ;;  %v908_v27 = vsel %vm847_vm0, %v907_v17, %v858_v56 }
 0x19d   : > { %v4789_v25 = vperm.slane %v1696_v51, %v4549_v63  ;;  %v4792_v16 = vperm.slane %v1698_v47, %v4549_v63  ;;  %v898_v42 = vsel %vm847_vm0, %v4600_v8, %v897_v46  ;;  %v909_v52 = vrot.slane %v858_v56, 4 }
 0x19e   : > { %v4801_v30 = vsel %vm847_vm0, %v1707_v48, %v4772_v44  ;;  %v906_v62 = vperm.slane %v898_v42, %v4573_v29  ;;  %v914_v0 = vperm.slane %v908_v27, %v4573_v29  ;;  %v837_v31 = vpop.permute.xlu1 %836  ;;  %v883_v7 = vrot.slane %v841_v39, 4  ;;  %v817_v56 = vpop.permute.xlu0 %816 }
 0x19f   : > { %v886_v8 = vsel %vm847_vm0, %v841_v39, %v885_v53  ;;  %v910_v17 = vsel %vm847_vm0, %v4586_v55, %v909_v52  ;;  %v983_v60 = vrot.slane %v837_v31, 4  ;;  %v986_v53 = vsel %vm847_vm0, %v837_v31, %v985_v6 }
 0x1a0   : > { %v949_v51 = vrot.slane %v906_v62, 4  ;;  %v953_v47 = vrot.slane %v914_v0, 4  ;;  %v894_v48 = vperm.slane %v886_v8, %v4549_v63  ;;  %v918_v42 = vperm.slane %v910_v17, %v4573_v29 }
 0x1a1   : > { %v884_v27 = vsel %vm847_vm0, %v883_v7, %v4539_v45  ;;  %v4824_v52 = vperm.slane %v986_v53, %v4549_v63  ;;  %v984_v45 = vsel %vm847_vm0, %v983_v60, %v4525_v43  ;;  %v959_v7 = vrot.slane %v817_v56, 4 }
 0x1a2   : > { %v890_v39 = vperm.slane %v884_v27, %v4549_v63  ;;  %v931_v18 = vrot.slane %v894_v48, 4  ;;  %v934_v55 = vsel %vm847_vm0, %v894_v48, %v933_v41  ;;  %v957_v8 = vrot.slane %v918_v42, 4 }
 0x1a3   : > { %v942_v17 = vperm.slane %v934_v55, %v4573_v29  ;;  %v4835_v41 = vperm.slane %v984_v45, %v4549_v63 }
 0x1a4   : > { %v919_v46 = vrot.slane %v890_v39, 4  ;;  %v922_v6 = vsel %vm847_vm0, %v890_v39, %v921_v54  ;;  %v932_v31 = vsel %vm847_vm0, %v931_v18, %v4569_v2  ;;  %v1045_v54 = vrot.slane %v4824_v52, 4 }
 0x1a5   : > { %v930_v48 = vperm.slane %v922_v6, %v4573_v29  ;;  %v938_v27 = vperm.slane %v932_v31, %v4573_v29  ;;  %v955_v53 = vrot.slane %v942_v17, 4  ;;  %v958_v55 = vsel %vm847_vm0, %v942_v17, %v957_v8 }
 0x1a6   : > { %v920_v43 = vsel %vm847_vm0, %v919_v46, %v4566_v26  ;;  %v1107_v60 = vrot.slane %v958_v55, 4  ;;  %v960_v26 = vsel %vm847_vm0, %v959_v7, %v4515_v40  ;;  %v962_v7 = vsel %vm847_vm0, %v817_v56, %v961_v61 }
 0x1a7   : > { %v4845_v2 = vperm.slane %v920_v43, %v4573_v29  ;;  %v947_v18 = vrot.slane %v930_v48, 4  ;;  %v4848_v39 = vsel %vm847_vm0, %v930_v48, %v949_v51  ;;  %v951_v45 = vrot.slane %v938_v27, 4 }
 0x1a8   : > { %v954_v6 = vsel %vm847_vm0, %v938_v27, %v953_v47  ;;  %v956_v8 = vsel %vm847_vm0, %v955_v53, %v918_v42  ;;  %v1672_v40 = vsel %vm847_vm0, %v1671_v20, %v4759_v23  ;;  %v1683_v20 = vrot.slane %v4776_v33, 4 }
 0x1a9   : > { %v4857_v31 = vsel %vm847_vm0, %v947_v18, %v906_v62  ;;  %v952_v43 = vsel %vm847_vm0, %v951_v45, %v914_v0  ;;  %v1095_v32 = vrot.slane %v956_v8, 4  ;;  %v4862_v47 = vsel %vm847_vm0, %v1107_v60, %v954_v6 }
 0x1aa   : > { %v1097_v48 = vrot.slane %v952_v43, 4  ;;  %v1109_v42 = vrot.slane %v954_v6, 4  ;;  %v966_v62 = vperm.slane %v960_v26, %v4549_v63  ;;  %v4875_v0 = vsel %vm847_vm0, %v4723_v49, %v1545_v22 }
 0x1ab   : > { %v4865_v27 = vsel %vm847_vm0, %v1095_v32, %v952_v43  ;;  %v970_v32 = vperm.slane %v962_v7, %v4549_v63  ;;  %v1678_v22 = vperm.slane %v1672_v40, %v4549_v63  ;;  %v1714_v26 = vperm.slane %v4801_v30, %v4549_v63  ;;  %v843_v43 = vpop.permute.xlu1 %842 }
 0x1ac   : > { %v4878_v53 = vsel %vm847_vm0, %v956_v8, %v1097_v48  ;;  %v1110_v60 = vsel %vm847_vm0, %v958_v55, %v1109_v42  ;;  %v1008_v49 = vsel %vm847_vm0, %v1007_v14, %v966_v62  ;;  %v1009_v38 = vrot.slane %v966_v62, 4 }
 0x1ad   : > { %v4887_v61 = vperm.slane %v1110_v60, %v4549_v63  ;;  %v4894_v56 = vperm.slane %v1008_v49, %v4573_v29  ;;  %v5880_v55 = vrot.slane %v4633_v4, 4  ;;  %v1021_v45 = vrot.slane %v970_v32, 4 }
 0x1ae   : > { %v1010_v6 = vsel %vm847_vm0, %v4658_v58, %v1009_v38  ;;  %v1684_v62 = vsel %vm847_vm0, %v1683_v20, %v4875_v0  ;;  %v1721_v40 = vrot.slane %v1678_v22, 4  ;;  %v1745_v49 = vrot.slane %v4789_v25, 4 }
 0x1af   : > { %v1020_v18 = vsel %vm847_vm0, %v5880_v55, %v970_v32  ;;  %v4907_v48 = vperm.slane %v1010_v6, %v4573_v29  ;;  %v1022_v42 = vsel %vm847_vm0, %v4633_v4, %v1021_v45  ;;  %v1690_v32 = vperm.slane %v1684_v62, %v4549_v63 }
 0x1b0   : > { %v1026_v8 = vperm.slane %v1020_v18, %v4573_v29  ;;  %v1030_v58 = vperm.slane %v1022_v42, %v4573_v29  ;;  %v995_v38 = vrot.slane %v843_v43, 4  ;;  %v5881_v18 = vrot.slane %v4749_v13, 4 }
 0x1b1   : > { %v1061_v30 = vrot.slane %v4907_v48, 4  ;;  %v1722_v4 = vsel %vm847_vm0, %v1690_v32, %v1721_v40  ;;  %v1719_v20 = vrot.slane %v1690_v32, 4  ;;  %v1746_v42 = vsel %vm847_vm0, %v1714_v26, %v1745_v49 }
 0x1b2   : > { %v1065_v60 = vrot.slane %v1026_v8, 4  ;;  %v1069_v55 = vrot.slane %v1030_v58, 4  ;;  %v998_v45 = vsel %vm847_vm0, %v843_v43, %v5881_v18  ;;  %v1730_v6 = vperm.slane %v1722_v4, %v4573_v29 }
 0x1b3   : > { %v996_v62 = vsel %vm847_vm0, %v995_v38, %v4749_v13  ;;  %v1006_v7 = vperm.slane %v998_v45, %v4549_v63  ;;  %v1754_v17 = vperm.slane %v1746_v42, %v4573_v29  ;;  %v1720_v40 = vsel %vm847_vm0, %v1719_v20, %v1678_v22 }
 0x1b4   : > { %v1002_v51 = vperm.slane %v996_v62, %v4549_v63  ;;  %v1743_v46 = vrot.slane %v1714_v26, 4  ;;  %v1726_v32 = vperm.slane %v1720_v40, %v4573_v29  ;;  %v1773_v49 = vrot.slane %v1730_v6, 4 }
 0x1b5   : > { %v1043_v14 = vrot.slane %v1006_v7, 4  ;;  %v1046_v43 = vsel %vm847_vm0, %v1006_v7, %v1045_v54  ;;  %v1771_v4 = vrot.slane %v1754_v17, 4  ;;  %v5882_v13 = vrot.slane %v4835_v41, 4 }
 0x1b6   : > { %v1031_v18 = vrot.slane %v1002_v51, 4  ;;  %v1054_v45 = vperm.slane %v1046_v43, %v4573_v29  ;;  %v1744_v54 = vsel %vm847_vm0, %v1743_v46, %v4789_v25  ;;  %v1774_v26 = vsel %vm847_vm0, %v1754_v17, %v1773_v49 }
 0x1b7   : > { %v1034_v38 = vsel %vm847_vm0, %v1002_v51, %v5882_v13  ;;  %v1044_v22 = vsel %vm847_vm0, %v1043_v14, %v4824_v52  ;;  %v1772_v7 = vsel %vm847_vm0, %v1771_v4, %v1730_v6  ;;  %3792 = vmatpush.xpose.msk.msrb.mxu3 %vm2271_vm1, %v1774_v26  ;;  %v1561_v13 = vrot.slane %v4702_v15, 4 }
 0x1b8   : > { %v4939_v42 = vperm.slane %v1034_v38, %v4573_v29  ;;  %v1032_v20 = vsel %vm847_vm0, %v1031_v18, %v4835_v41  ;;  %v1050_v51 = vperm.slane %v1044_v22, %v4573_v29  ;;  %v1067_v62 = vrot.slane %v1054_v45, 4  ;;  %3788 = vmatpush.xpose.msk.msrb.mxu2 %vm2271_vm1, %v1772_v7 }
 0x1b9   : > { %v4953_v40 = vperm.slane %v1032_v20, %v4573_v29  ;;  %v4961_v17 = vsel %vm847_vm0, %v1054_v45, %v1069_v55  ;;  %v1750_v18 = vperm.slane %v1744_v54, %v4573_v29  ;;  %v1566_v45 = vperm.slane %v4753_v35, %v4549_v63 }
 0x1ba   : > { %v1059_v52 = vrot.slane %v4939_v42, 4  ;;  %v4958_v25 = vsel %vm847_vm0, %v4939_v42, %v1061_v30  ;;  %v1063_v41 = vrot.slane %v1050_v51, 4  ;;  %v4964_v46 = vsel %vm847_vm0, %v1050_v51, %v1065_v60 }
 0x1bb   : > { %v4967_v14 = vsel %vm847_vm0, %v1067_v62, %v1030_v58  ;;  %v1195_v6 = vrot.slane %v4958_v25, 4  ;;  %v1055_v43 = vrot.slane %v4953_v40, 4  ;;  %v1219_v4 = vrot.slane %v4961_v17, 4 }
 0x1bc   : > { %v1207_v49 = vrot.slane %v4967_v14, 4  ;;  %v1221_v30 = vrot.slane %v4964_v46, 4  ;;  %v4975_v55 = vsel %vm847_vm0, %v1063_v41, %v1026_v8  ;;  %v1769_v60 = vrot.slane %v1726_v32, 4 }
 0x1bd   : > { %v5883_v22 = vrot.slane %v4662_v3, 4  ;;  %v1767_v26 = vrot.slane %v1750_v18, 4  ;;  %v1573_v7 = vrot.slane %v4711_v9, 4  ;;  %v5884_v51 = vrot.slane %v4669_v19, 4 }
 0x1be   : > { %v4982_v38 = vsel %vm847_vm0, %v4961_v17, %v1221_v30  ;;  %v1770_v54 = vsel %vm847_vm0, %v1750_v18, %v1769_v60  ;;  %v5885_v35 = vrot.slane %v4653_v37, 4  ;;  %v1609_v30 = vrot.slane %v1566_v45, 4 }
 0x1bf   : > { %v1572_v8 = vsel %vm847_vm0, %v5883_v22, %v4711_v9  ;;  %3784 = vmatpush.xpose.msk.msrb.mxu1 %vm2271_vm1, %v1770_v54  ;;  %v1584_v62 = vsel %vm847_vm0, %v5884_v51, %v4678_v21  ;;  %v5886_v22 = vrot.slane %v4759_v23, 4  ;;  %v1768_v60 = vsel %vm847_vm0, %v1767_v26, %v1726_v32 }
 0x1c0   : > { %v1578_v20 = vperm.slane %v1572_v8, %v4549_v63  ;;  %v1596_v41 = vsel %vm847_vm0, %v5885_v35, %v4665_v34  ;;  %v1590_v8 = vperm.slane %v1584_v62, %v4549_v63  ;;  %3780 = vmatpush.xpose.msk.msrb.mxu0 %vm2271_vm1, %v1768_v60  ;;  %v5887_v34 = vrot.slane %v4875_v0, 4 }
 0x1c1   : > { %v1674_v18 = vsel %vm847_vm0, %v4768_v28, %v5886_v22  ;;  %v1602_v54 = vperm.slane %v1596_v41, %v4549_v63  ;;  %v5888_v23 = vrot.slane %v4772_v44, 4  ;;  %v1757_v32 = vrot.slane %v4792_v16, 4 }
 0x1c2   : > { %v1682_v19 = vperm.slane %v1674_v18, %v4549_v63  ;;  %v1610_v37 = vsel %vm847_vm0, %v1578_v20, %v1609_v30  ;;  %v1686_v21 = vsel %vm847_vm0, %v4776_v33, %v5887_v34  ;;  %v1633_v51 = vrot.slane %v1590_v8, 4 }
 0x1c3   : > { %v1710_v28 = vsel %vm847_vm0, %v4779_v5, %v5888_v23  ;;  %v1618_v26 = vperm.slane %v1610_v37, %v4573_v29  ;;  %v1694_v62 = vperm.slane %v1686_v21, %v4549_v63  ;;  %v1607_v30 = vrot.slane %v1578_v20, 4 }
 0x1c4   : > { %v1718_v35 = vperm.slane %v1710_v28, %v4549_v63  ;;  %v1733_v41 = vrot.slane %v1682_v19, 4  ;;  %v1631_v0 = vrot.slane %v1602_v54, 4  ;;  %v5889_v33 = vrot.slane %v4845_v2, 4 }
 0x1c5   : > { %v1634_v5 = vsel %vm847_vm0, %v1602_v54, %v1633_v51  ;;  %v1661_v18 = vrot.slane %v1618_v26, 4  ;;  %v1731_v60 = vrot.slane %v1694_v62, 4  ;;  %v1608_v20 = vsel %vm847_vm0, %v1607_v30, %v1566_v45 }
 0x1c6   : > { %v5028_v44 = vsel %vm847_vm0, %v5889_v33, %v4786_v59  ;;  %v1758_v22 = vsel %vm847_vm0, %v1718_v35, %v1757_v32  ;;  %v1642_v37 = vperm.slane %v1634_v5, %v4573_v29  ;;  %v1734_v34 = vsel %vm847_vm0, %v1694_v62, %v1733_v41 }
 0x1c7   : > { %v1766_v21 = vperm.slane %v1758_v22, %v4573_v29  ;;  %v1742_v23 = vperm.slane %v1734_v34, %v4573_v29  ;;  %v1614_v28 = vperm.slane %v1608_v20, %v4573_v29  ;;  %v1632_v33 = vsel %vm847_vm0, %v1631_v0, %v1590_v8 }
 0x1c8   : > { %v1732_v54 = vsel %vm847_vm0, %v1731_v60, %v1682_v19  ;;  %v1659_v51 = vrot.slane %v1642_v37, 4  ;;  %v1638_v58 = vperm.slane %v1632_v33, %v4573_v29  ;;  %v1662_v5 = vsel %vm847_vm0, %v1642_v37, %v1661_v18 }
 0x1c9   : > { %v1779_v32 = vrot.slane %v1766_v21, 4  ;;  %3793 = vmatpush.xpose.msk.msrb.mxu3 %vm2271_vm1, %v1662_v5  ;;  %v1738_v62 = vperm.slane %v1732_v54, %v4573_v29  ;;  %v1755_v41 = vrot.slane %v1718_v35, 4  ;;  %v1781_v45 = vrot.slane %v1742_v23, 4 }
 0x1ca   : > { %v1657_v30 = vrot.slane %v1614_v28, 4  ;;  %v1660_v22 = vsel %vm847_vm0, %v1659_v51, %v1618_v26  ;;  %v1655_v8 = vrot.slane %v1638_v58, 4  ;;  %v5890_v19 = vrot.slane %v4786_v59, 4 }
 0x1cb   : > { %v1780_v34 = vsel %vm847_vm0, %v1779_v32, %v1742_v23  ;;  %3789 = vmatpush.xpose.msk.msrb.mxu2 %vm2271_vm1, %v1660_v22  ;;  %v1756_v18 = vsel %vm847_vm0, %v1755_v41, %v4792_v16  ;;  %v1782_v35 = vsel %vm847_vm0, %v1766_v21, %v1781_v45  ;;  %v5891_v26 = vrot.slane %v4857_v31, 4 }
 0x1cc   : > { %v5050_v0 = vsel %vm847_vm0, %v4845_v2, %v5890_v19  ;;  %v1658_v60 = vsel %vm847_vm0, %v1638_v58, %v1657_v30  ;;  %v1656_v59 = vsel %vm847_vm0, %v1655_v8, %v1614_v28  ;;  %v1762_v2 = vperm.slane %v1756_v18, %v4573_v29 }
 0x1cd   : > { %v1072_v37 = vsel %vm847_vm0, %v5891_v26, %v5028_v44  ;;  %3808 = vmatpush.xpose.msk.msra.mxu3 %vm2271_vm1, %v1782_v35  ;;  %v1085_v16 = vrot.slane %v5050_v0, 4  ;;  %3781 = vmatpush.xpose.msk.msrb.mxu0 %vm2271_vm1, %v1656_v59  ;;  %v5892_v58 = vrot.slane %v4848_v39, 4  ;;  %v1102_v23 = vperm.slane %v4865_v27, %v4549_v63 }
 0x1ce   : > { %v1078_v20 = vperm.slane %v1072_v37, %v4549_v63  ;;  %3785 = vmatpush.xpose.msk.msrb.mxu1 %vm2271_vm1, %v1658_v60  ;;  %v1114_v28 = vperm.slane %v4862_v47, %v4549_v63  ;;  %v1777_v33 = vrot.slane %v1738_v62, 4  ;;  %v1775_v54 = vrot.slane %v1762_v2, 4 }
 0x1cf   : > { %3804 = vmatpush.xpose.msk.msra.mxu2 %vm2271_vm1, %v1780_v34  ;;  %v1084_v21 = vsel %vm847_vm0, %v5892_v58, %v5050_v0  ;;  %v1562_v5 = vsel %vm847_vm0, %v4674_v50, %v1561_v13  ;;  %v1145_v41 = vrot.slane %v1102_v23, 4  ;;  %v1574_v15 = vsel %vm847_vm0, %v4662_v3, %v1573_v7 }
 0x1d0   : > { %v1090_v51 = vperm.slane %v1084_v21, %v4549_v63  ;;  %v1121_v32 = vrot.slane %v1078_v20, 4  ;;  %v1143_v45 = vrot.slane %v1114_v28, 4  ;;  %v1778_v30 = vsel %vm847_vm0, %v1762_v2, %v1777_v33 }
 0x1d1   : > { %v1570_v22 = vperm.slane %v1562_v5, %v4549_v63  ;;  %v1776_v27 = vsel %vm847_vm0, %v1775_v54, %v1738_v62  ;;  %v1146_v13 = vsel %vm847_vm0, %v1114_v28, %v1145_v41  ;;  %v1582_v62 = vperm.slane %v1574_v15, %v4549_v63 }
 0x1d2   : > { %v1122_v47 = vsel %vm847_vm0, %v1090_v51, %v1121_v32  ;;  %v1119_v34 = vrot.slane %v1090_v51, 4  ;;  %3800 = vmatpush.xpose.msk.msra.mxu1 %vm2271_vm1, %v1778_v30  ;;  %3796 = vmatpush.xpose.msk.msra.mxu0 %vm2271_vm1, %v1776_v27  ;;  %v1144_v8 = vsel %vm847_vm0, %v1143_v45, %v1102_v23  ;;  %v1154_v19 = vperm.slane %v1146_v13, %v4573_v29 }
 0x1d3   : > { %v1130_v50 = vperm.slane %v1122_v47, %v4573_v29  ;;  %v1150_v35 = vperm.slane %v1144_v8, %v4573_v29  ;;  %v1594_v9 = vperm.slane %v4693_v36, %v4549_v63  ;;  %v1606_v7 = vperm.slane %v4697_v57, %v4549_v63 }
 0x1d4   : > { %v1120_v18 = vsel %vm847_vm0, %v1119_v34, %v1078_v20  ;;  %v1621_v60 = vrot.slane %v1570_v22, 4  ;;  %v1171_v37 = vrot.slane %v1154_v19, 4  ;;  %v1619_v58 = vrot.slane %v1582_v62, 4 }
 0x1d5   : > { %v1126_v3 = vperm.slane %v1120_v18, %v4573_v29  ;;  %v1173_v26 = vrot.slane %v1130_v50, 4  ;;  %v1167_v59 = vrot.slane %v1150_v35, 4  ;;  %v1645_v2 = vrot.slane %v1594_v9, 4 }
 0x1d6   : > { %v1622_v21 = vsel %vm847_vm0, %v1582_v62, %v1621_v60  ;;  %v1643_v28 = vrot.slane %v1606_v7, 4  ;;  %v1172_v33 = vsel %vm847_vm0, %v1171_v37, %v1130_v50  ;;  %v1620_v5 = vsel %vm847_vm0, %v1619_v58, %v1570_v22 }
 0x1d7   : > { %v1174_v20 = vsel %vm847_vm0, %v1154_v19, %v1173_v26  ;;  %v1169_v23 = vrot.slane %v1126_v3, 4  ;;  %v1168_v36 = vsel %vm847_vm0, %v1167_v59, %v1126_v3  ;;  %v1630_v54 = vperm.slane %v1622_v21, %v4573_v29  ;;  %3790 = vmatmul.msk.f32.vlgmr.msrb.gmra.mxu2 %vm2271_vm1, %v1172_v33 }
 0x1d8   : > { %v1646_v57 = vsel %vm847_vm0, %v1606_v7, %v1645_v2  ;;  %3794 = vmatmul.msk.f32.vlgmr.msrb.gmra.mxu3 %vm2271_vm1, %v1174_v20  ;;  %3782 = vmatmul.msk.f32.vlgmr.msrb.gmra.mxu0 %vm2271_vm1, %v1168_v36  ;;  %v1073_v41 = vrot.slane %v5028_v44, 4  ;;  %v1626_v45 = vperm.slane %v1620_v5, %v4573_v29  ;;  %v1644_v30 = vsel %vm847_vm0, %v1643_v28, %v1594_v9 }
 0x1d9   : > { %v1654_v51 = vperm.slane %v1646_v57, %v4573_v29  ;;  %v1170_v32 = vsel %vm847_vm0, %v1150_v35, %v1169_v23  ;;  %v1669_v27 = vrot.slane %v1630_v54, 4  ;;  %v5124_v47 = vsel %vm847_vm0, %v1055_v43, %v4894_v56 }
 0x1da   : > { %3786 = vmatmul.msk.f32.vlgmr.msrb.gmra.mxu1 %vm2271_vm1, %v1170_v32  ;;  %v1650_v15 = vperm.slane %v1644_v30, %v4573_v29  ;;  %v5893_v22 = vrot.slane %v4894_v56, 4  ;;  %v5137_v50 = vsel %vm847_vm0, %v1059_v52, %v4907_v48  ;;  %v1665_v8 = vrot.slane %v1626_v45, 4 }
 0x1db   : > { %v1667_v34 = vrot.slane %v1654_v51, 4  ;;  %v1670_v13 = vsel %vm847_vm0, %v1654_v51, %v1669_v27  ;;  %v1183_v43 = vrot.slane %v5137_v50, 4  ;;  %v1185_v62 = vrot.slane %v5124_v47, 4 }
 0x1dc   : > { %v5131_v44 = vsel %vm847_vm0, %v4953_v40, %v5893_v22  ;;  %v1663_v56 = vrot.slane %v1650_v15, 4  ;;  %3809 = vmatpush.xpose.msk.msra.mxu3 %vm2271_vm1, %v1670_v13  ;;  %v1666_v40 = vsel %vm847_vm0, %v1650_v15, %v1665_v8  ;;  %v1208_v35 = vsel %vm847_vm0, %v1207_v49, %v4975_v55 }
 0x1dd   : > { %v1668_v19 = vsel %vm847_vm0, %v1667_v34, %v1630_v54  ;;  %v1196_v42 = vsel %vm847_vm0, %v1195_v6, %v5131_v44  ;;  %v1197_v48 = vrot.slane %v5131_v44, 4  ;;  %v1184_v52 = vsel %vm847_vm0, %v1183_v43, %v5124_v47  ;;  %3801 = vmatpush.xpose.msk.msra.mxu1 %vm2271_vm1, %v1666_v40 }
 0x1de   : > { %3805 = vmatpush.xpose.msk.msra.mxu2 %vm2271_vm1, %v1668_v19  ;;  %v1202_v18 = vperm.slane %v1196_v42, %v4549_v63  ;;  %v1664_v9 = vsel %vm847_vm0, %v1663_v56, %v1626_v45  ;;  %v1190_v6 = vperm.slane %v1184_v52, %v4549_v63  ;;  %v1214_v3 = vperm.slane %v1208_v35, %v4549_v63 }
 0x1df   : > { %v1220_v7 = vsel %vm847_vm0, %v1219_v4, %v4964_v46  ;;  %3797 = vmatpush.xpose.msk.msra.mxu0 %vm2271_vm1, %v1664_v9  ;;  %v1074_v49 = vsel %vm847_vm0, %v4857_v31, %v1073_v41  ;;  %v1086_v37 = vsel %vm847_vm0, %v4848_v39, %v1085_v16  ;;  %v1106_v21 = vperm.slane %v4878_v53, %v4549_v63 }
 0x1e0   : > { %v1226_v60 = vperm.slane %v1220_v7, %v4549_v63  ;;  %v1231_v26 = vrot.slane %v1202_v18, 4  ;;  %v1233_v59 = vrot.slane %v1190_v6, 4  ;;  %v1257_v2 = vrot.slane %v1214_v3, 4 }
 0x1e1   : > { %v1082_v58 = vperm.slane %v1074_v49, %v4549_v63  ;;  %v1094_v17 = vperm.slane %v1086_v37, %v4549_v63  ;;  %v1155_v20 = vrot.slane %v4887_v61, 4  ;;  %v1157_v15 = vrot.slane %v1106_v21, 4 }
 0x1e2   : > { %v1232_v46 = vsel %vm847_vm0, %v1231_v26, %v1190_v6  ;;  %v1255_v4 = vrot.slane %v1226_v60, 4  ;;  %v1234_v0 = vsel %vm847_vm0, %v1202_v18, %v1233_v59  ;;  %v1258_v39 = vsel %vm847_vm0, %v1226_v60, %v1257_v2 }
 0x1e3   : > { %v1238_v31 = vperm.slane %v1232_v46, %v4573_v29  ;;  %v1131_v16 = vrot.slane %v1094_v17, 4  ;;  %v1242_v28 = vperm.slane %v1234_v0, %v4573_v29  ;;  %v1266_v33 = vperm.slane %v1258_v39, %v4573_v29 }
 0x1e4   : > { %v1256_v23 = vsel %vm847_vm0, %v1255_v4, %v1214_v3  ;;  %v1156_v36 = vsel %vm847_vm0, %v1155_v20, %v1106_v21  ;;  %v1133_v45 = vrot.slane %v1082_v58, 4  ;;  %v1158_v40 = vsel %vm847_vm0, %v4887_v61, %v1157_v15 }
 0x1e5   : > { %v1262_v54 = vperm.slane %v1256_v23, %v4573_v29  ;;  %v1281_v53 = vrot.slane %v1238_v31, 4  ;;  %v1132_v57 = vsel %vm847_vm0, %v1131_v16, %v1082_v58  ;;  %v1162_v51 = vperm.slane %v1156_v36, %v4573_v29 }
 0x1e6   : > { %v1283_v32 = vrot.slane %v1266_v33, 4  ;;  %v1285_v5 = vrot.slane %v1242_v28, 4  ;;  %v1138_v41 = vperm.slane %v1132_v57, %v4573_v29  ;;  %v1134_v8 = vsel %vm847_vm0, %v1094_v17, %v1133_v45 }
 0x1e7   : > { %v1279_v30 = vrot.slane %v1262_v54, 4  ;;  %v1282_v27 = vsel %vm847_vm0, %v1262_v54, %v1281_v53  ;;  %v1175_v34 = vrot.slane %v1162_v51, 4  ;;  %v1142_v56 = vperm.slane %v1134_v8, %v4573_v29 }
 0x1e8   : > { %3787 = vmatmul.msk.f32.gmra.mxu1 %vm2271_vm1, %v1282_v27  ;;  %v1284_v22 = vsel %vm847_vm0, %v1283_v32, %v1242_v28  ;;  %v1286_v44 = vsel %vm847_vm0, %v1266_v33, %v1285_v5  ;;  %v1177_v13 = vrot.slane %v1138_v41, 4  ;;  %v1186_v52 = vsel %vm847_vm0, %v5137_v50, %v1185_v62 }
 0x1e9   : > { %v1280_v43 = vsel %vm847_vm0, %v1279_v30, %v1238_v31  ;;  %3791 = vmatmul.msk.f32.gmra.mxu2 %vm2271_vm1, %v1284_v22  ;;  %3795 = vmatmul.msk.f32.gmra.mxu3 %vm2271_vm1, %v1286_v44  ;;  %v1176_v19 = vsel %vm847_vm0, %v1175_v34, %v1138_v41  ;;  %v1198_v18 = vsel %vm847_vm0, %v4958_v25, %v1197_v48  ;;  %v1181_v9 = vrot.slane %v1142_v56, 4 }
 0x1ea   : > { %3783 = vmatmul.msk.f32.gmra.mxu0 %vm2271_vm1, %v1280_v43  ;;  %v1178_v42 = vsel %vm847_vm0, %v1162_v51, %v1177_v13  ;;  %v1166_v35 = vperm.slane %v1158_v40, %v4573_v29  ;;  %v1194_v6 = vperm.slane %v1186_v52, %v4549_v63  ;;  %v1206_v3 = vperm.slane %v1198_v18, %v4549_v63 }
 0x1eb   : > { %v5894_v7 = vrot.slane %v4975_v55, 4  ;;  %v1230_v47 = vperm.slane %v4982_v38, %v4549_v63 }
 0x1ec   : > { %v1179_v60 = vrot.slane %v1166_v35, 4  ;;  %v1182_v50 = vsel %vm847_vm0, %v1166_v35, %v1181_v9  ;;  %v1243_v62 = vrot.slane %v1206_v3, 4  ;;  %v1245_v26 = vrot.slane %v1194_v6, 4 }
 0x1ed   : > { %v1210_v61 = vsel %vm847_vm0, %v4967_v14, %v5894_v7  ;;  %v1267_v48 = vrot.slane %v1230_v47, 4  ;;  %v3941_v7 = vpack.i.bf16 %v4605_v11, %v4607_v12 }
 0x1ee   : > { %v1218_v25 = vperm.slane %v1210_v61, %v4549_v63  ;;  %v1180_v49 = vsel %vm847_vm0, %v1179_v60, %v1142_v56  ;;  %v1244_v55 = vsel %vm847_vm0, %v1243_v62, %v1194_v6  ;;  %v1246_v59 = vsel %vm847_vm0, %v1206_v3, %v1245_v26  ;;  %v5306_v60 = vpop.permute.xlu1 %3932 }
 0x1ef   : > { %v1250_v14 = vperm.slane %v1244_v55, %v4573_v29  ;;  %v1254_v58 = vperm.slane %v1246_v59, %v4573_v29 }
 0x1f0   : > { %v1269_v37 = vrot.slane %v1218_v25, 4  ;;  %3802 = vmatmul.msk.f32.vlgmr.msra.gmra.mxu1 %vm2271_vm1, %v1178_v42  ;;  %v1268_v38 = vsel %vm847_vm0, %v1267_v48, %v1218_v25 }
 0x1f1   : > { %3806 = vmatmul.msk.f32.vlgmr.msra.gmra.mxu2 %vm2271_vm1, %v1180_v49  ;;  %3810 = vmatmul.msk.f32.vlgmr.msra.gmra.mxu3 %vm2271_vm1, %v1182_v50  ;;  %v1274_v2 = vperm.slane %v1268_v38, %v4573_v29  ;;  %v1289_v4 = vrot.slane %v1250_v14, 4  ;;  %v1293_v20 = vrot.slane %v1254_v58, 4  ;;  %v5309_v50 = vpop.permute.xlu0 %3927 }
 0x1f2   : > { %v1270_v17 = vsel %vm847_vm0, %v1230_v47, %v1269_v37  ;;  %3798 = vmatmul.msk.f32.vlgmr.msra.gmra.mxu0 %vm2271_vm1, %v1176_v19 }
 0x1f3   : > { %v1278_v46 = vperm.slane %v1270_v17, %v4573_v29  ;;  %v1287_v31 = vrot.slane %v1274_v2, 4  ;;  %v1290_v0 = vsel %vm847_vm0, %v1274_v2, %v1289_v4 }
 0x1f5   : > { %v1291_v21 = vrot.slane %v1278_v46, 4  ;;  %v1294_v16 = vsel %vm847_vm0, %v1278_v46, %v1293_v20  ;;  %v1288_v23 = vsel %vm847_vm0, %v1287_v31, %v1250_v14 }
 0x1f7   : > { %v1292_v39 = vsel %vm847_vm0, %v1291_v21, %v1254_v58 }
 0x1f8   : > { %3803 = vmatmul.msk.f32.gmra.mxu1 %vm2271_vm1, %v1290_v0 }
 0x1f9   : > { %3807 = vmatmul.msk.f32.gmra.mxu2 %vm2271_vm1, %v1292_v39  ;;  %3811 = vmatmul.msk.f32.gmra.mxu3 %vm2271_vm1, %v1294_v16 }
 0x1fa   : > { %3799 = vmatmul.msk.f32.gmra.mxu0 %vm2271_vm1, %v1288_v23 }
 0x255   : > { %v5245_v28 = vpop.f32.mrf.mxu0 }
 0x256   : > { %v2553_v33 = vsel %vm2552_vm2, %v5245_v28, -inf }
 0x257   : > { %2554 = vmax.xlane.f32.xlu2 %v2553_v33  ;;  %v2336_v54 = vpop.f32.mrf.mxu1 }
 0x258   : > { %v2559_v32 = vsel %vm2552_vm2, %v2336_v54, -inf }
 0x25a   : > { %v2371_v53 = vpop.f32.mrf.mxu2 }
 0x25b   : > { %v2406_v36 = vpop.f32.mrf.mxu3  ;;  %v2565_v51 = vsel %vm2552_vm2, %v2371_v53, -inf }
 0x25c   : > { %v2571_v57 = vsel %vm2552_vm2, %v2406_v36, -inf  ;;  %2566 = vmax.xlane.f32.xlu0 %v2565_v51 }
 0x25d   : > { %2572 = vmax.xlane.f32.xlu1 %v2571_v57 }
 0x25f   : > { %2560 = vmax.xlane.f32.xlu2 %v2559_v32 }
 0x265   : > { %v5252_v5 = vpop.f32.mrf.mxu1 }
 0x266   : > { %v2562_v41 = vsel %vm2552_vm2, %v5252_v5, -inf }
 0x267   : > { %v5256_v45 = vpop.f32.mrf.mxu0  ;;  %2563 = vmax.xlane.f32.xlu0 %v2562_v41 }
 0x268   : > { %v2556_v30 = vsel %vm2552_vm2, %v5256_v45, -inf }
 0x269   : > { %2557 = vmax.xlane.f32.xlu2 %v2556_v30 }
 0x26c   : > { %v5260_v27 = vpop.f32.mrf.mxu2  ;;  %v5262_v34 = vpop.f32.mrf.mxu3 }
 0x26d   : > { %v2574_v15 = vsel %vm2552_vm2, %v5262_v34, -inf  ;;  %v2568_v22 = vsel %vm2552_vm2, %v5260_v27, -inf  ;;  %v5268_v44 = vpop.f32.mrf.mxu1 }
 0x26e   : > { %2575 = vmax.xlane.f32.xlu1 %v2574_v15  ;;  %v2583_v43 = vsel %vm2552_vm2, %v5268_v44, -inf }
 0x26f   : > { %2569 = vmax.xlane.f32.xlu0 %v2568_v22  ;;  %v5270_v13 = vpop.f32.mrf.mxu0 }
 0x270   : > { %v2577_v56 = vsel %vm2552_vm2, %v5270_v13, -inf }
 0x274   : > { %v5272_v8 = vpop.f32.mrf.mxu3  ;;  %v5280_v42 = vpop.f32.mrf.mxu2 }
 0x275   : > { %v2595_v19 = vsel %vm2552_vm2, %v5272_v8, -inf  ;;  %v5282_v40 = vpop.f32.mrf.mxu1  ;;  %v2589_v52 = vsel %vm2552_vm2, %v5280_v42, -inf }
 0x276   : > { %2584 = vmax.xlane.f32.xlu1 %v2583_v43  ;;  %2596 = vmax.xlane.f32.xlu2 %v2595_v19  ;;  %v2586_v18 = vsel %vm2552_vm2, %v5282_v40, -inf }
 0x277   : > { %2578 = vmax.xlane.f32.xlu0 %v2577_v56  ;;  %v5288_v35 = vpop.f32.mrf.mxu0 }
 0x278   : > { %v2580_v3 = vsel %vm2552_vm2, %v5288_v35, -inf }
 0x27c   : > { %v5290_v9 = vpop.f32.mrf.mxu2  ;;  %v5302_v61 = vpop.f32.mrf.mxu3 }
 0x27d   : > { %v2592_v6 = vsel %vm2552_vm2, %v5290_v9, -inf  ;;  %v2598_v47 = vsel %vm2552_vm2, %v5302_v61, -inf }
 0x27e   : > { %2590 = vmax.xlane.f32.xlu1 %v2589_v52  ;;  %2587 = vmax.xlane.f32.xlu2 %v2586_v18 }
 0x286   : > { %2593 = vmax.xlane.f32.xlu2 %v2592_v6  ;;  %2581 = vmax.xlane.f32.xlu1 %v2580_v3 }
 0x28b   : > { %3942 = vrot.lane.b32.xlu0 %v3941_v7, %s4253_s24 }
 0x29e   : > { %3937 = vrot.lane.b32.xlu2 %v3941_v7, %s4254_s29 }
 0x29f   : > { %3947 = vrot.lane.b32.xlu1 %v4637_v10, %s4255_s28 }
 0x2b5   : > { %2599 = vmax.xlane.f32.xlu0 %v2598_v47 }
 0x2c9   : > { %3952 = vrot.lane.b32.xlu0 %v3941_v7, %s4255_s28 }
 0x2ca   : > { %v2555_v25 = vpop.xlane.xlu2 %2554 }
 0x2cb   : > { %v2601_v20 = vsub.f32 %v5245_v28, %v2555_v25 }
 0x2cd   : > { %v2617_v33 = vmul.f32 1.442695, %v2601_v20  ;;  %v3935_v20 = vunpack.i.h.bf16 %v5306_v60 }
 0x2cf   : > { %v2567_v26 = vpop.xlane.xlu0 %2566 }
 0x2d0   : > { %v2573_v62 = vpop.xlane.xlu1 %2572  ;;  %v2605_v10 = vsub.f32 %v2371_v53, %v2567_v26 }
 0x2d1   : > { %v2607_v48 = vsub.f32 %v2406_v36, %v2573_v62 }
 0x2d2   : > { %v2561_v55 = vpop.xlane.xlu2 %2560  ;;  %v2625_v38 = vmul.f32 1.442695, %v2605_v10 }
 0x2d3   : > { %v2629_v49 = vmul.f32 1.442695, %v2607_v48  ;;  %v2603_v37 = vsub.f32 %v2336_v54, %v2561_v55 }
 0x2d5   : > { %3986 = vpow2.f32 %v2629_v49  ;;  %v2621_v14 = vmul.f32 1.442695, %v2603_v37 }
 0x2d7   : > { %3988 = vpow2.f32 %v2621_v14 }
 0x2d8   : > { %3990 = vpow2.f32 %v2625_v38 }
 0x2da   : > { %v2564_v59 = vpop.xlane.xlu0 %2563 }
 0x2db   : > { %v5311_v2 = vpop.eup %3986  ;;  %v2604_v36 = vsub.f32 %v5252_v5, %v2564_v59 }
 0x2dc   : > { %v2558_v58 = vpop.xlane.xlu2 %2557  ;;  %v2667_v17 = vsel %vm2552_vm2, %v5311_v2, 0.0 }
 0x2dd   : > { %2668 = vadd.xlane.f32.xlu1 %v2667_v17  ;;  %v5315_v46 = vpop.eup %3988  ;;  %v2602_v4 = vsub.f32 %v5256_v45, %v2558_v58  ;;  %v2623_v57 = vmul.f32 1.442695, %v2604_v36 }
 0x2de   : > { %v2655_v21 = vsel %vm2552_vm2, %v5315_v46, 0.0  ;;  %v5322_v23 = vpop.eup %3990 }
 0x2df   : > { %2656 = vadd.xlane.f32.xlu2 %v2655_v21  ;;  %v2619_v0 = vmul.f32 1.442695, %v2602_v4  ;;  %v2661_v53 = vsel %vm2552_vm2, %v5322_v23, 0.0 }
 0x2e1   : > { %v2576_v31 = vpop.xlane.xlu1 %2575  ;;  %3992 = vpow2.f32 %v2619_v0  ;;  %v3934_v0 = vunpack.i.l.bf16 %v5306_v60 }
 0x2e2   : > { %v2570_v39 = vpop.xlane.xlu0 %2569  ;;  %v2608_v28 = vsub.f32 %v5262_v34, %v2576_v31 }
 0x2e3   : > { %v2606_v16 = vsub.f32 %v5260_v27, %v2570_v39  ;;  %v1937_v39 = vrot.slane %v4617_v24, 4 }
 0x2e4   : > { %v2631_v15 = vmul.f32 1.442695, %v2608_v28 }
 0x2e5   : > { %v2627_v54 = vmul.f32 1.442695, %v2606_v16  ;;  %v1961_v16 = vrot.slane %v4619_v1, 4  ;;  %v1938_v28 = vsel %vm847_vm0, %v3935_v20, %v1937_v39 }
 0x2e7   : > { %3994 = vpow2.f32 %v2627_v54  ;;  %2662 = vadd.xlane.f32.xlu2 %v2661_v53  ;;  %v5329_v30 = vpop.eup %3992  ;;  %v1959_v54 = vrot.slane %v3934_v0, 4  ;;  %v3930_v53 = vunpack.i.h.bf16 %v5309_v50 }
 0x2e8   : > { %3996 = vpow2.f32 %v2617_v33  ;;  %v2652_v34 = vsel %vm2552_vm2, %v5329_v30, 0.0  ;;  %v1935_v33 = vrot.slane %v3935_v20, 4 }
 0x2e9   : > { %v2585_v51 = vpop.xlane.xlu1 %2584  ;;  %v2597_v32 = vpop.xlane.xlu2 %2596  ;;  %3998 = vpow2.f32 %v2623_v57 }
 0x2ea   : > { %v2615_v41 = vsub.f32 %v5272_v8, %v2597_v32  ;;  %v2579_v45 = vpop.xlane.xlu0 %2578  ;;  %v1936_v60 = vsel %vm847_vm0, %v1935_v33, %v4617_v24  ;;  %v3929_v32 = vunpack.i.l.bf16 %v5309_v50 }
 0x2eb   : > { %v2609_v22 = vsub.f32 %v5270_v13, %v2579_v45  ;;  %v1960_v45 = vsel %vm847_vm0, %v1959_v54, %v4619_v1 }
 0x2ec   : > { %v2645_v27 = vmul.f32 1.442695, %v2615_v41 }
 0x2ed   : > { %v5331_v5 = vpop.eup %3994  ;;  %v2633_v8 = vmul.f32 1.442695, %v2609_v22 }
 0x2ee   : > { %v2664_v43 = vsel %vm2552_vm2, %v5331_v5, 0.0  ;;  %v5336_v19 = vpop.eup %3996  ;;  %4000 = vpow2.f32 %v2645_v27  ;;  %v1942_v27 = vperm.slane %v1936_v60, %v4549_v63 }
 0x2ef   : > { %2665 = vadd.xlane.f32.xlu1 %v2664_v43  ;;  %2653 = vadd.xlane.f32.xlu2 %v2652_v34  ;;  %4002 = vpow2.f32 %v2631_v15  ;;  %v2649_v13 = vsel %vm2552_vm2, %v5336_v19, 0.0  ;;  %v5343_v6 = vpop.eup %3998  ;;  %v1946_v15 = vperm.slane %v1938_v28, %v4549_v63  ;;  %v1949_v43 = vrot.slane %v3930_v53, 4 }
 0x2f0   : > { %4004 = vpow2.f32 %v2633_v8  ;;  %v2658_v47 = vsel %vm2552_vm2, %v5343_v6, 0.0  ;;  %v1973_v34 = vrot.slane %v3929_v32, 4 }
 0x2f1   : > { %v2591_v56 = vpop.xlane.xlu1 %2590  ;;  %v2588_v52 = vpop.xlane.xlu2 %2587 }
 0x2f2   : > { %v2613_v18 = vsub.f32 %v5280_v42, %v2591_v56  ;;  %v2611_v42 = vsub.f32 %v5268_v44, %v2585_v51  ;;  %v2612_v37 = vsub.f32 %v5282_v40, %v2588_v52  ;;  %v1962_v51 = vsel %vm847_vm0, %v3934_v0, %v1961_v16 }
 0x2f3   : > { %2650 = vadd.xlane.f32.xlu0 %v2649_v13  ;;  %v1970_v22 = vperm.slane %v1962_v51, %v4549_v63  ;;  %v1966_v52 = vperm.slane %v1960_v45, %v4549_v63 }
 0x2f4   : > { %v5345_v3 = vpop.eup %4000  ;;  %v2641_v7 = vmul.f32 1.442695, %v2613_v18  ;;  %v2637_v14 = vmul.f32 1.442695, %v2611_v42  ;;  %v2639_v58 = vmul.f32 1.442695, %v2612_v37 }
 0x2f5   : > { %v2691_v25 = vsel %vm2552_vm2, %v5345_v3, 0.0  ;;  %v5351_v62 = vpop.eup %4002 }
 0x2f6   : > { %4006 = vpow2.f32 %v2641_v7  ;;  %v2670_v49 = vsel %vm2552_vm2, %v5351_v62, 0.0  ;;  %v5357_v55 = vpop.eup %4004 }
 0x2f7   : > { %2659 = vadd.xlane.f32.xlu1 %v2658_v47  ;;  %2692 = vadd.xlane.f32.xlu2 %v2691_v25  ;;  %v2673_v59 = vsel %vm2552_vm2, %v5357_v55, 0.0  ;;  %v1997_v47 = vrot.slane %v1946_v15, 4 }
 0x2f9   : > { %v2594_v48 = vpop.xlane.xlu2 %2593  ;;  %v2582_v38 = vpop.xlane.xlu1 %2581 }
 0x2fa   : > { %v2614_v26 = vsub.f32 %v5290_v9, %v2594_v48  ;;  %v2610_v9 = vsub.f32 %v5288_v35, %v2582_v38  ;;  %v1985_v48 = vrot.slane %v1942_v27, 4 }
 0x2fb   : > { %2671 = vadd.xlane.f32.xlu0 %v2670_v49 }
 0x2fc   : > { %v2643_v10 = vmul.f32 1.442695, %v2614_v26  ;;  %v5362_v44 = vpop.eup %4006  ;;  %v2635_v40 = vmul.f32 1.442695, %v2610_v9  ;;  %v2021_v26 = vrot.slane %v1970_v22, 4 }
 0x2fd   : > { %v2685_v17 = vsel %vm2552_vm2, %v5362_v44, 0.0 }
 0x2fe   : > { %4008 = vpow2.f32 %v2643_v10 }
 0x2ff   : > { %2674 = vadd.xlane.f32.xlu1 %v2673_v59  ;;  %4010 = vpow2.f32 %v2637_v14 }
 0x300   : > { %4012 = vpow2.f32 %v2639_v58  ;;  %v2009_v58 = vrot.slane %v1966_v52, 4 }
 0x301   : > { %4014 = vpow2.f32 %v2635_v40 }
 0x303   : > { %2686 = vadd.xlane.f32.xlu0 %v2685_v17 }
 0x304   : > { %v5367_v4 = vpop.eup %4008 }
 0x305   : > { %v2688_v21 = vsel %vm2552_vm2, %v5367_v4, 0.0  ;;  %v5372_v31 = vpop.eup %4010 }
 0x306   : > { %2689 = vadd.xlane.f32.xlu2 %v2688_v21  ;;  %v5375_v35 = vpop.eup %4012  ;;  %v2679_v36 = vsel %vm2552_vm2, %v5372_v31, 0.0 }
 0x307   : > { %v2682_v57 = vsel %vm2552_vm2, %v5375_v35, 0.0  ;;  %v5389_v41 = vpop.eup %4014 }
 0x308   : > { %v2676_v50 = vsel %vm2552_vm2, %v5389_v41, 0.0 }
 0x30b   : > { %2680 = vadd.xlane.f32.xlu0 %v2679_v36 }
 0x30e   : > { %2683 = vadd.xlane.f32.xlu2 %v2682_v57 }
 0x311   : > { %v3948_v24 = vpop.permute.xlu1 %3947 }
 0x312   : > { %v3950_v8 = vunpack.i.h.bf16 %v3948_v24  ;;  %v3949_v56 = vunpack.i.l.bf16 %v3948_v24 }
 0x313   : > { %2677 = vadd.xlane.f32.xlu0 %v2676_v50 }
 0x314   : > { %v1947_v18 = vrot.slane %v3950_v8, 4  ;;  %v1950_v1 = vsel %vm847_vm0, %v3950_v8, %v1949_v43  ;;  %v1971_v13 = vrot.slane %v3949_v56, 4  ;;  %v1974_v7 = vsel %vm847_vm0, %v3949_v56, %v1973_v34 }
 0x315   : > { %v1958_v25 = vperm.slane %v1950_v1, %v4549_v63  ;;  %v1982_v42 = vperm.slane %v1974_v7, %v4549_v63 }
 0x316   : > { %v1948_v49 = vsel %vm847_vm0, %v1947_v18, %v3930_v53  ;;  %v1972_v37 = vsel %vm847_vm0, %v1971_v13, %v3929_v32 }
 0x317   : > { %v1954_v10 = vperm.slane %v1948_v49, %v4549_v63  ;;  %v1995_v14 = vrot.slane %v1958_v25, 4  ;;  %v1998_v38 = vsel %vm847_vm0, %v1958_v25, %v1997_v47  ;;  %v1978_v59 = vperm.slane %v1972_v37, %v4549_v63 }
 0x318   : > { %v2006_v9 = vperm.slane %v1998_v38, %v4573_v29  ;;  %v2019_v17 = vrot.slane %v1982_v42, 4  ;;  %v2022_v40 = vsel %vm847_vm0, %v1982_v42, %v2021_v26 }
 0x319   : > { %v1983_v21 = vrot.slane %v1954_v10, 4  ;;  %v1986_v20 = vsel %vm847_vm0, %v1954_v10, %v1985_v48  ;;  %v1996_v0 = vsel %vm847_vm0, %v1995_v14, %v1946_v15  ;;  %v2007_v39 = vrot.slane %v1978_v59, 4 }
 0x31a   : > { %v1994_v16 = vperm.slane %v1986_v20, %v4573_v29  ;;  %v2002_v33 = vperm.slane %v1996_v0, %v4573_v29  ;;  %v2045_v36 = vrot.slane %v2006_v9, 4  ;;  %v2010_v54 = vsel %vm847_vm0, %v1978_v59, %v2009_v58 }
 0x31b   : > { %v1984_v53 = vsel %vm847_vm0, %v1983_v21, %v1942_v27  ;;  %v2008_v57 = vsel %vm847_vm0, %v2007_v39, %v1966_v52  ;;  %v2018_v60 = vperm.slane %v2010_v54, %v4573_v29  ;;  %v2020_v28 = vsel %vm847_vm0, %v2019_v17, %v1970_v22  ;;  %v5425_v22 = vpop.permute.xlu0 %3942 }
 0x31c   : > { %v1990_v51 = vperm.slane %v1984_v53, %v4573_v29  ;;  %v2037_v32 = vrot.slane %v1994_v16, 4  ;;  %v2041_v45 = vrot.slane %v2002_v33, 4  ;;  %v2014_v15 = vperm.slane %v2008_v57, %v4573_v29 }
 0x31d   : > { %v2026_v43 = vperm.slane %v2020_v28, %v4573_v29  ;;  %v2030_v24 = vperm.slane %v2022_v40, %v4573_v29  ;;  %v2035_v34 = vrot.slane %v2018_v60, 4 }
 0x31e   : > { %v2033_v8 = vrot.slane %v1990_v51, 4  ;;  %v2031_v56 = vrot.slane %v2014_v15, 4  ;;  %v2038_v27 = vsel %vm847_vm0, %v2018_v60, %v2037_v32 }
 0x31f   : > { %v2036_v50 = vsel %vm847_vm0, %v2035_v34, %v1994_v16  ;;  %v2039_v52 = vrot.slane %v2026_v43, 4  ;;  %v2043_v18 = vrot.slane %v2030_v24, 4  ;;  %v2042_v1 = vsel %vm847_vm0, %v2026_v43, %v2041_v45 }
 0x320   : > { %v2046_v13 = vsel %vm847_vm0, %v2030_v24, %v2045_v36  ;;  %v2171_v7 = vrot.slane %v2038_v27, 4  ;;  %v2032_v47 = vsel %vm847_vm0, %v2031_v56, %v1990_v51  ;;  %v2034_v48 = vsel %vm847_vm0, %v2014_v15, %v2033_v8 }
 0x321   : > { %v2044_v25 = vsel %vm847_vm0, %v2043_v18, %v2006_v9  ;;  %v2195_v42 = vrot.slane %v2046_v13, 4  ;;  %v2040_v26 = vsel %vm847_vm0, %v2039_v52, %v2002_v33  ;;  %v2159_v37 = vrot.slane %v2036_v50, 4 }
 0x322   : > { %v2183_v49 = vrot.slane %v2044_v25, 4  ;;  %v2172_v10 = vsel %vm847_vm0, %v2171_v7, %v2034_v48  ;;  %v2197_v20 = vrot.slane %v2042_v1, 4  ;;  %v2185_v39 = vrot.slane %v2040_v26, 4 }
 0x323   : > { %v2178_v14 = vperm.slane %v2172_v10, %v4549_v63  ;;  %v2196_v38 = vsel %vm847_vm0, %v2195_v42, %v2042_v1  ;;  %v2160_v59 = vsel %vm847_vm0, %v2159_v37, %v2032_v47  ;;  %v2161_v53 = vrot.slane %v2032_v47, 4 }
 0x324   : > { %v2184_v58 = vsel %vm847_vm0, %v2183_v49, %v2040_v26  ;;  %v2202_v17 = vperm.slane %v2196_v38, %v4549_v63  ;;  %v2166_v9 = vperm.slane %v2160_v59, %v4549_v63  ;;  %v2173_v57 = vrot.slane %v2034_v48, 4 }
 0x325   : > { %v2190_v40 = vperm.slane %v2184_v58, %v4549_v63  ;;  %v2207_v21 = vrot.slane %v2178_v14, 4  ;;  %v2198_v8 = vsel %vm847_vm0, %v2046_v13, %v2197_v20  ;;  %v2186_v18 = vsel %vm847_vm0, %v2044_v25, %v2185_v39 }
 0x326   : > { %v2231_v0 = vrot.slane %v2202_v17, 4  ;;  %v2209_v33 = vrot.slane %v2166_v9, 4  ;;  %v3945_v1 = vunpack.i.h.bf16 %v5425_v22  ;;  %v2174_v48 = vsel %vm847_vm0, %v2038_v27, %v2173_v57 }
 0x327   : > { %v2208_v16 = vsel %vm847_vm0, %v2207_v21, %v2166_v9  ;;  %v2233_v36 = vrot.slane %v2190_v40, 4  ;;  %v2206_v26 = vperm.slane %v2198_v8, %v4549_v63  ;;  %v2162_v25 = vsel %vm847_vm0, %v2036_v50, %v2161_v53  ;;  %v3938_v21 = vpop.permute.xlu2 %3937 }
 0x328   : > { %v2600_v54 = vpop.xlane.xlu0 %2599  ;;  %v2214_v60 = vperm.slane %v2208_v16, %v4573_v29  ;;  %v2232_v28 = vsel %vm847_vm0, %v2231_v0, %v2190_v40  ;;  %v2210_v45 = vsel %vm847_vm0, %v2178_v14, %v2209_v33  ;;  %v2194_v37 = vperm.slane %v2186_v18, %v4549_v63 }
 0x329   : > { %v2616_v51 = vsub.f32 %v5302_v61, %v2600_v54  ;;  %v2238_v32 = vperm.slane %v2232_v28, %v4573_v29  ;;  %v2234_v15 = vsel %vm847_vm0, %v2202_v17, %v2233_v36  ;;  %v2218_v43 = vperm.slane %v2210_v45, %v4573_v29 }
 0x32a   : > { %v2242_v24 = vperm.slane %v2234_v15, %v4573_v29  ;;  %v2257_v34 = vrot.slane %v2214_v60, 4  ;;  %v3944_v10 = vunpack.i.l.bf16 %v5425_v22  ;;  %v2182_v14 = vperm.slane %v2174_v48, %v4549_v63 }
 0x32b   : > { %v2647_v56 = vmul.f32 1.442695, %v2616_v51  ;;  %v2255_v52 = vrot.slane %v2238_v32, 4  ;;  %v2261_v47 = vrot.slane %v2218_v43, 4  ;;  %v2170_v38 = vperm.slane %v2162_v25, %v4549_v63 }
 0x32c   : > { %v2259_v61 = vrot.slane %v2242_v24, 4  ;;  %v2258_v7 = vsel %vm847_vm0, %v2238_v32, %v2257_v34  ;;  %v2243_v27 = vrot.slane %v2206_v26, 4  ;;  %v1823_v59 = vrot.slane %v3945_v1, 4 }
 0x32d   : > { %4016 = vpow2.f32 %v2647_v56  ;;  %v2256_v42 = vsel %vm847_vm0, %v2255_v52, %v2214_v60  ;;  %2778 = vmatpush.msrb.mxu1 %v2258_v7  ;;  %v2262_v49 = vsel %vm847_vm0, %v2242_v24, %v2261_v47  ;;  %v2245_v58 = vrot.slane %v2194_v37, 4 }
 0x32e   : > { %2749 = vmatpush.msrb.mxu0 %v2256_v42  ;;  %v2260_v13 = vsel %vm847_vm0, %v2259_v61, %v2218_v43  ;;  %2836 = vmatpush.msrb.mxu3 %v2262_v49  ;;  %v1825_v9 = vrot.slane %v4605_v11, 4  ;;  %v1849_v40 = vrot.slane %v4607_v12, 4  ;;  %v1847_v50 = vrot.slane %v3944_v10, 4 }
 0x32f   : > { %2807 = vmatpush.msrb.mxu2 %v2260_v13  ;;  %v2219_v0 = vrot.slane %v2182_v14, 4  ;;  %v2244_v39 = vsel %vm847_vm0, %v2243_v27, %v2194_v37  ;;  %v2221_v16 = vrot.slane %v2170_v38, 4  ;;  %v1824_v33 = vsel %vm847_vm0, %v1823_v59, %v4605_v11 }
 0x330   : > { %v1826_v22 = vsel %vm847_vm0, %v3945_v1, %v1825_v9  ;;  %v1850_v36 = vsel %vm847_vm0, %v3944_v10, %v1849_v40  ;;  %v2246_v54 = vsel %vm847_vm0, %v2206_v26, %v2245_v58  ;;  %v3940_v53 = vunpack.i.h.bf16 %v3938_v21 }
 0x331   : > { %v3939_v57 = vunpack.i.l.bf16 %v3938_v21  ;;  %v1834_v60 = vperm.slane %v1826_v22, %v4549_v63  ;;  %v1848_v28 = vsel %vm847_vm0, %v1847_v50, %v4607_v12  ;;  %v2220_v51 = vsel %vm847_vm0, %v2219_v0, %v2170_v38 }
 0x332   : > { %v5481_v32 = vperm.slane %v2244_v39, %v4573_v29  ;;  %v1830_v45 = vperm.slane %v1824_v33, %v4549_v63  ;;  %v1858_v11 = vperm.slane %v1850_v36, %v4549_v63  ;;  %v2222_v15 = vsel %vm847_vm0, %v2182_v14, %v2221_v16 }
 0x333   : > { %v5464_v17 = vpop.eup %4016  ;;  %v5487_v43 = vperm.slane %v2246_v54, %v4573_v29  ;;  %v1854_v24 = vperm.slane %v1848_v28, %v4549_v63  ;;  %v1837_v34 = vrot.slane %v3940_v53, 4  ;;  %v1861_v8 = vrot.slane %v3939_v57, 4 }
 0x334   : > { %v2694_v20 = vsel %vm2552_vm2, %v5464_v17, 0.0  ;;  %v5491_v12 = vperm.slane %v2220_v51, %v4573_v29  ;;  %v2263_v1 = vrot.slane %v5481_v32, 4  ;;  %v5495_v61 = vperm.slane %v2222_v15, %v4573_v29 }
 0x335   : > { %2695 = vadd.xlane.f32.xlu1 %v2694_v20  ;;  %v1873_v7 = vrot.slane %v1830_v45, 4  ;;  %v1885_v47 = vrot.slane %v1834_v60, 4  ;;  %v1909_v42 = vrot.slane %v1858_v11, 4  ;;  %v2267_v48 = vrot.slane %v5487_v43, 4 }
 0x336   : > { %v1897_v37 = vrot.slane %v1854_v24, 4  ;;  %v2265_v38 = vrot.slane %v5491_v12, 4  ;;  %v5507_v58 = vsel %vm847_vm0, %v2263_v1, %v5491_v12  ;;  %v2269_v9 = vrot.slane %v5495_v61, 4 }
 0x337   : > { %v5517_v16 = vsel %vm847_vm0, %v2267_v48, %v5495_v61 }
 0x33b   : > { %v3953_v56 = vpop.permute.xlu0 %3952 }
 0x33c   : > { %v3955_v52 = vunpack.i.h.bf16 %v3953_v56  ;;  %v3954_v18 = vunpack.i.l.bf16 %v3953_v56 }
 0x33e   : > { %v1835_v26 = vrot.slane %v3955_v52, 4  ;;  %v1838_v13 = vsel %vm847_vm0, %v3955_v52, %v1837_v34  ;;  %v1859_v49 = vrot.slane %v3954_v18, 4  ;;  %v1862_v25 = vsel %vm847_vm0, %v3954_v18, %v1861_v8 }
 0x33f   : > { %v1846_v10 = vperm.slane %v1838_v13, %v4549_v63  ;;  %v1870_v14 = vperm.slane %v1862_v25, %v4549_v63 }
 0x340   : > { %v1836_v27 = vsel %vm847_vm0, %v1835_v26, %v3940_v53  ;;  %v1860_v59 = vsel %vm847_vm0, %v1859_v49, %v3939_v57 }
 0x341   : > { %v1842_v40 = vperm.slane %v1836_v27, %v4549_v63  ;;  %v1883_v50 = vrot.slane %v1846_v10, 4  ;;  %v1866_v21 = vperm.slane %v1860_v59, %v4549_v63  ;;  %v1886_v20 = vsel %vm847_vm0, %v1846_v10, %v1885_v47 }
 0x342   : > { %v1894_v0 = vperm.slane %v1886_v20, %v4573_v29  ;;  %v1907_v22 = vrot.slane %v1870_v14, 4  ;;  %v1910_v39 = vsel %vm847_vm0, %v1870_v14, %v1909_v42 }
 0x343   : > { %v1871_v33 = vrot.slane %v1842_v40, 4  ;;  %v1874_v36 = vsel %vm847_vm0, %v1842_v40, %v1873_v7  ;;  %v1884_v54 = vsel %vm847_vm0, %v1883_v50, %v1834_v60  ;;  %v1895_v53 = vrot.slane %v1866_v21, 4 }
 0x344   : > { %v1882_v57 = vperm.slane %v1874_v36, %v4573_v29  ;;  %v1890_v28 = vperm.slane %v1884_v54, %v4573_v29  ;;  %v1898_v51 = vsel %vm847_vm0, %v1866_v21, %v1897_v37  ;;  %v1908_v15 = vsel %vm847_vm0, %v1907_v22, %v1858_v11 }
 0x345   : > { %v1872_v34 = vsel %vm847_vm0, %v1871_v33, %v1830_v45  ;;  %v1896_v8 = vsel %vm847_vm0, %v1895_v53, %v1854_v24  ;;  %v1906_v56 = vperm.slane %v1898_v51, %v4573_v29  ;;  %v1914_v52 = vperm.slane %v1908_v15, %v4573_v29 }
 0x346   : > { %v1878_v18 = vperm.slane %v1872_v34, %v4573_v29  ;;  %v1902_v60 = vperm.slane %v1896_v8, %v4573_v29  ;;  %v1918_v1 = vperm.slane %v1910_v39, %v4573_v29  ;;  %v1925_v7 = vrot.slane %v1882_v57, 4 }
 0x347   : > { %v1923_v47 = vrot.slane %v1906_v56, 4  ;;  %v1927_v42 = vrot.slane %v1914_v52, 4  ;;  %v1929_v48 = vrot.slane %v1890_v28, 4  ;;  %v1933_v26 = vrot.slane %v1894_v0, 4 }
 0x348   : > { %v1919_v11 = vrot.slane %v1902_v60, 4  ;;  %v1921_v13 = vrot.slane %v1878_v18, 4  ;;  %v1926_v45 = vsel %vm847_vm0, %v1906_v56, %v1925_v7  ;;  %v1931_v24 = vrot.slane %v1918_v1, 4 }
 0x349   : > { %v1934_v49 = vsel %vm847_vm0, %v1918_v1, %v1933_v26  ;;  %v1924_v25 = vsel %vm847_vm0, %v1923_v47, %v1882_v57  ;;  %v1928_v37 = vsel %vm847_vm0, %v1927_v42, %v1890_v28  ;;  %v1930_v10 = vsel %vm847_vm0, %v1914_v52, %v1929_v48 }
 0x34a   : > { %v1932_v14 = vsel %vm847_vm0, %v1931_v24, %v1894_v0  ;;  %v2083_v27 = vrot.slane %v1934_v49, 4  ;;  %v1920_v59 = vsel %vm847_vm0, %v1919_v11, %v1878_v18  ;;  %v1922_v40 = vsel %vm847_vm0, %v1902_v60, %v1921_v13 }
 0x34b   : > { %v2071_v50 = vrot.slane %v1932_v14, 4  ;;  %v2047_v21 = vrot.slane %v1924_v25, 4  ;;  %v2049_v20 = vrot.slane %v1920_v59, 4  ;;  %v2059_v22 = vrot.slane %v1926_v45, 4 }
 0x34c   : > { %v2061_v39 = vrot.slane %v1922_v40, 4  ;;  %v2073_v33 = vrot.slane %v1928_v37, 4  ;;  %v2084_v36 = vsel %vm847_vm0, %v2083_v27, %v1930_v10  ;;  %v2085_v54 = vrot.slane %v1930_v10, 4 }
 0x34d   : > { %v2048_v53 = vsel %vm847_vm0, %v2047_v21, %v1920_v59  ;;  %v2060_v57 = vsel %vm847_vm0, %v2059_v22, %v1922_v40  ;;  %v2072_v0 = vsel %vm847_vm0, %v2071_v50, %v1928_v37  ;;  %v2090_v28 = vperm.slane %v2084_v36, %v4549_v63 }
 0x34e   : > { %v2054_v51 = vperm.slane %v2048_v53, %v4549_v63  ;;  %v2066_v15 = vperm.slane %v2060_v57, %v4549_v63  ;;  %v2078_v34 = vperm.slane %v2072_v0, %v4549_v63  ;;  %v2050_v8 = vsel %vm847_vm0, %v1924_v25, %v2049_v20 }
 0x34f   : > { %v2119_v56 = vrot.slane %v2090_v28, 4  ;;  %v2058_v52 = vperm.slane %v2050_v8, %v4549_v63  ;;  %v2062_v18 = vsel %vm847_vm0, %v1926_v45, %v2061_v39  ;;  %v2074_v60 = vsel %vm847_vm0, %v1932_v14, %v2073_v33 }
 0x350   : > { %v2669_v1 = vpop.xlane.xlu1 %2668  ;;  %v2095_v7 = vrot.slane %v2066_v15, 4  ;;  %v2097_v47 = vrot.slane %v2054_v51, 4  ;;  %v2121_v42 = vrot.slane %v2078_v34, 4  ;;  %v2070_v48 = vperm.slane %v2062_v18, %v4549_v63 }
 0x351   : > { %4018 = vrcp.f32 %v2669_v1  ;;  %v2120_v26 = vsel %vm847_vm0, %v2119_v56, %v2078_v34  ;;  %v2082_v11 = vperm.slane %v2074_v60, %v4549_v63  ;;  %v2086_v13 = vsel %vm847_vm0, %v1934_v49, %v2085_v54 }
 0x352   : > { %v2096_v24 = vsel %vm847_vm0, %v2095_v7, %v2054_v51  ;;  %v2126_v25 = vperm.slane %v2120_v26, %v4573_v29  ;;  %v2098_v45 = vsel %vm847_vm0, %v2066_v15, %v2097_v47  ;;  %v2122_v37 = vsel %vm847_vm0, %v2090_v28, %v2121_v42  ;;  %v2657_v10 = vpop.xlane.xlu2 %2656 }
 0x353   : > { %v2102_v14 = vperm.slane %v2096_v24, %v4573_v29  ;;  %v2106_v27 = vperm.slane %v2098_v45, %v4573_v29  ;;  %v2130_v59 = vperm.slane %v2122_v37, %v4573_v29  ;;  %v2094_v40 = vperm.slane %v2086_v13, %v4549_v63 }
 0x354   : > { %4020 = vrcp.f32 %v2657_v10  ;;  %v2143_v50 = vrot.slane %v2126_v25, 4  ;;  %v2107_v49 = vrot.slane %v2070_v48, 4  ;;  %v2109_v21 = vrot.slane %v2058_v52, 4 }
 0x355   : > { %v2147_v20 = vrot.slane %v2130_v59, 4  ;;  %v2145_v22 = vrot.slane %v2102_v14, 4  ;;  %v2149_v39 = vrot.slane %v2106_v27, 4  ;;  %v2131_v33 = vrot.slane %v2094_v40, 4 }
 0x356   : > { %v2144_v36 = vsel %vm847_vm0, %v2143_v50, %v2102_v14  ;;  %v2108_v54 = vsel %vm847_vm0, %v2107_v49, %v2058_v52  ;;  %v2110_v53 = vsel %vm847_vm0, %v2070_v48, %v2109_v21  ;;  %v2133_v57 = vrot.slane %v2082_v11, 4 }
 0x357   : > { %v4019_v0 = vpop.eup %4018  ;;  %2750 = vmatpush.msrb.mxu0 %v2144_v36  ;;  %v2148_v28 = vsel %vm847_vm0, %v2147_v20, %v2106_v27  ;;  %v2146_v51 = vsel %vm847_vm0, %v2126_v25, %v2145_v22  ;;  %v2150_v15 = vsel %vm847_vm0, %v2130_v59, %v2149_v39  ;;  %v2114_v34 = vperm.slane %v2108_v54, %v4573_v29 }
 0x358   : > { %v2719_v8 = vmul.f32 %v4019_v0, %v5311_v2  ;;  %2808 = vmatpush.msrb.mxu2 %v2148_v28  ;;  %v2132_v56 = vsel %vm847_vm0, %v2131_v33, %v2082_v11  ;;  %v2118_v52 = vperm.slane %v2110_v53, %v4573_v29  ;;  %2779 = vmatpush.msrb.mxu1 %v2146_v51 }
 0x359   : > { %2865 = vmatpush.msra.mxu0 %v5507_v58  ;;  %v2138_v18 = vperm.slane %v2132_v56, %v4573_v29  ;;  %v2266_v60 = vsel %vm847_vm0, %v5481_v32, %v2265_v38  ;;  %v2134_v1 = vsel %vm847_vm0, %v2094_v40, %v2133_v57  ;;  %v2153_v2 = vrot.slane %v2114_v34, 4  ;;  %2837 = vmatpush.msrb.mxu3 %v2150_v15 }
 0x35a   : > { %2923 = vmatpush.msra.mxu2 %v5517_v16  ;;  %v4021_v7 = vpop.eup %4020  ;;  %2894 = vmatpush.msra.mxu1 %v2266_v60  ;;  %v2142_v58 = vperm.slane %v2134_v1, %v4573_v29  ;;  %v2270_v16 = vsel %vm847_vm0, %v5487_v43, %v2269_v9  ;;  %v2157_v47 = vrot.slane %v2118_v52, 4  ;;  %v2663_v38 = vpop.xlane.xlu2 %2662 }
 0x35b   : > { %v2715_v42 = vmul.f32 %v4021_v7, %v5315_v46  ;;  %v2151_v12 = vrot.slane %v2138_v18, 4  ;;  %2952 = vmatpush.msra.mxu3 %v2270_v16  ;;  %v2154_v32 = vsel %vm847_vm0, %v2138_v18, %v2153_v2  ;;  %4022 = vrcp.f32 %v2663_v38 }
 0x35c   : > { %v2155_v48 = vrot.slane %v2142_v58, 4  ;;  %2895 = vmatpush.msra.mxu1 %v2154_v32  ;;  %v2158_v26 = vsel %vm847_vm0, %v2142_v58, %v2157_v47  ;;  %3818 = vmatmul.msk.f32.vlgmr.msrb.gmra.mxu3 %vm2552_vm2, %v2719_v8 }
 0x35d   : > { %v2152_v61 = vsel %vm847_vm0, %v2151_v12, %v2114_v34  ;;  %2953 = vmatpush.msra.mxu3 %v2158_v26  ;;  %3814 = vmatmul.msk.f32.vlgmr.msrb.gmra.mxu1 %vm2552_vm2, %v2715_v42 }
 0x35e   : > { %2866 = vmatpush.msra.mxu0 %v2152_v61  ;;  %v2156_v46 = vsel %vm847_vm0, %v2155_v48, %v2118_v52 }
 0x35f   : > { %2924 = vmatpush.msra.mxu2 %v2156_v46 }
 0x361   : > { %v4023_v43 = vpop.eup %4022 }
 0x362   : > { %v2666_v9 = vpop.xlane.xlu1 %2665  ;;  %v2717_v11 = vmul.f32 %v4023_v43, %v5322_v23  ;;  %v2654_v24 = vpop.xlane.xlu2 %2653 }
 0x363   : > { %4024 = vrcp.f32 %v2666_v9 }
 0x364   : > { %3816 = vmatmul.msk.f32.vlgmr.msrb.gmra.mxu2 %vm2552_vm2, %v2717_v11 }
 0x366   : > { %v2651_v13 = vpop.xlane.xlu0 %2650 }
 0x367   : > { %4026 = vrcp.f32 %v2651_v13 }
 0x369   : > { %v4025_v25 = vpop.eup %4024 }
 0x36a   : > { %v2660_v45 = vpop.xlane.xlu1 %2659  ;;  %v2718_v37 = vmul.f32 %v4025_v25, %v5331_v5  ;;  %v2693_v59 = vpop.xlane.xlu2 %2692 }
 0x36b   : > { %4028 = vrcp.f32 %v2660_v45 }
 0x36c   : > { %4030 = vrcp.f32 %v2654_v24  ;;  %3817 = vmatmul.msk.f32.gmra.mxu2 %vm2552_vm2, %v2718_v37 }
 0x36d   : > { %v4027_v10 = vpop.eup %4026 }
 0x36e   : > { %v2713_v14 = vmul.f32 %v4027_v10, %v5336_v19  ;;  %v2672_v27 = vpop.xlane.xlu0 %2671 }
 0x36f   : > { %4032 = vrcp.f32 %v2672_v27 }
 0x370   : > { %3812 = vmatmul.msk.f32.vlgmr.msrb.gmra.mxu0 %vm2552_vm2, %v2713_v14 }
 0x371   : > { %v4029_v23 = vpop.eup %4028 }
 0x372   : > { %v2675_v40 = vpop.xlane.xlu1 %2674  ;;  %v2716_v50 = vmul.f32 %v4029_v23, %v5343_v6  ;;  %v4031_v49 = vpop.eup %4030 }
 0x373   : > { %4034 = vrcp.f32 %v2675_v40  ;;  %v2714_v20 = vmul.f32 %v4031_v49, %v5329_v30 }
 0x374   : > { %3815 = vmatmul.msk.f32.gmra.mxu1 %vm2552_vm2, %v2716_v50  ;;  %4036 = vrcp.f32 %v2693_v59 }
 0x375   : > { %v4033_v5 = vpop.eup %4032 }
 0x376   : > { %v2687_v21 = vpop.xlane.xlu0 %2686  ;;  %v2720_v19 = vmul.f32 %v4033_v5, %v5351_v62 }
 0x377   : > { %4038 = vrcp.f32 %v2687_v21 }
 0x378   : > { %3813 = vmatmul.msk.f32.gmra.mxu0 %vm2552_vm2, %v2714_v20  ;;  %3819 = vmatmul.msk.f32.gmra.mxu3 %vm2552_vm2, %v2720_v19 }
 0x379   : > { %v2690_v22 = vpop.xlane.xlu2 %2689  ;;  %v4035_v39 = vpop.eup %4034 }
 0x37a   : > { %v4037_v33 = vpop.eup %4036  ;;  %4040 = vrcp.f32 %v2690_v22  ;;  %v2721_v36 = vmul.f32 %v4035_v39, %v5357_v55 }
 0x37b   : > { %v2727_v57 = vmul.f32 %v4037_v33, %v5345_v3 }
 0x37d   : > { %v4039_v6 = vpop.eup %4038 }
 0x37e   : > { %v2725_v54 = vmul.f32 %v4039_v6, %v5362_v44  ;;  %v2681_v53 = vpop.xlane.xlu0 %2680 }
 0x37f   : > { %4042 = vrcp.f32 %v2681_v53 }
 0x380   : > { %3820 = vmatmul.msk.f32.vlgmr.msra.gmra.mxu0 %vm2552_vm2, %v2721_v36  ;;  %3824 = vmatmul.msk.f32.vlgmr.msra.gmra.mxu2 %vm2552_vm2, %v2725_v54  ;;  %v4041_v62 = vpop.eup %4040 }
 0x381   : > { %3826 = vmatmul.msk.f32.vlgmr.msra.gmra.mxu3 %vm2552_vm2, %v2727_v57  ;;  %v2684_v30 = vpop.xlane.xlu2 %2683  ;;  %v2726_v55 = vmul.f32 %v4041_v62, %v5367_v4 }
 0x382   : > { %4044 = vrcp.f32 %v2684_v30 }
 0x385   : > { %v4043_v0 = vpop.eup %4042 }
 0x386   : > { %v2723_v28 = vmul.f32 %v4043_v0, %v5372_v31  ;;  %v2678_v51 = vpop.xlane.xlu0 %2677 }
 0x387   : > { %4046 = vrcp.f32 %v2678_v51 }
 0x388   : > { %3822 = vmatmul.msk.f32.vlgmr.msra.gmra.mxu1 %vm2552_vm2, %v2723_v28  ;;  %3825 = vmatmul.msk.f32.gmra.mxu2 %vm2552_vm2, %v2726_v55  ;;  %v4045_v3 = vpop.eup %4044 }
 0x389   : > { %v2724_v34 = vmul.f32 %v4045_v3, %v5375_v35 }
 0x38d   : > { %v4047_v44 = vpop.eup %4046 }
 0x38e   : > { %v2722_v15 = vmul.f32 %v4047_v44, %v5389_v41 }
 0x390   : > { %3821 = vmatmul.msk.f32.gmra.mxu0 %vm2552_vm2, %v2722_v15  ;;  %3823 = vmatmul.msk.f32.gmra.mxu1 %vm2552_vm2, %v2724_v34 }
 0x3a8   : > { %v2696_v8 = vpop.xlane.xlu1 %2695 }
 0x3a9   : > { %4048 = vrcp.f32 %v2696_v8 }
 0x3af   : > { %v4049_v31 = vpop.eup %4048 }
 0x3b0   : > { %v2728_v4 = vmul.f32 %v4049_v31, %v5464_v17 }
 0x3b2   : > { %3827 = vmatmul.msk.f32.gmra.mxu3 %vm2552_vm2, %v2728_v4 }
 0x3da   : > { %v2781_v60 = vpop.f32.mrf.mxu1 }
 0x3db   : > { %v2975_v7 = vrot.slane %v2781_v60, 4 }
 0x3df   : > { %v2839_v18 = vpop.f32.mrf.mxu3 }
 0x3e0   : > { %v2973_v41 = vrot.slane %v2839_v18, 4  ;;  %v2976_v12 = vsel %vm847_vm0, %v2839_v18, %v2975_v7 }
 0x3e1   : > { %v2984_v61 = vperm.slane %v2976_v12, %v4549_v63 }
 0x3e2   : > { %v2974_v16 = vsel %vm847_vm0, %v2973_v41, %v2781_v60 }
 0x3e3   : > { %v2980_v48 = vperm.slane %v2974_v16, %v4549_v63  ;;  %v3021_v13 = vrot.slane %v2984_v61, 4 }
 0x3e5   : > { %v3009_v9 = vrot.slane %v2980_v48, 4 }
 0x3e7   : > { %v2810_v52 = vpop.f32.mrf.mxu2 }
 0x3e8   : > { %v2961_v35 = vrot.slane %v2810_v52, 4 }
 0x3ed   : > { %v2752_v56 = vpop.f32.mrf.mxu0 }
 0x3ee   : > { %v2963_v2 = vrot.slane %v2752_v56, 4  ;;  %v2962_v58 = vsel %vm847_vm0, %v2961_v35, %v2752_v56 }
 0x3ef   : > { %v5627_v42 = vpop.f32.mrf.mxu2  ;;  %v2968_v32 = vperm.slane %v2962_v58, %v4549_v63 }
 0x3f0   : > { %v2964_v47 = vsel %vm847_vm0, %v2810_v52, %v2963_v2 }
 0x3f1   : > { %v5633_v38 = vpop.f32.mrf.mxu1  ;;  %v2972_v26 = vperm.slane %v2964_v47, %v4549_v63  ;;  %v3011_v43 = vrot.slane %v2968_v32, 4  ;;  %v3010_v45 = vsel %vm847_vm0, %v3009_v9, %v2968_v32 }
 0x3f2   : > { %v3016_v20 = vperm.slane %v3010_v45, %v4573_v29 }
 0x3f3   : > { %v3023_v11 = vrot.slane %v2972_v26, 4  ;;  %v3012_v14 = vsel %vm847_vm0, %v2980_v48, %v3011_v43  ;;  %v3022_v27 = vsel %vm847_vm0, %v3021_v13, %v2972_v26 }
 0x3f4   : > { %v3020_v39 = vperm.slane %v3012_v14, %v4573_v29  ;;  %v3028_v33 = vperm.slane %v3022_v27, %v4573_v29  ;;  %v3059_v0 = vrot.slane %v3016_v20, 4 }
 0x3f5   : > { %v5622_v1 = vpop.f32.mrf.mxu0  ;;  %v3024_v50 = vsel %vm847_vm0, %v2984_v61, %v3023_v11 }
 0x3f6   : > { %v3032_v54 = vperm.slane %v3024_v50, %v4573_v29  ;;  %v3063_v3 = vrot.slane %v3020_v39, 4  ;;  %v3067_v8 = vrot.slane %v3028_v33, 4 }
 0x3f8   : > { %v3071_v31 = vrot.slane %v3032_v54, 4 }
 0x3fb   : > { %v5629_v17 = vpop.f32.mrf.mxu3 }
 0x3fd   : > { %v2868_v46 = vpop.f32.mrf.mxu0 }
 0x3fe   : > { %v2987_v24 = vrot.slane %v2868_v46, 4 }
 0x403   : > { %v2926_v25 = vpop.f32.mrf.mxu2 }
 0x404   : > { %v2985_v37 = vrot.slane %v2926_v25, 4  ;;  %v2955_v10 = vpop.f32.mrf.mxu3  ;;  %v2988_v23 = vsel %vm847_vm0, %v2926_v25, %v2987_v24 }
 0x405   : > { %v2997_v59 = vrot.slane %v2955_v10, 4  ;;  %v2897_v40 = vpop.f32.mrf.mxu1  ;;  %v2996_v5 = vperm.slane %v2988_v23, %v4549_v63 }
 0x406   : > { %v2986_v49 = vsel %vm847_vm0, %v2985_v37, %v2868_v46  ;;  %v2999_v21 = vrot.slane %v2897_v40, 4 }
 0x407   : > { %v2992_v19 = vperm.slane %v2986_v49, %v4549_v63  ;;  %v2998_v22 = vsel %vm847_vm0, %v2997_v59, %v2897_v40  ;;  %v3047_v57 = vrot.slane %v2996_v5, 4 }
 0x408   : > { %v3000_v6 = vsel %vm847_vm0, %v2955_v10, %v2999_v21  ;;  %v3004_v36 = vperm.slane %v2998_v22, %v4549_v63 }
 0x409   : > { %v3035_v53 = vrot.slane %v2992_v19, 4  ;;  %v3008_v30 = vperm.slane %v3000_v6, %v4549_v63 }
 0x40a   : > { %v3033_v62 = vrot.slane %v3004_v36, 4 }
 0x40b   : > { %v3036_v28 = vsel %vm847_vm0, %v3004_v36, %v3035_v53  ;;  %v3045_v51 = vrot.slane %v3008_v30, 4  ;;  %v3048_v55 = vsel %vm847_vm0, %v3008_v30, %v3047_v57 }
 0x40c   : > { %v3034_v44 = vsel %vm847_vm0, %v3033_v62, %v2992_v19  ;;  %v3044_v15 = vperm.slane %v3036_v28, %v4573_v29  ;;  %v3056_v34 = vperm.slane %v3048_v55, %v4573_v29 }
 0x40d   : > { %v3040_v4 = vperm.slane %v3034_v44, %v4573_v29  ;;  %v3046_v56 = vsel %vm847_vm0, %v3045_v51, %v2996_v5 }
 0x40e   : > { %v3052_v52 = vperm.slane %v3046_v56, %v4573_v29  ;;  %v3061_v18 = vrot.slane %v3044_v15, 4  ;;  %v3064_v60 = vsel %vm847_vm0, %v3044_v15, %v3063_v3  ;;  %v3069_v41 = vrot.slane %v3056_v34, 4 }
 0x40f   : > { %v3057_v2 = vrot.slane %v3040_v4, 4  ;;  %v3060_v35 = vsel %vm847_vm0, %v3040_v4, %v3059_v0  ;;  %v3072_v7 = vsel %vm847_vm0, %v3056_v34, %v3071_v31  ;;  %v3197_v58 = vrot.slane %v3064_v60, 4 }
 0x410   : > { %v3062_v16 = vsel %vm847_vm0, %v3061_v18, %v3020_v39  ;;  %v3065_v47 = vrot.slane %v3052_v52, 4  ;;  %v3068_v12 = vsel %vm847_vm0, %v3052_v52, %v3067_v8  ;;  %v3199_v32 = vrot.slane %v3060_v35, 4 }
 0x411   : > { %v3058_v48 = vsel %vm847_vm0, %v3057_v2, %v3016_v20  ;;  %v3185_v26 = vrot.slane %v3062_v16, 4  ;;  %v3198_v61 = vsel %vm847_vm0, %v3197_v58, %v3060_v35  ;;  %v3221_v11 = vrot.slane %v3072_v7, 4 }
 0x412   : > { %v3187_v46 = vrot.slane %v3058_v48, 4  ;;  %v3200_v43 = vsel %vm847_vm0, %v3064_v60, %v3199_v32  ;;  %v3204_v9 = vperm.slane %v3198_v61, %v4549_v63  ;;  %v3223_v13 = vrot.slane %v3068_v12, 4 }
 0x413   : > { %v3066_v25 = vsel %vm847_vm0, %v3065_v47, %v3028_v33  ;;  %v3070_v45 = vsel %vm847_vm0, %v3069_v41, %v3032_v54  ;;  %v3208_v37 = vperm.slane %v3200_v43, %v4549_v63  ;;  %v3186_v10 = vsel %vm847_vm0, %v3185_v26, %v3058_v48 }
 0x414   : > { %v3188_v24 = vsel %vm847_vm0, %v3062_v16, %v3187_v46  ;;  %v3209_v14 = vrot.slane %v3070_v45, 4  ;;  %v3192_v27 = vperm.slane %v3186_v10, %v4549_v63  ;;  %v3211_v59 = vrot.slane %v3066_v25, 4 }
 0x415   : > { %v3196_v23 = vperm.slane %v3188_v24, %v4549_v63  ;;  %v3222_v50 = vsel %vm847_vm0, %v3221_v11, %v3068_v12  ;;  %v3224_v49 = vsel %vm847_vm0, %v3072_v7, %v3223_v13  ;;  %v3233_v5 = vrot.slane %v3204_v9, 4 }
 0x416   : > { %v3210_v40 = vsel %vm847_vm0, %v3209_v14, %v3066_v25  ;;  %v3212_v21 = vsel %vm847_vm0, %v3070_v45, %v3211_v59  ;;  %v3228_v19 = vperm.slane %v3222_v50, %v4549_v63  ;;  %v3232_v39 = vperm.slane %v3224_v49, %v4549_v63  ;;  %v2929_v50 = vpop.f32.mrf.mxu2 }
 0x417   : > { %v3216_v20 = vperm.slane %v3210_v40, %v4549_v63  ;;  %v3220_v22 = vperm.slane %v3212_v21, %v4549_v63  ;;  %v3234_v33 = vsel %vm847_vm0, %v3233_v5, %v3192_v27  ;;  %v3245_v6 = vrot.slane %v3208_v37, 4 }
 0x418   : > { %v3240_v36 = vperm.slane %v3234_v33, %v4573_v29  ;;  %v3257_v54 = vrot.slane %v3228_v19, 4  ;;  %v3235_v53 = vrot.slane %v3192_v27, 4  ;;  %v3247_v57 = vrot.slane %v3196_v23, 4  ;;  %v2871_v27 = vpop.f32.mrf.mxu0 }
 0x419   : > { %v3246_v30 = vsel %vm847_vm0, %v3245_v6, %v3196_v23  ;;  %v3269_v62 = vrot.slane %v3232_v39, 4  ;;  %v3259_v0 = vrot.slane %v3216_v20, 4  ;;  %v3271_v28 = vrot.slane %v3220_v22, 4  ;;  %v2900_v6 = vpop.f32.mrf.mxu1 }
 0x41a   : > { %v3252_v51 = vperm.slane %v3246_v30, %v4573_v29  ;;  %v3258_v55 = vsel %vm847_vm0, %v3257_v54, %v3216_v20  ;;  %v3283_v3 = vrot.slane %v3240_v36, 4  ;;  %v3236_v44 = vsel %vm847_vm0, %v3204_v9, %v3235_v53 }
 0x41b   : > { %v3264_v15 = vperm.slane %v3258_v55, %v4573_v29  ;;  %v3270_v34 = vsel %vm847_vm0, %v3269_v62, %v3220_v22  ;;  %v3244_v8 = vperm.slane %v3236_v44, %v4573_v29  ;;  %v3248_v31 = vsel %vm847_vm0, %v3208_v37, %v3247_v57  ;;  %v3509_v62 = vld [vmem:[#allocation10 + $0xf0] sm:$0xff]  ;;  %v3542_v44 = vld [vmem:[#allocation10 + $0x1f8] sm:$0xff] }
 0x41c   : > { %v3276_v4 = vperm.slane %v3270_v34, %v4573_v29  ;;  %v3291_v56 = vrot.slane %v3252_v51, 4  ;;  %v3256_v52 = vperm.slane %v3248_v31, %v4573_v29  ;;  %v3260_v18 = vsel %vm847_vm0, %v3228_v19, %v3259_v0  ;;  %v3541_v0 = vld [vmem:[#allocation10 + $0x1f0] sm:$0xff]  ;;  %3549 = vmatpush.msrb.mxu0 %v3509_v62  ;;  %3618 = vmatpush.msrb.mxu3 %v3542_v44 }
 0x41d   : > { %v3281_v60 = vrot.slane %v3264_v15, 4  ;;  %v3284_v41 = vsel %vm847_vm0, %v3264_v15, %v3283_v3  ;;  %v3268_v2 = vperm.slane %v3260_v18, %v4573_v29  ;;  %v3272_v35 = vsel %vm847_vm0, %v3232_v39, %v3271_v28  ;;  %v3510_v28 = vld [vmem:[#allocation10 + $0xf8] sm:$0xff]  ;;  %3572 = vmatpush.msrb.mxu1 %v3541_v0 }
 0x41e   : > { %v3289_v7 = vrot.slane %v3276_v4, 4  ;;  %v3292_v58 = vsel %vm847_vm0, %v3276_v4, %v3291_v56  ;;  %v3280_v16 = vperm.slane %v3272_v35, %v4573_v29  ;;  %v3287_v47 = vrot.slane %v3244_v8, 4  ;;  %3595 = vmatpush.msrb.mxu2 %v3510_v28 }
 0x41f   : > { %v3956_v12 = vpack.i.bf16 %v3292_v58, %v3284_v41  ;;  %v3295_v32 = vrot.slane %v3256_v52, 4  ;;  %v3285_v48 = vrot.slane %v3268_v2, 4  ;;  %v5705_v26 = vsel %vm847_vm0, %v3281_v60, %v3240_v36 }
 0x420   : > { %v3288_v61 = vsel %vm847_vm0, %v3268_v2, %v3287_v47  ;;  %v3293_v46 = vrot.slane %v3280_v16, 4  ;;  %v5709_v43 = vsel %vm847_vm0, %v3289_v7, %v3252_v51  ;;  %v3075_v45 = vrot.slane %v5622_v1, 4 }
 0x421   : > { %3957 = vrot.lane.b32.xlu1 %v3956_v12, %s4255_s28  ;;  %v3296_v9 = vsel %vm847_vm0, %v3280_v16, %v3295_v32  ;;  %v3286_v13 = vsel %vm847_vm0, %v3285_v48, %v3244_v8  ;;  %v3087_v37 = vrot.slane %v5633_v38, 4  ;;  %v3085_v10 = vrot.slane %v5629_v17, 4 }
 0x422   : > { %v3966_v11 = vpack.i.bf16 %v3296_v9, %v3288_v61  ;;  %v3294_v24 = vsel %vm847_vm0, %v3293_v46, %v3256_v52  ;;  %v3073_v14 = vrot.slane %v5627_v42, 4  ;;  %v3076_v23 = vsel %vm847_vm0, %v5627_v42, %v3075_v45 }
 0x423   : > { %v3961_v25 = vpack.i.bf16 %v3294_v24, %v3286_v13  ;;  %v3088_v59 = vsel %vm847_vm0, %v5629_v17, %v3087_v37  ;;  %v3086_v49 = vsel %vm847_vm0, %v3085_v10, %v5633_v38  ;;  %v3099_v5 = vrot.slane %v2871_v27, 4 }
 0x424   : > { %3967 = vrot.lane.b32.xlu2 %v3966_v11, %s4254_s29  ;;  %v3074_v40 = vsel %vm847_vm0, %v3073_v14, %v5622_v1  ;;  %v3084_v21 = vperm.slane %v3076_v23, %v4549_v63  ;;  %v3096_v20 = vperm.slane %v3088_v59, %v4549_v63  ;;  %v3097_v22 = vrot.slane %v2929_v50, 4 }
 0x425   : > { %3962 = vrot.lane.b32.xlu0 %v3961_v25, %s4253_s24  ;;  %v3080_v19 = vperm.slane %v3074_v40, %v4549_v63  ;;  %v3092_v42 = vperm.slane %v3086_v49, %v4549_v63  ;;  %v3100_v39 = vsel %vm847_vm0, %v2929_v50, %v3099_v5  ;;  %v3111_v30 = vrot.slane %v2900_v6, 4 }
 0x426   : > { %v3135_v17 = vrot.slane %v3084_v21, 4  ;;  %v3133_v33 = vrot.slane %v3096_v20, 4  ;;  %v3098_v36 = vsel %vm847_vm0, %v3097_v22, %v2871_v27  ;;  %v3108_v53 = vperm.slane %v3100_v39, %v4549_v63 }
 0x427   : > { %v3123_v1 = vrot.slane %v3080_v19, 4  ;;  %v3121_v54 = vrot.slane %v3092_v42, 4  ;;  %v3104_v55 = vperm.slane %v3098_v36, %v4549_v63 }
 0x428   : > { %v3136_v38 = vsel %vm847_vm0, %v3096_v20, %v3135_v17  ;;  %v3134_v51 = vsel %vm847_vm0, %v3133_v33, %v3084_v21  ;;  %v3159_v56 = vrot.slane %v3108_v53, 4 }
 0x429   : > { %v3124_v57 = vsel %vm847_vm0, %v3092_v42, %v3123_v1  ;;  %v3144_v15 = vperm.slane %v3136_v38, %v4573_v29  ;;  %v3122_v31 = vsel %vm847_vm0, %v3121_v54, %v3080_v19  ;;  %v3140_v18 = vperm.slane %v3134_v51, %v4573_v29 }
 0x42a   : > { %v3132_v4 = vperm.slane %v3124_v57, %v4573_v29  ;;  %v3147_v41 = vrot.slane %v3104_v55, 4  ;;  %v3128_v58 = vperm.slane %v3122_v31, %v4573_v29 }
 0x42b   : > { %v3183_v16 = vrot.slane %v3144_v15, 4  ;;  %v3179_v24 = vrot.slane %v3140_v18, 4 }
 0x42c   : > { %v3175_v12 = vrot.slane %v3132_v4, 4  ;;  %v3171_v23 = vrot.slane %v3128_v58, 4 }
 0x435   : > { %v2958_v3 = vpop.f32.mrf.mxu3 }
 0x436   : > { %v3109_v34 = vrot.slane %v2958_v3, 4  ;;  %v3112_v8 = vsel %vm847_vm0, %v2958_v3, %v3111_v30 }
 0x437   : > { %v3120_v52 = vperm.slane %v3112_v8, %v4549_v63 }
 0x438   : > { %v3110_v60 = vsel %vm847_vm0, %v3109_v34, %v2900_v6 }
 0x439   : > { %v3116_v2 = vperm.slane %v3110_v60, %v4549_v63  ;;  %v3157_v35 = vrot.slane %v3120_v52, 4  ;;  %v3160_v7 = vsel %vm847_vm0, %v3120_v52, %v3159_v56 }
 0x43a   : > { %v3168_v47 = vperm.slane %v3160_v7, %v4573_v29 }
 0x43b   : > { %v3145_v32 = vrot.slane %v3116_v2, 4  ;;  %v3148_v48 = vsel %vm847_vm0, %v3116_v2, %v3147_v41  ;;  %v3158_v61 = vsel %vm847_vm0, %v3157_v35, %v3108_v53 }
 0x43c   : > { %v3156_v46 = vperm.slane %v3148_v48, %v4573_v29  ;;  %v3164_v9 = vperm.slane %v3158_v61, %v4573_v29  ;;  %v3181_v11 = vrot.slane %v3168_v47, 4  ;;  %v3184_v13 = vsel %vm847_vm0, %v3168_v47, %v3183_v16 }
 0x43d   : > { %v3146_v25 = vsel %vm847_vm0, %v3145_v32, %v3104_v55  ;;  %v3333_v45 = vrot.slane %v3184_v13, 4 }
 0x43e   : > { %v3152_v37 = vperm.slane %v3146_v25, %v4573_v29  ;;  %v3173_v10 = vrot.slane %v3156_v46, 4  ;;  %v3176_v14 = vsel %vm847_vm0, %v3156_v46, %v3175_v12  ;;  %v3177_v27 = vrot.slane %v3164_v9, 4 }
 0x43f   : > { %v3180_v59 = vsel %vm847_vm0, %v3164_v9, %v3179_v24  ;;  %v3182_v40 = vsel %vm847_vm0, %v3181_v11, %v3144_v15  ;;  %v3309_v50 = vrot.slane %v3176_v14, 4 }
 0x440   : > { %v3169_v49 = vrot.slane %v3152_v37, 4  ;;  %v3174_v5 = vsel %vm847_vm0, %v3173_v10, %v3132_v4  ;;  %v3178_v21 = vsel %vm847_vm0, %v3177_v27, %v3140_v18  ;;  %v3321_v20 = vrot.slane %v3182_v40, 4 }
 0x441   : > { %v3297_v19 = vrot.slane %v3174_v5, 4  ;;  %v3323_v22 = vrot.slane %v3178_v21, 4  ;;  %v3334_v42 = vsel %vm847_vm0, %v3333_v45, %v3180_v59  ;;  %v3335_v39 = vrot.slane %v3180_v59, 4 }
 0x442   : > { %v3322_v17 = vsel %vm847_vm0, %v3321_v20, %v3178_v21  ;;  %v3170_v33 = vsel %vm847_vm0, %v3169_v49, %v3128_v58  ;;  %v3172_v6 = vsel %vm847_vm0, %v3152_v37, %v3171_v23  ;;  %v3340_v1 = vperm.slane %v3334_v42, %v4549_v63 }
 0x443   : > { %v3324_v36 = vsel %vm847_vm0, %v3182_v40, %v3323_v22  ;;  %v3336_v54 = vsel %vm847_vm0, %v3184_v13, %v3335_v39  ;;  %v3298_v38 = vsel %vm847_vm0, %v3297_v19, %v3170_v33  ;;  %v3299_v53 = vrot.slane %v3170_v33, 4  ;;  %v3539_v33 = vld [vmem:[#allocation10 + $0x1e0] sm:$0xff] }
 0x444   : > { %v3332_v57 = vperm.slane %v3324_v36, %v4549_v63  ;;  %v3344_v30 = vperm.slane %v3336_v54, %v4549_v63  ;;  %v3304_v62 = vperm.slane %v3298_v38, %v4549_v63  ;;  %v3310_v0 = vsel %vm847_vm0, %v3309_v50, %v3172_v6  ;;  %3573 = vmatpush.msrb.mxu1 %v3539_v33  ;;  %v3505_v36 = vld [vmem:[#allocation10 + $0xd0] sm:$0xff]  ;;  %v3506_v38 = vld [vmem:[#allocation10 + $0xd8] sm:$0xff] }
 0x445   : > { %v3300_v28 = vsel %vm847_vm0, %v3174_v5, %v3299_v53  ;;  %v3311_v51 = vrot.slane %v3172_v6, 4  ;;  %v3316_v55 = vperm.slane %v3310_v0, %v4549_v63  ;;  %v3328_v3 = vperm.slane %v3322_v17, %v4549_v63  ;;  %v3507_v17 = vld [vmem:[#allocation10 + $0xe0] sm:$0xff]  ;;  %v3508_v6 = vld [vmem:[#allocation10 + $0xe8] sm:$0xff]  ;;  %v3537_v54 = vld [vmem:[#allocation10 + $0x1d0] sm:$0xff] }
 0x446   : > { %v3308_v44 = vperm.slane %v3300_v28, %v4549_v63  ;;  %v3347_v15 = vrot.slane %v3304_v62, 4  ;;  %v3383_v34 = vrot.slane %v3332_v57, 4  ;;  %v3369_v8 = vrot.slane %v3340_v1, 4  ;;  %3550 = vmatpush.msrb.mxu0 %v3507_v17  ;;  %3596 = vmatpush.msrb.mxu2 %v3508_v6  ;;  %v3538_v53 = vld [vmem:[#allocation10 + $0x1d8] sm:$0xff]  ;;  %v3536_v0 = vld [vmem:[#allocation10 + $0x1c8] sm:$0xff]  ;;  %v3501_v28 = vld [vmem:[#allocation10 + $0xb0] sm:$0xff] }
 0x447   : > { %v3312_v31 = vsel %vm847_vm0, %v3176_v14, %v3311_v51  ;;  %v3371_v4 = vrot.slane %v3328_v3, 4  ;;  %v3345_v56 = vrot.slane %v3316_v55, 4  ;;  %v3381_v52 = vrot.slane %v3344_v30, 4  ;;  %3574 = vmatpush.msrb.mxu1 %v3537_v54  ;;  %v3533_v51 = vld [vmem:[#allocation10 + $0x1b0] sm:$0xff] }
 0x448   : > { %v3320_v18 = vperm.slane %v3312_v31, %v4549_v63  ;;  %v3348_v60 = vsel %vm847_vm0, %v3316_v55, %v3347_v15  ;;  %v3359_v41 = vrot.slane %v3308_v44, 4  ;;  %v3384_v2 = vsel %vm847_vm0, %v3344_v30, %v3383_v34  ;;  %3551 = vmatpush.msrb.mxu0 %v3505_v36  ;;  %v3535_v30 = vld [vmem:[#allocation10 + $0x1c0] sm:$0xff]  ;;  %3597 = vmatpush.msrb.mxu2 %v3506_v38  ;;  %v3502_v55 = vld [vmem:[#allocation10 + $0xb8] sm:$0xff]  ;;  %v3500_v34 = vld [vmem:[#allocation10 + $0xa8] sm:$0xff] }
 0x449   : > { %v3356_v35 = vperm.slane %v3348_v60, %v4573_v29  ;;  %v3372_v7 = vsel %vm847_vm0, %v3340_v1, %v3371_v4  ;;  %v3392_v58 = vperm.slane %v3384_v2, %v4573_v29  ;;  %v3346_v16 = vsel %vm847_vm0, %v3345_v56, %v3304_v62  ;;  %v3540_v1 = vld [vmem:[#allocation10 + $0x1e8] sm:$0xff]  ;;  %3575 = vmatpush.msrb.mxu1 %v3535_v30  ;;  %v3531_v15 = vld [vmem:[#allocation10 + $0x1a0] sm:$0xff]  ;;  %v3497_v31 = vld [vmem:[#allocation10 + $0x90] sm:$0xff] }
 0x44a   : > { %v3360_v47 = vsel %vm847_vm0, %v3320_v18, %v3359_v41  ;;  %v3380_v12 = vperm.slane %v3372_v7, %v4573_v29  ;;  %v3352_v32 = vperm.slane %v3346_v16, %v4573_v29  ;;  %v3357_v63 = vrot.slane %v3320_v18, 4  ;;  %3619 = vmatpush.msrb.mxu3 %v3540_v1  ;;  %v3504_v62 = vld [vmem:[#allocation10 + $0xc8] sm:$0xff]  ;;  %v3529_v4 = vld [vmem:[#allocation10 + $0x190] sm:$0xff]  ;;  %v3498_v56 = vld [vmem:[#allocation10 + $0x98] sm:$0xff] }
 0x44b   : > { %v3368_v48 = vperm.slane %v3360_v47, %v4573_v29  ;;  %v3405_v61 = vrot.slane %v3392_v58, 4  ;;  %v3370_v46 = vsel %vm847_vm0, %v3369_v8, %v3328_v3  ;;  %v3382_v9 = vsel %vm847_vm0, %v3381_v52, %v3332_v57  ;;  %v3503_v57 = vld [vmem:[#allocation10 + $0xc0] sm:$0xff]  ;;  %v3534_v3 = vld [vmem:[#allocation10 + $0x1b8] sm:$0xff]  ;;  %3598 = vmatpush.msrb.mxu2 %v3504_v62  ;;  %3576 = vmatpush.msrb.mxu1 %v3533_v51  ;;  %v3532_v8 = vld [vmem:[#allocation10 + $0x1a8] sm:$0xff] }
 0x44c   : > { %v3397_v11 = vrot.slane %v3380_v12, 4  ;;  %v3358_v13 = vsel %vm847_vm0, %v3357_v63, %v3308_v44  ;;  %v3376_v24 = vperm.slane %v3370_v46, %v4573_v29  ;;  %v3388_v25 = vperm.slane %v3382_v9, %v4573_v29  ;;  %3620 = vmatpush.msrb.mxu3 %v3538_v53  ;;  %3552 = vmatpush.msrb.mxu0 %v3503_v57  ;;  %v3499_v44 = vld [vmem:[#allocation10 + $0xa0] sm:$0xff]  ;;  %v3530_v52 = vld [vmem:[#allocation10 + $0x198] sm:$0xff]  ;;  %v3496_v41 = vld [vmem:[#allocation10 + $0x88] sm:$0xff] }
 0x44d   : > { %v3406_v45 = vsel %vm847_vm0, %v3405_v61, %v3368_v48  ;;  %v3364_v37 = vperm.slane %v3358_v13, %v4573_v29  ;;  %v3395_v10 = vrot.slane %v3352_v32, 4  ;;  %v3399_v14 = vrot.slane %v3356_v35, 4  ;;  %3599 = vmatpush.msrb.mxu2 %v3502_v55  ;;  %3577 = vmatpush.msrb.mxu1 %v3531_v15  ;;  %v3495_v18 = vld [vmem:[#allocation10 + $0x80] sm:$0xff]  ;;  %v3528_v2 = vld [vmem:[#allocation10 + $0x188] sm:$0xff]  ;;  %v3525_v7 = vld [vmem:[#allocation10 + $0x170] sm:$0xff] }
 0x44e   : > { %v3398_v27 = vsel %vm847_vm0, %v3397_v11, %v3356_v35  ;;  %v3393_v23 = vrot.slane %v3376_v24, 4  ;;  %v3401_v59 = vrot.slane %v3388_v25, 4  ;;  %v3407_v40 = vrot.slane %v3368_v48, 4  ;;  %3621 = vmatpush.msrb.mxu3 %v3536_v0  ;;  %3553 = vmatpush.msrb.mxu0 %v3501_v28  ;;  %v3527_v60 = vld [vmem:[#allocation10 + $0x180] sm:$0xff]  ;;  %v3493_v35 = vld [vmem:[#allocation10 + $0x70] sm:$0xff]  ;;  %v3526_v16 = vld [vmem:[#allocation10 + $0x178] sm:$0xff] }
 0x44f   : > { %v3976_v50 = vpack.i.bf16 %v3406_v45, %v3398_v27  ;;  %v3403_v49 = vrot.slane %v3364_v37, 4  ;;  %v3400_v5 = vsel %vm847_vm0, %v3380_v12, %v3399_v14  ;;  %v3396_v29 = vsel %vm847_vm0, %v3376_v24, %v3395_v10  ;;  %3600 = vmatpush.msrb.mxu2 %v3500_v34  ;;  %3578 = vmatpush.msrb.mxu1 %v3529_v4  ;;  %v3491_v47 = vld [vmem:[#allocation10 + $0x60] sm:$0xff]  ;;  %v3524_v63 = vld [vmem:[#allocation10 + $0x168] sm:$0xff]  ;;  %v3489_v48 = vld [vmem:[#allocation10 + $0x50] sm:$0xff] }
 0x450   : > { %v3408_v21 = vsel %vm847_vm0, %v3392_v58, %v3407_v40  ;;  %v5802_v20 = vsel %vm847_vm0, %v3393_v23, %v3352_v32  ;;  %v5805_v19 = vsel %vm847_vm0, %v3401_v59, %v3364_v37  ;;  %3622 = vmatpush.msrb.mxu3 %v3534_v3  ;;  %3554 = vmatpush.msrb.mxu0 %v3499_v44  ;;  %v3494_v58 = vld [vmem:[#allocation10 + $0x78] sm:$0xff]  ;;  %v3523_v12 = vld [vmem:[#allocation10 + $0x160] sm:$0xff]  ;;  %v3492_v32 = vld [vmem:[#allocation10 + $0x68] sm:$0xff] }
 0x451   : > { %3977 = vrot.lane.b32.xlu1 %v3976_v50, %s4253_s24  ;;  %v3404_v22 = vsel %vm847_vm0, %v3388_v25, %v3403_v49  ;;  %v3981_v42 = vpack.i.bf16 %v3408_v21, %v3400_v5  ;;  %3601 = vmatpush.msrb.mxu2 %v3498_v56  ;;  %v3521_v61 = vld [vmem:[#allocation10 + $0x150] sm:$0xff]  ;;  %v3490_v46 = vld [vmem:[#allocation10 + $0x58] sm:$0xff]  ;;  %v3487_v11 = vld [vmem:[#allocation10 + $0x40] sm:$0xff] }
 0x452   : > { %v3971_v39 = vpack.i.bf16 %v3404_v22, %v3396_v29  ;;  %3623 = vmatpush.msrb.mxu3 %v3532_v8  ;;  %3555 = vmatpush.msrb.mxu0 %v3497_v31  ;;  %v3522_v9 = vld [vmem:[#allocation10 + $0x158] sm:$0xff]  ;;  %v3519_v13 = vld [vmem:[#allocation10 + $0x140] sm:$0xff]  ;;  %v3488_v24 = vld [vmem:[#allocation10 + $0x48] sm:$0xff] }
 0x453   : > { %3982 = vrot.lane.b32.xlu2 %v3981_v42, %s4254_s29  ;;  %3579 = vmatpush.msrb.mxu1 %v3527_v60  ;;  %v3520_v25 = vld [vmem:[#allocation10 + $0x148] sm:$0xff]  ;;  %v3485_v45 = vld [vmem:[#allocation10 + $0x30] sm:$0xff]  ;;  %v3486_v10 = vld [vmem:[#allocation10 + $0x38] sm:$0xff]  ;;  %s4190_s29 = scalar_lea.hbm %s5871_s5, 64 }
 0x454   : > { %3972 = vrot.lane.b32.xlu0 %v3971_v39, %s4255_s28  ;;  %3624 = vmatpush.msrb.mxu3 %v3530_v52  ;;  %v3517_v37 = vld [vmem:[#allocation10 + $0x130] sm:$0xff]  ;;  %v3518_v14 = vld [vmem:[#allocation10 + $0x138] sm:$0xff]  ;;  %v3483_v27 = vld [vmem:[#allocation10 + $0x20] sm:$0xff]  ;;  %p4192_p9 = scmp.lt.s32.totalorder %s4190_s29, %s4186_s22 }
 0x455   : > { %3556 = vmatpush.msrb.mxu0 %v3495_v18  ;;  %3602 = vmatpush.msrb.mxu2 %v3496_v41  ;;  %v3515_v23 = vld [vmem:[#allocation10 + $0x120] sm:$0xff]  ;;  %v3484_v59 = vld [vmem:[#allocation10 + $0x28] sm:$0xff]  ;;  %v3481_v50 = vld [vmem:[#allocation10 + $0x10] sm:$0xff] }
 0x456   : > { %3625 = vmatpush.msrb.mxu3 %v3528_v2  ;;  %3580 = vmatpush.msrb.mxu1 %v3525_v7  ;;  %v3516_v40 = vld [vmem:[#allocation10 + $0x128] sm:$0xff]  ;;  %v3513_v49 = vld [vmem:[#allocation10 + $0x110] sm:$0xff]  ;;  %v3482_v5 = vld [vmem:[#allocation10 + $0x18] sm:$0xff]  ;;  %p4193_p2 = por %p4192_p9, %p4191_p11 }
 0x457   : > { %3557 = vmatpush.msrb.mxu0 %v3493_v35  ;;  %3603 = vmatpush.msrb.mxu2 %v3494_v58  ;;  %v3514_v21 = vld [vmem:[#allocation10 + $0x118] sm:$0xff]  ;;  %v3479_v29 = vld [vmem:[#allocation10] sm:$0xff]  ;;  %v3480_v42 = vld [vmem:[#allocation10 + $0x8] sm:$0xff] }
 0x458   : > { %3626 = vmatpush.msrb.mxu3 %v3526_v16  ;;  %3581 = vmatpush.msrb.mxu1 %v3523_v12  ;;  %v3511_v22 = vld [vmem:[#allocation10 + $0x100] sm:$0xff]  ;;  %v3512_v39 = vld [vmem:[#allocation10 + $0x108] sm:$0xff]  ;;  %p4194_p10 = pnand %p4193_p2, %p4189_p8 }
 0x459   : > { %3558 = vmatpush.msrb.mxu0 %v3491_v47  ;;  %3604 = vmatpush.msrb.mxu2 %v3492_v32 }
 0x45a   : > { %3627 = vmatpush.msrb.mxu3 %v3524_v63  ;;  %3582 = vmatpush.msrb.mxu1 %v3521_v61 }
 0x45b   : > { %3559 = vmatpush.msrb.mxu0 %v3489_v48  ;;  %3605 = vmatpush.msrb.mxu2 %v3490_v46 }
 0x45c   : > { %3628 = vmatpush.msrb.mxu3 %v3522_v9  ;;  %3583 = vmatpush.msrb.mxu1 %v3519_v13 }
 0x45d   : > { %3560 = vmatpush.msrb.mxu0 %v3487_v11  ;;  %3606 = vmatpush.msrb.mxu2 %v3488_v24 }
 0x45e   : > { %3629 = vmatpush.msrb.mxu3 %v3520_v25  ;;  %3584 = vmatpush.msrb.mxu1 %v3517_v37 }
 0x45f   : > { %3561 = vmatpush.msrb.mxu0 %v3485_v45  ;;  %3607 = vmatpush.msrb.mxu2 %v3486_v10 }
 0x460   : > { %3630 = vmatpush.msrb.mxu3 %v3518_v14  ;;  %3585 = vmatpush.msrb.mxu1 %v3515_v23 }
 0x461   : > { %3562 = vmatpush.msrb.mxu0 %v3483_v27  ;;  %3608 = vmatpush.msrb.mxu2 %v3484_v59 }
 0x462   : > { %3631 = vmatpush.msrb.mxu3 %v3516_v40  ;;  %3586 = vmatpush.msrb.mxu1 %v3513_v49 }
 0x463   : > { %3563 = vmatpush.msrb.mxu0 %v3481_v50  ;;  %3609 = vmatpush.msrb.mxu2 %v3482_v5 }
 0x464   : > { %3632 = vmatpush.msrb.mxu3 %v3514_v21  ;;  %3587 = vmatpush.msrb.mxu1 %v3511_v22 }
 0x465   : > { %3564 = vmatpush.msrb.mxu0 %v3479_v29  ;;  %3610 = vmatpush.msrb.mxu2 %v3480_v42 }
 0x466   : > { %3633 = vmatpush.msrb.mxu3 %v3512_v39 }
 0x47e   : > { %v3968_v1 = vpop.permute.xlu2 %3967 }
 0x47f   : > { %v3970_v53 = vunpack.i.h.bf16 %v3968_v1  ;;  %v3969_v57 = vunpack.i.l.bf16 %v3968_v1 }
 0x493   : > { %v3958_v17 = vpop.permute.xlu1 %3957 }
 0x494   : > { %v3960_v33 = vunpack.i.h.bf16 %v3958_v17  ;;  %v3959_v6 = vunpack.i.l.bf16 %v3958_v17 }
 0x496   : > { %v3465_v30 = vsel %vm2271_vm1, %v5709_v43, %v3960_v33  ;;  %v3457_v62 = vsel %vm2271_vm1, %v5705_v26, %v3959_v6 }
 0x497   : > { %v3963_v36 = vpop.permute.xlu0 %3962 }
 0x498   : > { %v3965_v54 = vunpack.i.h.bf16 %v3963_v36  ;;  %v3964_v38 = vunpack.i.l.bf16 %v3963_v36 }
 0x49a   : > { %v3460_v0 = vsel %vm3459_vm3, %v3457_v62, %v3964_v38  ;;  %v3467_v28 = vsel %vm3459_vm3, %v3465_v30, %v3965_v54 }
 0x49b   : > { %v3463_v51 = vsel %vm3462_vm4, %v3460_v0, %v3969_v57  ;;  %v3469_v55 = vsel %vm3462_vm4, %v3467_v28, %v3970_v53 }
 0x49c   : > { %3565 = vmatmul.f32.vlgmr.msrb.gmra.mxu0 %v3463_v51  ;;  %3588 = vmatmul.f32.vlgmr.msrb.gmra.mxu1 %v3469_v55 }
 0x49d   : > { %3611 = vmatmul.f32.vlgmr.msrb.gmra.mxu2 %v3463_v51  ;;  %3634 = vmatmul.f32.vlgmr.msrb.gmra.mxu3 %v3469_v55 }
 0x4ad   : > { %v3983_v44 = vpop.permute.xlu2 %3982 }
 0x4ae   : > { %v3985_v26 = vunpack.i.h.bf16 %v3983_v44  ;;  %v3984_v4 = vunpack.i.l.bf16 %v3983_v44 }
 0x4c3   : > { %v3978_v3 = vpop.permute.xlu1 %3977 }
 0x4c4   : > { %v3980_v15 = vunpack.i.h.bf16 %v3978_v3  ;;  %v3979_v34 = vunpack.i.l.bf16 %v3978_v3 }
 0x4c6   : > { %v3973_v43 = vpop.permute.xlu0 %3972 }
 0x4c7   : > { %v3975_v8 = vunpack.i.h.bf16 %v3973_v43  ;;  %v3974_v31 = vunpack.i.l.bf16 %v3973_v43 }
 0x4c9   : > { %v3458_v56 = vsel %vm2271_vm1, %v5802_v20, %v3974_v31  ;;  %v3466_v52 = vsel %vm2271_vm1, %v5805_v19, %v3975_v8  ;;  %v3543_v20 = vld [vmem:[%s5870_s4] sm:$0x3] }
 0x4ca   : > { %v3461_v18 = vsel %vm3459_vm3, %v3458_v56, %v3979_v34  ;;  %v3468_v60 = vsel %vm3459_vm3, %v3466_v52, %v3980_v15  ;;  %v3545_v35 = vperm.slane %v3543_v20, 0  ;;  %v3546_v47 = vperm.slane %v3543_v20, 1 }
 0x4cb   : > { %v3464_v41 = vsel %vm3462_vm4, %v3461_v18, %v3984_v4  ;;  %v3470_v2 = vsel %vm3462_vm4, %v3468_v60, %v3985_v26 }
 0x4cc   : > { %3568 = vmatmul.f32.gmra.mxu0 %v3464_v41  ;;  %3591 = vmatmul.f32.gmra.mxu1 %v3470_v2 }
 0x4cd   : > { %3614 = vmatmul.f32.gmra.mxu2 %v3464_v41  ;;  %3637 = vmatmul.f32.gmra.mxu3 %v3470_v2 }
 0x519   : > { %v3566_v19 = vpop.f32.mrf.mxu0  ;;  %v3589_v58 = vpop.f32.mrf.mxu1 }
 0x51a   : > { %v3567_v7 = vadd.f32 %v3566_v19, %v3545_v35 }
 0x51c   : > { %v3590_v16 = vadd.f32 %v3589_v58, %v3567_v7 }
 0x51e   : > { %3641 = vst [vmem:[%s293_s26] sm:$0xff] %v3590_v16 }
 0x520   : > { %v3612_v12 = vpop.f32.mrf.mxu2  ;;  %v3635_v63 = vpop.f32.mrf.mxu3 }
 0x521   : > { %v3613_v32 = vadd.f32 %v3612_v12, %v3546_v47 }
 0x523   : > { %v3636_v48 = vadd.f32 %v3635_v63, %v3613_v32 }
 0x525   : > { %3642 = vst [vmem:[%s293_s26 + $0x8] sm:$0xff] %v3636_v48 }
 0x549   : > { %v3569_v61 = vpop.f32.mrf.mxu0  ;;  %v3592_v9 = vpop.f32.mrf.mxu1 }
 0x54a   : > { %v3570_v46 = vadd.f32 %v3569_v61, %v3545_v35 }
 0x54c   : > { %v3593_v11 = vadd.f32 %v3592_v9, %v3570_v46 }
 0x54e   : > { %3643 = vst [vmem:[%s293_s26 + $0x10] sm:$0xff] %v3593_v11 }
 0x550   : > { %v3615_v13 = vpop.f32.mrf.mxu2  ;;  %v3638_v25 = vpop.f32.mrf.mxu3 }
 0x551   : > { %v3616_v24 = vadd.f32 %v3615_v13, %v3546_v47 }
 0x553   : > { %v3639_v45 = vadd.f32 %v3638_v25, %v3616_v24 }
 0x555   : > { %3644 = vst [vmem:[%s293_s26 + $0x18] sm:$0xff] %v3639_v45 }
 0x556   : > { %4197 = shalt.err (!%p4194_p10)
}
 0x557   : > { %s4258_s17 = smov 256   ;;  %s4259_s23 = smov 16  }
 0x558   : > { %3852 = dma.vmem_to_hbm [thread:$0]  (%p4375_p3), %s3660_s15, 512, %s3662_s7, %s3646_s27, %s4258_s17, %s4258_s17, %s4259_s23  }
 0x559 PF: > { %s3676_s26 = sand.u32 1, %s4232_s18   ;;  %p5895_p12 = scmp.ge.s32.totalorder %s4244_s21, 2 }
 0x55a   : > { %s3677_s6 = scalar_lea.sflag [#allocation6], %s3676_s26 }
 0x55b   : > { %p3869_p13 = pnand %p5895_p12, %p4325_p6 }
 0x55d   : > { %p3870_p0 = pneg %p3869_p13 }
 0x55f   : > { %4227 = dma.done.wait (%p3870_p0), %s3677_s6, 512  }
 0x560   : > { %4229 = vsyncadd (%p3870_p0), %s3677_s6, 4294966784  ;;  %p20_p5 = scmp.ge.s32.totalorder %s4362_s30, 4   ;;  %s5896_s18 = smov %s4236_s19 }
 0x561   : > { %s5897_s19 = smov %s4240_s20  ;;  %s5898_s20 = smov %s4371_s9 }
 0x562   : > { %s5899_s21 = smov %s4362_s30  ;;  %22 = sbr.rel (!%p20_p5) target bundleno = 7 (0x7), region = 97 }
 0x567   :  { %3683 = vsyncpa [#allocation5], 1 }
 0x568   :  { %3685 = vsyncpa [#allocation5 + $0x1], 1 }
 0x569   :  { %3686 = vsyncpa [#allocation8], 1 }
 0x56a   :  { %3687 = vsyncpa [#allocation11], 1 }
 0x56b   :  { %3688 = vsyncpa [#allocation6], 1 }
 0x56c   :  { %3690 = vsyncpa [#allocation6 + $0x1], 1 }

</bundles_post_ra>
